<compile_context>
chip_gen: v7x
topology: tpu7x:2x2x1
jax: 0.10.0
libtpu: 0.0.40
codegen_flags: <defaults>
</compile_context>

<pallas_src>
import functools

import jax
import jax.numpy as jnp
from jax.experimental import pallas as pl
from jax.experimental.pallas import tpu as pltpu

IMG_SIZE = 64
NC = 3
INPUT_DIM_DICT = {"ResNet34": 512, "ResNet50": 2048}

NPAD = 128   # num_classes padded to a lane-dense width
TN = 3072    # fc1 output-feature tile: 12288 / 3072 = 4 grid steps


def _fused_fc_kernel(x_ref, w1_ref, b1_ref, w12_ref, bc_ref, out_ref, feat_ref):
    """One grid step handles one TN-wide slice of the 12288 hidden features.

      feat_tile = x @ w1[:, tile] + b1[tile]   (written to `feature`)
      out_tile  = x @ W12 + bc                 (tiny folded fc2; identical on
                                                every step, wrapper keeps one)
    """
    x = x_ref[...]

    # fc1 tile on the MXU: bf16 inputs, f32 accumulation, f32 bias.
    feat = jnp.dot(x, w1_ref[0],
                   preferred_element_type=jnp.float32) + b1_ref[...]
    feat_ref[...] = feat.astype(feat_ref.dtype)

    # Folded fc2: out = x @ (w1 @ w2) + (b1 @ w2 + b2).  Recomputed per step
    # (negligible) so the grid axis stays fully parallel.
    out = jnp.dot(x, w12_ref[...],
                  preferred_element_type=jnp.float32) + bc_ref[...]
    out_ref[...] = out.astype(out_ref.dtype)


def fused_fc_forward(x, w1_tiles, b1, w12, bc, *, tn=TN):
    """(out_tiles, feature) for the two-layer FC head.

    x        : [M, K]        bf16
    w1_tiles : [NT, K, tn]   bf16   (tile-major fc1 weight, contiguous DMA)
    b1       : [1, NT*tn]    f32
    w12      : [K, NP]       bf16   (folded fc1@fc2 weight)
    bc       : [1, NP]       f32    (folded bias)
    Returns out_tiles [M, NT*NP] (every NP-wide block identical) and
    feature [M, NT*tn].
    """
    M, K = x.shape
    NT, K1, tn_ = w1_tiles.shape
    K2, NP = w12.shape
    H = NT * tn
    assert K == K1 == K2 and tn_ == tn
    assert b1.shape == (1, H) and bc.shape == (1, NP)

    flops = 2 * M * K * H + NT * 2 * M * K * NP
    bytes_accessed = (x.size * x.dtype.itemsize
                      + w1_tiles.size * w1_tiles.dtype.itemsize
                      + b1.size * b1.dtype.itemsize
                      + w12.size * w12.dtype.itemsize
                      + bc.size * bc.dtype.itemsize
                      + M * H * 4 + M * NT * NP * 4)

    out_tiles, feature = pl.pallas_call(
        _fused_fc_kernel,
        out_shape=(jax.ShapeDtypeStruct((M, NT * NP), jnp.float32),
                   jax.ShapeDtypeStruct((M, H), jnp.float32)),
        grid_spec=pltpu.PrefetchScalarGridSpec(
            num_scalar_prefetch=0,
            grid=(NT,),
            in_specs=[
                pl.BlockSpec((M, K), lambda j: (0, 0)),      # x (resident)
                pl.BlockSpec((1, K, tn), lambda j: (j, 0, 0)),  # w1 tile (contig)
                pl.BlockSpec((1, tn), lambda j: (0, j)),     # b1 tile
                pl.BlockSpec((K, NP), lambda j: (0, 0)),     # W12 (resident)
                pl.BlockSpec((1, NP), lambda j: (0, 0)),     # bc  (resident)
            ],
            out_specs=[
                pl.BlockSpec((M, NP), lambda j: (0, j)),     # out tile
                pl.BlockSpec((M, tn), lambda j: (0, j)),     # feature tile
            ],
        ),
        compiler_params=pltpu.CompilerParams(
            dimension_semantics=("parallel",),
        ),
        cost_estimate=pl.CostEstimate(flops=flops, transcendentals=0,
                                      bytes_accessed=bytes_accessed),
    )(x, w1_tiles, b1, w12, bc)
    return out_tiles, feature


class ResNetKeeptrainFCPallas:
    """JAX/Pallas re-implementation of ResNet_keeptrain_fc's forward pass."""

    def __init__(self, resnet_name, num_classes=10, seed=0):
        input_dim = INPUT_DIM_DICT[resnet_name]
        hidden = NC * IMG_SIZE * IMG_SIZE  # 12288
        assert hidden % TN == 0
        self.input_dim = input_dim
        self.hidden = hidden
        self.num_classes = num_classes

        key = jax.random.PRNGKey(seed)
        k1, k2, k3, k4 = jax.random.split(key, 4)

        # PyTorch nn.Linear default init: U(-1/sqrt(fan_in), 1/sqrt(fan_in)).
        s1 = 1.0 / float(input_dim) ** 0.5
        s2 = 1.0 / float(hidden) ** 0.5

        # Weights stored [K, N] (transposed from torch's [out, in]).
        w1 = jax.random.uniform(k1, (input_dim, hidden), jnp.float32, -s1, s1)
        b1 = jax.random.uniform(k2, (1, hidden), jnp.float32, -s1, s1)
        w2 = jax.random.uniform(k3, (hidden, num_classes), jnp.float32, -s2, s2)
        b2 = jax.random.uniform(k4, (1, num_classes), jnp.float32, -s2, s2)

        w1_bf16 = w1.astype(jnp.bfloat16)
        nt = hidden // TN
        # Tile-major fc1 weight: [NT, K, TN] so each grid step's DMA is one
        # contiguous ~3 MiB read.
        self.w1_tiles = (w1_bf16.reshape(input_dim, nt, TN)
                         .transpose(1, 0, 2))
        self.b1 = b1

        # Fold fc2 into fc1 for the `out` path (removes w2 from the HBM
        # stream).  Fold uses the bf16-quantized w1 so `feature @ w2` and
        # `x @ W12` agree up to the bf16 rounding of W12.
        w12 = w1_bf16.astype(jnp.float32) @ w2                # [K, nc]
        bc = b1 @ w2 + b2                                     # [1, nc]
        self.w12 = jnp.zeros((input_dim, NPAD), jnp.bfloat16).at[
            :, :num_classes].set(w12.astype(jnp.bfloat16))
        self.bc = jnp.zeros((1, NPAD), jnp.float32).at[
            :, :num_classes].set(bc)

        # Kept only for the pure-JAX reference check (true un-folded fc2).
        self.w1_f32 = w1_bf16.astype(jnp.float32)
        self.w2_f32 = w2
        self.b2_f32 = b2

    @functools.partial(jax.jit, static_argnums=0)
    def __call__(self, x):
        out_tiles, feature = fused_fc_forward(
            x.astype(jnp.bfloat16), self.w1_tiles, self.b1, self.w12, self.bc)
        # Every NPAD-wide block of out_tiles holds the same `out`; keep the
        # first and drop the class padding.
        return out_tiles[:, :self.num_classes], feature


def _reference(x, model):
    # True module semantics on the same bf16-quantized x / w1; fc2 in f32.
    xb = x.astype(jnp.bfloat16).astype(jnp.float32)
    feature = xb @ model.w1_f32 + model.b1
    out = feature @ model.w2_f32 + model.b2_f32
    return out, feature


if __name__ == "__main__":
    model = ResNetKeeptrainFCPallas("ResNet34", num_classes=10, seed=0)

    batch = 2
    x = jax.random.normal(jax.random.PRNGKey(0), (batch, model.input_dim),
                          dtype=jnp.float32)

    out, feature = model(x)
    jax.block_until_ready((out, feature))

    ref_out, ref_feature = _reference(x, model)
    assert out.shape == (batch, 10)
    assert feature.shape == (batch, NC * IMG_SIZE * IMG_SIZE)
    # bf16 weights/activations inside the kernel -> relaxed tolerances.
    assert jnp.allclose(feature, ref_feature, atol=2e-2, rtol=2e-2)
    assert jnp.allclose(out, ref_out, atol=5e-2, rtol=5e-2)

    print("KERNEL_OK")
</pallas_src>

<mosaic_0001>
module attributes {stable_mosaic.version = 11 : i64} {
  func.func @_fused_fc_kernel(%arg0: i32, %arg1: memref<2x512xbf16, #tpu.memory_space<vmem>>, %arg2: memref<1x512x3072xbf16, #tpu.memory_space<vmem>>, %arg3: memref<1x3072xf32, #tpu.memory_space<vmem>>, %arg4: memref<512x128xbf16, #tpu.memory_space<vmem>>, %arg5: memref<1x128xf32, #tpu.memory_space<vmem>>, %arg6: memref<2x128xf32, #tpu.memory_space<vmem>>, %arg7: memref<2x3072xf32, #tpu.memory_space<vmem>>) attributes {dimension_semantics = [#tpu.dimension_semantics<parallel>], iteration_bounds = array<i64: 4>, scalar_prefetch = 0 : i64, scratch_operands = 0 : i64, tpu.core_type = #tpu.core_type<tc>, window_params = [{pipeline_mode = #tpu.pipeline_mode<synchronous>, transform_indices = @transform_0, window_bounds = array<i64: 2, 512>}, {transform_indices = @transform_1, window_bounds = array<i64: 1, 512, 3072>}, {transform_indices = @transform_2, window_bounds = array<i64: 1, 3072>}, {pipeline_mode = #tpu.pipeline_mode<synchronous>, transform_indices = @transform_3, window_bounds = array<i64: 512, 128>}, {pipeline_mode = #tpu.pipeline_mode<synchronous>, transform_indices = @transform_4, window_bounds = array<i64: 1, 128>}, {transform_indices = @transform_5, window_bounds = array<i64: 2, 128>}, {transform_indices = @transform_6, window_bounds = array<i64: 2, 3072>}]} {
    %c0 = arith.constant 0 : index
    %c0_0 = arith.constant 0 : index
    %0 = vector.load %arg1[%c0, %c0_0] : memref<2x512xbf16, #tpu.memory_space<vmem>>, vector<2x512xbf16>
    %c0_1 = arith.constant 0 : index
    %c0_2 = arith.constant 0 : index
    %c0_3 = arith.constant 0 : index
    %1 = vector.load %arg2[%c0_1, %c0_2, %c0_3] : memref<1x512x3072xbf16, #tpu.memory_space<vmem>>, vector<1x512x3072xbf16>
    %2 = vector.shape_cast %1 : vector<1x512x3072xbf16> to vector<512x3072xbf16>
    %cst = arith.constant dense<0.000000e+00> : vector<2x3072xf32>
    %3 = tpu.matmul %0, %2, %cst {dimension_numbers = #tpu.dot_dimension_numbers<[1], [0], [0], [1], [0, 0, 1, 1], [], []>} : vector<2x512xbf16>, vector<512x3072xbf16>, vector<2x3072xf32> -> vector<2x3072xf32>
    %c0_4 = arith.constant 0 : index
    %c0_5 = arith.constant 0 : index
    %4 = vector.load %arg3[%c0_4, %c0_5] : memref<1x3072xf32, #tpu.memory_space<vmem>>, vector<1x3072xf32>
    %5 = vector.broadcast %4 : vector<1x3072xf32> to vector<2x3072xf32>
    %6 = arith.addf %3, %5 : vector<2x3072xf32>
    %c0_6 = arith.constant 0 : index
    %c0_7 = arith.constant 0 : index
    %7 = vector.load %arg7[%c0_6, %c0_7] : memref<2x3072xf32, #tpu.memory_space<vmem>>, vector<2x3072xf32>
    tpu.vector_store %arg7[%c0_6, %c0_7], %6 {strides = array<i32>} : memref<2x3072xf32, #tpu.memory_space<vmem>>, vector<2x3072xf32>,
    %c0_8 = arith.constant 0 : index
    %c0_9 = arith.constant 0 : index
    %8 = vector.load %arg4[%c0_8, %c0_9] : memref<512x128xbf16, #tpu.memory_space<vmem>>, vector<512x128xbf16>
    %cst_10 = arith.constant dense<0.000000e+00> : vector<2x128xf32>
    %9 = tpu.matmul %0, %8, %cst_10 {dimension_numbers = #tpu.dot_dimension_numbers<[1], [0], [0], [1], [0, 0, 1, 1], [], []>} : vector<2x512xbf16>, vector<512x128xbf16>, vector<2x128xf32> -> vector<2x128xf32>
    %c0_11 = arith.constant 0 : index
    %c0_12 = arith.constant 0 : index
    %10 = vector.load %arg5[%c0_11, %c0_12] : memref<1x128xf32, #tpu.memory_space<vmem>>, vector<1x128xf32>
    %11 = vector.broadcast %10 : vector<1x128xf32> to vector<2x128xf32>
    %12 = arith.addf %9, %11 : vector<2x128xf32>
    %c0_13 = arith.constant 0 : index
    %c0_14 = arith.constant 0 : index
    %13 = vector.load %arg6[%c0_13, %c0_14] : memref<2x128xf32, #tpu.memory_space<vmem>>, vector<2x128xf32>
    tpu.vector_store %arg6[%c0_13, %c0_14], %12 {strides = array<i32>} : memref<2x128xf32, #tpu.memory_space<vmem>>, vector<2x128xf32>,
    return
  }
  func.func @transform_0(%arg0: i32) -> (i32, i32) {
    %c0_i32 = arith.constant 0 : i32
    %c0_i32_0 = arith.constant 0 : i32
    %c0_i32_1 = arith.constant 0 : i32
    return %c0_i32, %c0_i32_0 : i32, i32
  }
  func.func @transform_1(%arg0: i32) -> (i32, i32, i32) {
    %c0_i32 = arith.constant 0 : i32
    %c0_i32_0 = arith.constant 0 : i32
    %c0_i32_1 = arith.constant 0 : i32
    return %arg0, %c0_i32, %c0_i32_0 : i32, i32, i32
  }
  func.func @transform_2(%arg0: i32) -> (i32, i32) {
    %c0_i32 = arith.constant 0 : i32
    %c0_i32_0 = arith.constant 0 : i32
    return %c0_i32, %arg0 : i32, i32
  }
  func.func @transform_3(%arg0: i32) -> (i32, i32) {
    %c0_i32 = arith.constant 0 : i32
    %c0_i32_0 = arith.constant 0 : i32
    %c0_i32_1 = arith.constant 0 : i32
    return %c0_i32, %c0_i32_0 : i32, i32
  }
  func.func @transform_4(%arg0: i32) -> (i32, i32) {
    %c0_i32 = arith.constant 0 : i32
    %c0_i32_0 = arith.constant 0 : i32
    %c0_i32_1 = arith.constant 0 : i32
    return %c0_i32, %c0_i32_0 : i32, i32
  }
  func.func @transform_5(%arg0: i32) -> (i32, i32) {
    %c0_i32 = arith.constant 0 : i32
    %c0_i32_0 = arith.constant 0 : i32
    return %c0_i32, %arg0 : i32, i32
  }
  func.func @transform_6(%arg0: i32) -> (i32, i32) {
    %c0_i32 = arith.constant 0 : i32
    %c0_i32_0 = arith.constant 0 : i32
    return %c0_i32, %arg0 : i32, i32
  }
}

</mosaic_0001>

<bundles_post_ra>
// kernel: a_call__.1
= control target key start
LH: loop header
LB: loop body
LE: loop exit
PB: predicated region body
PF: predicated region fallthrough
CT: control target
= control target key end

     0   :  { %12 = vsyncpa [#allocation3], 0  ;;  %s8892_s0 = inlined_call_operand.vmem [shape: bf16[2,512], index: 0, kind: input, shape index: {}]   ;;  %s8893_s1 = inlined_call_operand.vmem [shape: bf16[4,512,3072], index: 1, kind: input, shape index: {}]   ;;  %s8894_s2 = inlined_call_operand.vmem [shape: f32[1,12288], index: 2, kind: input, shape index: {}]   ;;  %s8895_s3 = inlined_call_operand.vmem [shape: bf16[512,128], index: 3, kind: input, shape index: {}]   ;;  %s8896_s4 = inlined_call_operand.vmem [shape: f32[1,128], index: 4, kind: input, shape index: {}]   ;;  %s8897_s5 = inlined_call_operand.vmem [shape: f32[2,512], index: 5, kind: output, shape index: {0}]   ;;  %s8898_s6 = inlined_call_operand.hbm [shape: f32[2,12288], index: 6, kind: output, shape index: {1}]  }
   0x1   :  { %14 = vsyncpa [#allocation3 + $0x1], 0  ;;  %s7731_s21 = smov 0   ;;  %s7733_s22 = smov 0  }
   0x2   :  { %s7735_s23 = smov 0   ;;  %s7737_s24 = smov 0  }
   0x3 LB: > { %s7752_s25 = sadd.s32 4294967295, %s7691_s24   ;;  %s6626_s26 = sadd.s32 4294967294, %s7691_s24   ;;  %s7691_s24 = sphi %s7737_s24, %s8905_s24   ;;  %s7687_s23 = sphi %s7735_s23, %s8904_s23   ;;  %s7683_s22 = sphi %s7733_s22, %s8903_s22   ;;  %s7679_s21 = sphi %s7731_s21, %s8902_s21  }
   0x4   : > { %s7756_s27 = sadd.s32 1, %s7691_s24   ;;  %s168_s28 = sadd.s32 1, %s7687_s23 }
   0x5   : > { %s165_s29 = ssub.s32 %s7691_s24, %s7756_s27  ;;  %p178_p0 = scmp.ne.s32.totalorder %s7687_s23, %s7683_s22 }
   0x6   : > { %p166_p1 = scmp.eq.s32.totalorder %s165_s29, 0  ;;  %p179_p2 = scmp.eq.s32.totalorder %s7752_s25, 3 }
   0x7   : > { %p184_p3 = scmp.ne.s32.totalorder %s7683_s22, %s7679_s21  ;;  %p185_p4 = scmp.eq.s32.totalorder %s6626_s26, 3 }
   0x8   : > { %s7767_s30 = scalar_select %p166_p1, %s7687_s23, %s168_s28  }
   0x9   : > { %p7769_p5 = por %p179_p2, %p178_p0  ;;  %p7773_p6 = por %p185_p4, %p184_p3 }
   0xa   : > { %p6629_p7 = scmp.ge.s32.totalorder %s7691_s24, 1  ;;  %p228_p8 = scmp.lt.s32.totalorder %s7691_s24, 5 }
   0xc   : > { %p229_p9 = pnand %p6629_p7, %p228_p8 }
   0xd   : > { %p266_p10 = scmp.lt.s32.totalorder (!%p229_p9), %s7752_s25, 3  ;;  %v6632_v0 = vld.sshfl [vmem:[%s8892_s0] sm:$0x33 pattern:$0x75316420] (!%p229_p9)  ;;  %v1057_v1 = vlaneseq (!%p229_p9)  ;;  %s271_s16 = smul.u32 (!%p229_p9), 24, %s7752_s25 }
   0xe   : > { %232 = sbr.rel (%p229_p9) target bundleno = 1050 (0x41a), region = 40  ;;  %v7693_v3 = vmov (!%p229_p9), 1966171168   ;;  %v1185_v5 = vcombine.high (!%p229_p9), %v6632_v0, %v6632_v0  ;;  %s263_s26 = sand.u32 (!%p229_p9), 1, %s7683_s22  }
   0xf   : > { %v7786_v2 = vshrl.u32 (!%p229_p9), %v1057_v1, 7  ;;  %v1187_v4 = vunpack.c.l.s4 (!%p229_p9), %v7693_v3  ;;  %p8162_p11 = scmp.lt.s32.totalorder (!%p229_p9), %s271_s16, 95  ;;  %s7554_s28 = smul.u32 (!%p229_p9), 48, %s263_s26 }
  0x10   : > { %s7695_s13 = smov (!%p229_p9), [#allocation2]  }
  0x11   : > { %v1188_v6 = vunpack.c.0.s8 (!%p229_p9), %v1187_v4  ;;  %s8236_s29 = scalar_lea.vmem (!%p229_p9), [#allocation2], %s7554_s28  ;;  %s7633_s14 = sshll.u32 (!%p229_p9), %s7695_s13, 4  ;;  %s7634_s14 = int_to_ptr.vmem [resolvable:$false] %s7633_s14 }
  0x12   : > { %s6534_s19 = sshll.u32 (!%p229_p9), %s8236_s29, 4  ;;  %s8842_s19 = int_to_ptr.vmem [resolvable:$true] %s6534_s19 }
  0x13   : > { %v1191_v7 = vsub.s32 (!%p229_p9), %v1188_v6, %v7786_v2  ;;  %p7636_p1 = scmp.lt.s32.totalorder (!%p229_p9), %s8842_s19, %s7634_s14 }
  0x15   : > { %s7784_s11 = scalar_select %p266_p10, %s7752_s25, 3  ;;  %v7801_v16 = vrot.slane %v1185_v5, %v1191_v7  ;;  %v7803_v17 = vrot.slane %v6632_v0, %v1191_v7 }
  0x16   : > { %s8907_s16 = smov (!%p8162_p11, %s271_s16), 95 }
  0x17   : > { %s7555_s12 = smul.u32 6144, %s7784_s11  ;;  %5078 = vmatprep.mubr.bf16.mxu0 %v7801_v16  ;;  %5160 = vmatprep.mubr.bf16.mxu1 %v7801_v16  ;;  %s8183_s20 = scalar_lea.vmem %s8894_s2, %s8907_s16 }
  0x19   : > { %s7792_s15 = scalar_lea.vmem %s8893_s1, %s7555_s12  ;;  %s6517_s12 = scalar_lea.sflag [#allocation3], %s263_s26 }
  0x1a   : > { %v283_v8 = vld [vmem:[%s7792_s15] sm:$0xff]  ;;  %v284_v10 = vld [vmem:[%s7792_s15 + $0x8] sm:$0xff] }
  0x1b   : > { %v295_v9 = vld [vmem:[%s7792_s15 + $0x60] sm:$0xff]  ;;  %v296_v12 = vld [vmem:[%s7792_s15 + $0x68] sm:$0xff] }
  0x1c   : > { %v6634_v11 = vcombine.high %v283_v8, %v295_v9  ;;  %v6633_v13 = vcombine.low %v283_v8, %v295_v9  ;;  %v307_v14 = vld [vmem:[%s7792_s15 + $0xc0] sm:$0xff]  ;;  %v6636_v18 = vcombine.high %v284_v10, %v296_v12  ;;  %v6635_v19 = vcombine.low %v284_v10, %v296_v12  ;;  %v308_v21 = vld [vmem:[%s7792_s15 + $0xc8] sm:$0xff] }
  0x1d   : > { %v319_v15 = vld [vmem:[%s7792_s15 + $0x120] sm:$0xff]  ;;  %v320_v22 = vld [vmem:[%s7792_s15 + $0x128] sm:$0xff] }
  0x1e   : > { %v6658_v20 = vcombine.high %v307_v14, %v319_v15  ;;  %v331_v23 = vld [vmem:[%s7792_s15 + $0x180] sm:$0xff]  ;;  %5046 = vmatprep.subr.bf16.mxu0 %v6634_v11  ;;  %v6660_v24 = vcombine.high %v308_v21, %v320_v22  ;;  %v332_v26 = vld [vmem:[%s7792_s15 + $0x188] sm:$0xff]  ;;  %5128 = vmatprep.subr.bf16.mxu1 %v6636_v18  ;;  %v6657_v28 = vcombine.low %v307_v14, %v319_v15 }
  0x1f   : > { %v343_v25 = vld [vmem:[%s7792_s15 + $0x1e0] sm:$0xff]  ;;  %v344_v27 = vld [vmem:[%s7792_s15 + $0x1e8] sm:$0xff]  ;;  %5047 = vmatpush1.bf16.msra.mxu0 %v6633_v13  ;;  %5129 = vmatpush1.bf16.msra.mxu1 %v6635_v19  ;;  %v6659_v29 = vcombine.low %v308_v21, %v320_v22 }
  0x20   : > { %5048 = vmatprep.subr.bf16.mxu0 %v6658_v20  ;;  %v6682_v30 = vcombine.high %v331_v23, %v343_v25  ;;  %5130 = vmatprep.subr.bf16.mxu1 %v6660_v24  ;;  %v6684_v31 = vcombine.high %v332_v26, %v344_v27  ;;  %v355_v32 = vld [vmem:[%s7792_s15 + $0x240] sm:$0xff]  ;;  %v356_v34 = vld [vmem:[%s7792_s15 + $0x248] sm:$0xff]  ;;  %v6681_v36 = vcombine.low %v331_v23, %v343_v25 }
  0x21   : > { %v367_v33 = vld [vmem:[%s7792_s15 + $0x2a0] sm:$0xff]  ;;  %v368_v35 = vld [vmem:[%s7792_s15 + $0x2a8] sm:$0xff]  ;;  %v6683_v37 = vcombine.low %v332_v26, %v344_v27 }
  0x22   : > { %v6706_v38 = vcombine.high %v355_v32, %v367_v33  ;;  %v6708_v39 = vcombine.high %v356_v34, %v368_v35  ;;  %v379_v40 = vld [vmem:[%s7792_s15 + $0x300] sm:$0xff]  ;;  %v380_v42 = vld [vmem:[%s7792_s15 + $0x308] sm:$0xff]  ;;  %v6705_v44 = vcombine.low %v355_v32, %v367_v33  ;;  %v6707_v45 = vcombine.low %v356_v34, %v368_v35 }
  0x23   : > { %5049 = vmatpush1.bf16.msra.mxu0 %v6657_v28  ;;  %5131 = vmatpush1.bf16.msra.mxu1 %v6659_v29  ;;  %v391_v41 = vld [vmem:[%s7792_s15 + $0x360] sm:$0xff]  ;;  %v392_v43 = vld [vmem:[%s7792_s15 + $0x368] sm:$0xff] }
  0x24   : > { %5050 = vmatprep.subr.bf16.mxu0 %v6682_v30  ;;  %5132 = vmatprep.subr.bf16.mxu1 %v6684_v31  ;;  %v6730_v46 = vcombine.high %v379_v40, %v391_v41  ;;  %v6732_v47 = vcombine.high %v380_v42, %v392_v43  ;;  %v403_v48 = vld [vmem:[%s7792_s15 + $0x3c0] sm:$0xff]  ;;  %v404_v50 = vld [vmem:[%s7792_s15 + $0x3c8] sm:$0xff]  ;;  %v6729_v52 = vcombine.low %v379_v40, %v391_v41 }
  0x25   : > { %v415_v49 = vld [vmem:[%s7792_s15 + $0x420] sm:$0xff]  ;;  %v416_v51 = vld [vmem:[%s7792_s15 + $0x428] sm:$0xff]  ;;  %v6731_v53 = vcombine.low %v380_v42, %v392_v43 }
  0x26   : > { %v6754_v54 = vcombine.high %v403_v48, %v415_v49  ;;  %v6756_v55 = vcombine.high %v404_v50, %v416_v51  ;;  %v427_v56 = vld [vmem:[%s7792_s15 + $0x480] sm:$0xff]  ;;  %v428_v58 = vld [vmem:[%s7792_s15 + $0x488] sm:$0xff]  ;;  %v6753_v60 = vcombine.low %v403_v48, %v415_v49  ;;  %v6755_v61 = vcombine.low %v404_v50, %v416_v51 }
  0x27   : > { %5051 = vmatpush1.bf16.msra.mxu0 %v6681_v36  ;;  %5133 = vmatpush1.bf16.msra.mxu1 %v6683_v37  ;;  %v439_v57 = vld [vmem:[%s7792_s15 + $0x4e0] sm:$0xff]  ;;  %v440_v59 = vld [vmem:[%s7792_s15 + $0x4e8] sm:$0xff] }
  0x28   : > { %5052 = vmatprep.subr.bf16.mxu0 %v6706_v38  ;;  %5134 = vmatprep.subr.bf16.mxu1 %v6708_v39  ;;  %v6778_v62 = vcombine.high %v427_v56, %v439_v57  ;;  %v6780_v63 = vcombine.high %v428_v58, %v440_v59  ;;  %v451_v0 = vld [vmem:[%s7792_s15 + $0x540] sm:$0xff]  ;;  %v452_v3 = vld [vmem:[%s7792_s15 + $0x548] sm:$0xff]  ;;  %v6777_v5 = vcombine.low %v427_v56, %v439_v57 }
  0x29   : > { %v463_v1 = vld [vmem:[%s7792_s15 + $0x5a0] sm:$0xff]  ;;  %v464_v4 = vld [vmem:[%s7792_s15 + $0x5a8] sm:$0xff]  ;;  %v6779_v6 = vcombine.low %v428_v58, %v440_v59 }
  0x2a   : > { %v6802_v7 = vcombine.high %v451_v0, %v463_v1  ;;  %v6804_v8 = vcombine.high %v452_v3, %v464_v4  ;;  %v475_v9 = vld [vmem:[%s7792_s15 + $0x600] sm:$0xff]  ;;  %v476_v11 = vld [vmem:[%s7792_s15 + $0x608] sm:$0xff]  ;;  %v6801_v13 = vcombine.low %v451_v0, %v463_v1  ;;  %v6803_v14 = vcombine.low %v452_v3, %v464_v4 }
  0x2b   : > { %5053 = vmatpush1.bf16.msra.mxu0 %v6705_v44  ;;  %5135 = vmatpush1.bf16.msra.mxu1 %v6707_v45  ;;  %v487_v10 = vld [vmem:[%s7792_s15 + $0x660] sm:$0xff]  ;;  %v488_v12 = vld [vmem:[%s7792_s15 + $0x668] sm:$0xff] }
  0x2c   : > { %5054 = vmatprep.subr.bf16.mxu0 %v6730_v46  ;;  %5136 = vmatprep.subr.bf16.mxu1 %v6732_v47  ;;  %v6826_v15 = vcombine.high %v475_v9, %v487_v10  ;;  %v6828_v18 = vcombine.high %v476_v11, %v488_v12  ;;  %v499_v19 = vld [vmem:[%s7792_s15 + $0x6c0] sm:$0xff]  ;;  %v500_v21 = vld [vmem:[%s7792_s15 + $0x6c8] sm:$0xff]  ;;  %v6825_v23 = vcombine.low %v475_v9, %v487_v10 }
  0x2d   : > { %v511_v20 = vld [vmem:[%s7792_s15 + $0x720] sm:$0xff]  ;;  %v512_v22 = vld [vmem:[%s7792_s15 + $0x728] sm:$0xff]  ;;  %v6827_v24 = vcombine.low %v476_v11, %v488_v12 }
  0x2e   : > { %v6850_v25 = vcombine.high %v499_v19, %v511_v20  ;;  %v6852_v26 = vcombine.high %v500_v21, %v512_v22  ;;  %v523_v27 = vld [vmem:[%s7792_s15 + $0x780] sm:$0xff]  ;;  %v524_v29 = vld [vmem:[%s7792_s15 + $0x788] sm:$0xff]  ;;  %v6849_v31 = vcombine.low %v499_v19, %v511_v20  ;;  %v6851_v32 = vcombine.low %v500_v21, %v512_v22 }
  0x2f   : > { %5055 = vmatpush1.bf16.msra.mxu0 %v6729_v52  ;;  %5137 = vmatpush1.bf16.msra.mxu1 %v6731_v53  ;;  %v535_v28 = vld [vmem:[%s7792_s15 + $0x7e0] sm:$0xff]  ;;  %v536_v30 = vld [vmem:[%s7792_s15 + $0x7e8] sm:$0xff] }
  0x30   : > { %5056 = vmatprep.subr.bf16.mxu0 %v6754_v54  ;;  %5138 = vmatprep.subr.bf16.mxu1 %v6756_v55  ;;  %v6874_v33 = vcombine.high %v523_v27, %v535_v28  ;;  %v6876_v34 = vcombine.high %v524_v29, %v536_v30  ;;  %v547_v35 = vld [vmem:[%s7792_s15 + $0x840] sm:$0xff]  ;;  %v548_v37 = vld [vmem:[%s7792_s15 + $0x848] sm:$0xff]  ;;  %v6873_v39 = vcombine.low %v523_v27, %v535_v28 }
  0x31   : > { %v559_v36 = vld [vmem:[%s7792_s15 + $0x8a0] sm:$0xff]  ;;  %v560_v38 = vld [vmem:[%s7792_s15 + $0x8a8] sm:$0xff]  ;;  %v6875_v40 = vcombine.low %v524_v29, %v536_v30 }
  0x32   : > { %v6898_v41 = vcombine.high %v547_v35, %v559_v36  ;;  %v6900_v42 = vcombine.high %v548_v37, %v560_v38  ;;  %v571_v43 = vld [vmem:[%s7792_s15 + $0x900] sm:$0xff]  ;;  %v572_v45 = vld [vmem:[%s7792_s15 + $0x908] sm:$0xff]  ;;  %v6897_v47 = vcombine.low %v547_v35, %v559_v36  ;;  %v6899_v48 = vcombine.low %v548_v37, %v560_v38 }
  0x33   : > { %5057 = vmatpush1.bf16.msra.mxu0 %v6753_v60  ;;  %5139 = vmatpush1.bf16.msra.mxu1 %v6755_v61  ;;  %v583_v44 = vld [vmem:[%s7792_s15 + $0x960] sm:$0xff]  ;;  %v584_v46 = vld [vmem:[%s7792_s15 + $0x968] sm:$0xff] }
  0x34   : > { %5058 = vmatprep.subr.bf16.mxu0 %v6778_v62  ;;  %5140 = vmatprep.subr.bf16.mxu1 %v6780_v63  ;;  %v6922_v49 = vcombine.high %v571_v43, %v583_v44  ;;  %v6924_v50 = vcombine.high %v572_v45, %v584_v46  ;;  %v595_v51 = vld [vmem:[%s7792_s15 + $0x9c0] sm:$0xff]  ;;  %v596_v53 = vld [vmem:[%s7792_s15 + $0x9c8] sm:$0xff]  ;;  %v6921_v55 = vcombine.low %v571_v43, %v583_v44 }
  0x35   : > { %v607_v52 = vld [vmem:[%s7792_s15 + $0xa20] sm:$0xff]  ;;  %v608_v54 = vld [vmem:[%s7792_s15 + $0xa28] sm:$0xff]  ;;  %v6923_v56 = vcombine.low %v572_v45, %v584_v46 }
  0x36   : > { %v6946_v57 = vcombine.high %v595_v51, %v607_v52  ;;  %v6948_v58 = vcombine.high %v596_v53, %v608_v54  ;;  %v619_v59 = vld [vmem:[%s7792_s15 + $0xa80] sm:$0xff]  ;;  %v620_v61 = vld [vmem:[%s7792_s15 + $0xa88] sm:$0xff]  ;;  %v6945_v63 = vcombine.low %v595_v51, %v607_v52  ;;  %v6947_v0 = vcombine.low %v596_v53, %v608_v54 }
  0x37   : > { %5059 = vmatpush1.bf16.msra.mxu0 %v6777_v5  ;;  %5141 = vmatpush1.bf16.msra.mxu1 %v6779_v6  ;;  %v631_v60 = vld [vmem:[%s7792_s15 + $0xae0] sm:$0xff]  ;;  %v632_v62 = vld [vmem:[%s7792_s15 + $0xae8] sm:$0xff] }
  0x38   : > { %5060 = vmatprep.subr.bf16.mxu0 %v6802_v7  ;;  %5142 = vmatprep.subr.bf16.mxu1 %v6804_v8  ;;  %v6970_v1 = vcombine.high %v619_v59, %v631_v60  ;;  %v6972_v3 = vcombine.high %v620_v61, %v632_v62  ;;  %v643_v4 = vld [vmem:[%s7792_s15 + $0xb40] sm:$0xff]  ;;  %v644_v6 = vld [vmem:[%s7792_s15 + $0xb48] sm:$0xff]  ;;  %v6969_v8 = vcombine.low %v619_v59, %v631_v60 }
  0x39   : > { %v655_v5 = vld [vmem:[%s7792_s15 + $0xba0] sm:$0xff]  ;;  %v656_v7 = vld [vmem:[%s7792_s15 + $0xba8] sm:$0xff]  ;;  %v6971_v9 = vcombine.low %v620_v61, %v632_v62 }
  0x3a   : > { %v6994_v10 = vcombine.high %v643_v4, %v655_v5  ;;  %v6996_v11 = vcombine.high %v644_v6, %v656_v7  ;;  %v667_v12 = vld [vmem:[%s7792_s15 + $0xc00] sm:$0xff]  ;;  %v6995_v19 = vcombine.low %v644_v6, %v656_v7 }
  0x3b   : > { %5061 = vmatpush1.bf16.msra.mxu0 %v6801_v13  ;;  %5143 = vmatpush1.bf16.msra.mxu1 %v6803_v14  ;;  %v679_v13 = vld [vmem:[%s7792_s15 + $0xc60] sm:$0xff]  ;;  %v668_v14 = vld [vmem:[%s7792_s15 + $0xc08] sm:$0xff] }
  0x3c   : > { %5062 = vmatprep.subr.bf16.mxu0 %v6826_v15  ;;  %5144 = vmatprep.subr.bf16.mxu1 %v6828_v18  ;;  %v680_v15 = vld [vmem:[%s7792_s15 + $0xc68] sm:$0xff]  ;;  %v6993_v18 = vcombine.low %v643_v4, %v655_v5  ;;  %v7018_v20 = vcombine.high %v667_v12, %v679_v13  ;;  %v691_v22 = vld [vmem:[%s7792_s15 + $0xcc0] sm:$0xff] }
  0x3d   : > { %v7020_v21 = vcombine.high %v668_v14, %v680_v15  ;;  %v7019_v27 = vcombine.low %v668_v14, %v680_v15  ;;  %v715_v29 = vld [vmem:[%s7792_s15 + $0xd80] sm:$0xff] }
  0x3e   : > { %v727_v30 = vld [vmem:[%s7792_s15 + $0xde0] sm:$0xff] }
  0x3f   : > { %5063 = vmatpush1.bf16.msra.mxu0 %v6825_v23  ;;  %5145 = vmatpush1.bf16.msra.mxu1 %v6827_v24  ;;  %v703_v23 = vld [vmem:[%s7792_s15 + $0xd20] sm:$0xff]  ;;  %v692_v24 = vld [vmem:[%s7792_s15 + $0xcc8] sm:$0xff]  ;;  %v7066_v37 = vcombine.high %v715_v29, %v727_v30  ;;  %v7065_v43 = vcombine.low %v715_v29, %v727_v30 }
  0x40   : > { %5064 = vmatprep.subr.bf16.mxu0 %v6850_v25  ;;  %5146 = vmatprep.subr.bf16.mxu1 %v6852_v26  ;;  %v704_v25 = vld [vmem:[%s7792_s15 + $0xd28] sm:$0xff]  ;;  %v7017_v26 = vcombine.low %v667_v12, %v679_v13  ;;  %v7042_v28 = vcombine.high %v691_v22, %v703_v23  ;;  %v7041_v35 = vcombine.low %v691_v22, %v703_v23  ;;  %v739_v38 = vld [vmem:[%s7792_s15 + $0xe40] sm:$0xff] }
  0x41   : > { %v7043_v36 = vcombine.low %v692_v24, %v704_v25  ;;  %v763_v46 = vld [vmem:[%s7792_s15 + $0xf00] sm:$0xff]  ;;  %v896_v29 = vld [vmem:[%s7792_s15 + $0x1328] sm:$0xff] }
  0x42   : > { %v787_v54 = vld [vmem:[%s7792_s15 + $0xfc0] sm:$0xff] }
  0x43   : > { %5065 = vmatpush1.bf16.msra.mxu0 %v6849_v31  ;;  %5147 = vmatpush1.bf16.msra.mxu1 %v6851_v32  ;;  %v716_v31 = vld [vmem:[%s7792_s15 + $0xd88] sm:$0xff]  ;;  %v7044_v32 = vcombine.high %v692_v24, %v704_v25  ;;  %v811_v62 = vld [vmem:[%s7792_s15 + $0x1080] sm:$0xff] }
  0x44   : > { %5066 = vmatprep.subr.bf16.mxu0 %v6874_v33  ;;  %5148 = vmatprep.subr.bf16.mxu1 %v6876_v34  ;;  %v728_v33 = vld [vmem:[%s7792_s15 + $0xde8] sm:$0xff]  ;;  %v7879_v34 = vcombine.high %v7801_v16, %v7801_v16  ;;  %v835_v7 = vld [vmem:[%s7792_s15 + $0x1140] sm:$0xff] }
  0x45   : > { %v7067_v44 = vcombine.low %v716_v31, %v728_v33 }
  0x47   : > { %5067 = vmatpush1.bf16.msra.mxu0 %v6873_v39  ;;  %5149 = vmatpush1.bf16.msra.mxu1 %v6875_v40  ;;  %v751_v39 = vld [vmem:[%s7792_s15 + $0xea0] sm:$0xff]  ;;  %v740_v40 = vld [vmem:[%s7792_s15 + $0xe48] sm:$0xff] }
  0x48   : > { %5068 = vmatprep.subr.bf16.mxu0 %v6898_v41  ;;  %5150 = vmatprep.subr.bf16.mxu1 %v6900_v42  ;;  %v7068_v41 = vcombine.high %v716_v31, %v728_v33  ;;  %v752_v42 = vld [vmem:[%s7792_s15 + $0xea8] sm:$0xff]  ;;  %v7090_v45 = vcombine.high %v739_v38, %v751_v39  ;;  %v7089_v51 = vcombine.low %v739_v38, %v751_v39 }
  0x49   : > { %v7091_v52 = vcombine.low %v740_v40, %v752_v42  ;;  %v920_v38 = vld [vmem:[%s7792_s15 + $0x13e8] sm:$0xff] }
  0x4b   : > { %5069 = vmatpush1.bf16.msra.mxu0 %v6897_v47  ;;  %5151 = vmatpush1.bf16.msra.mxu1 %v6899_v48  ;;  %v775_v47 = vld [vmem:[%s7792_s15 + $0xf60] sm:$0xff]  ;;  %v764_v48 = vld [vmem:[%s7792_s15 + $0xf08] sm:$0xff] }
  0x4c   : > { %5070 = vmatprep.subr.bf16.mxu0 %v6922_v49  ;;  %5152 = vmatprep.subr.bf16.mxu1 %v6924_v50  ;;  %v7092_v49 = vcombine.high %v740_v40, %v752_v42  ;;  %v776_v50 = vld [vmem:[%s7792_s15 + $0xf68] sm:$0xff]  ;;  %v7114_v53 = vcombine.high %v763_v46, %v775_v47  ;;  %v7113_v59 = vcombine.low %v763_v46, %v775_v47 }
  0x4d   : > { %v7115_v60 = vcombine.low %v764_v48, %v776_v50  ;;  %v944_v46 = vld [vmem:[%s7792_s15 + $0x14a8] sm:$0xff] }
  0x4f   : > { %5071 = vmatpush1.bf16.msra.mxu0 %v6921_v55  ;;  %5153 = vmatpush1.bf16.msra.mxu1 %v6923_v56  ;;  %v799_v55 = vld [vmem:[%s7792_s15 + $0x1020] sm:$0xff]  ;;  %v788_v56 = vld [vmem:[%s7792_s15 + $0xfc8] sm:$0xff] }
  0x50   : > { %5072 = vmatprep.subr.bf16.mxu0 %v6946_v57  ;;  %5154 = vmatprep.subr.bf16.mxu1 %v6948_v58  ;;  %v7116_v57 = vcombine.high %v764_v48, %v776_v50  ;;  %v800_v58 = vld [vmem:[%s7792_s15 + $0x1028] sm:$0xff]  ;;  %v7138_v61 = vcombine.high %v787_v54, %v799_v55  ;;  %v7137_v4 = vcombine.low %v787_v54, %v799_v55 }
  0x51   : > { %v7139_v5 = vcombine.low %v788_v56, %v800_v58  ;;  %v968_v54 = vld [vmem:[%s7792_s15 + $0x1568] sm:$0xff] }
  0x53   : > { %5073 = vmatpush1.bf16.msra.mxu0 %v6945_v63  ;;  %5155 = vmatpush1.bf16.msra.mxu1 %v6947_v0  ;;  %v823_v63 = vld [vmem:[%s7792_s15 + $0x10e0] sm:$0xff]  ;;  %v812_v0 = vld [vmem:[%s7792_s15 + $0x1088] sm:$0xff] }
  0x54   : > { %5074 = vmatprep.subr.bf16.mxu0 %v6970_v1  ;;  %5156 = vmatprep.subr.bf16.mxu1 %v6972_v3  ;;  %v7140_v1 = vcombine.high %v788_v56, %v800_v58  ;;  %v824_v3 = vld [vmem:[%s7792_s15 + $0x10e8] sm:$0xff]  ;;  %v7162_v6 = vcombine.high %v811_v62, %v823_v63  ;;  %v7161_v12 = vcombine.low %v811_v62, %v823_v63 }
  0x55   : > { %v7163_v13 = vcombine.low %v812_v0, %v824_v3  ;;  %v992_v62 = vld [vmem:[%s7792_s15 + $0x1628] sm:$0xff] }
  0x57   : > { %5075 = vmatpush1.bf16.msra.mxu0 %v6969_v8  ;;  %5157 = vmatpush1.bf16.msra.mxu1 %v6971_v9  ;;  %v847_v8 = vld [vmem:[%s7792_s15 + $0x11a0] sm:$0xff]  ;;  %v836_v9 = vld [vmem:[%s7792_s15 + $0x1148] sm:$0xff] }
  0x58   : > { %5076 = vmatprep.subr.bf16.mxu0 %v6994_v10  ;;  %5158 = vmatprep.subr.bf16.mxu1 %v6996_v11  ;;  %v7164_v10 = vcombine.high %v812_v0, %v824_v3  ;;  %v848_v11 = vld [vmem:[%s7792_s15 + $0x11a8] sm:$0xff]  ;;  %v7186_v14 = vcombine.high %v835_v7, %v847_v8  ;;  %v7185_v22 = vcombine.low %v835_v7, %v847_v8 }
  0x59   : > { %v7188_v15 = vcombine.high %v836_v9, %v848_v11  ;;  %v7187_v23 = vcombine.low %v836_v9, %v848_v11  ;;  %v1016_v7 = vld [vmem:[%s7792_s15 + $0x16e8] sm:$0xff] }
  0x5b   : > { %5077 = vmatpush1.bf16.msra.mxu0 %v6993_v18  ;;  %5159 = vmatpush1.bf16.msra.mxu1 %v6995_v19  ;;  %v859_v18 = vld [vmem:[%s7792_s15 + $0x1200] sm:$0xff] }
  0x5c   : > { %5087 = vmatprep.subr.bf16.mxu0 %v7018_v20  ;;  %5169 = vmatprep.subr.bf16.mxu1 %v7020_v21  ;;  %v871_v19 = vld [vmem:[%s7792_s15 + $0x1260] sm:$0xff]  ;;  %v860_v20 = vld [vmem:[%s7792_s15 + $0x1208] sm:$0xff] }
  0x5d   : > { %v872_v21 = vld [vmem:[%s7792_s15 + $0x1268] sm:$0xff]  ;;  %v7210_v24 = vcombine.high %v859_v18, %v871_v19  ;;  %v7209_v30 = vcombine.low %v859_v18, %v871_v19 }
  0x5e   : > { %5079 = vmatmul.mubr.bf16.vlgmr.msra.gmra.mrb[0].mxu0 %v7803_v17  ;;  %5161 = vmatmul.mubr.bf16.vlgmr.msra.gmra.mrb[0].mxu1 %v7803_v17  ;;  %v7212_v25 = vcombine.high %v860_v20, %v872_v21  ;;  %v7211_v31 = vcombine.low %v860_v20, %v872_v21 }
  0x5f   : > { %5088 = vmatpush1.bf16.msra.mxu0 %v7017_v26  ;;  %5170 = vmatpush1.bf16.msra.mxu1 %v7019_v27  ;;  %v883_v26 = vld [vmem:[%s7792_s15 + $0x12c0] sm:$0xff] }
  0x60   : > { %5089 = vmatprep.subr.bf16.mxu0 %v7042_v28  ;;  %5171 = vmatprep.subr.bf16.mxu1 %v7044_v32  ;;  %v895_v27 = vld [vmem:[%s7792_s15 + $0x1320] sm:$0xff]  ;;  %v884_v28 = vld [vmem:[%s7792_s15 + $0x12c8] sm:$0xff] }
  0x61   : > { %5119 = vmatprep.mubr.bf16.mxu0 %v7879_v34  ;;  %5201 = vmatprep.mubr.bf16.mxu1 %v7879_v34  ;;  %v7234_v32 = vcombine.high %v883_v26, %v895_v27  ;;  %v7236_v33 = vcombine.high %v884_v28, %v896_v29  ;;  %v7233_v39 = vcombine.low %v883_v26, %v895_v27 }
  0x62   : > { %v7235_v40 = vcombine.low %v884_v28, %v896_v29 }
  0x63   : > { %5090 = vmatpush1.bf16.msra.mxu0 %v7041_v35  ;;  %5172 = vmatpush1.bf16.msra.mxu1 %v7043_v36  ;;  %v907_v35 = vld [vmem:[%s7792_s15 + $0x1380] sm:$0xff] }
  0x64   : > { %5091 = vmatprep.subr.bf16.mxu0 %v7066_v37  ;;  %5173 = vmatprep.subr.bf16.mxu1 %v7068_v41  ;;  %v919_v36 = vld [vmem:[%s7792_s15 + $0x13e0] sm:$0xff]  ;;  %v908_v37 = vld [vmem:[%s7792_s15 + $0x1388] sm:$0xff] }
  0x65   : > { %v7258_v41 = vcombine.high %v907_v35, %v919_v36  ;;  %v7260_v42 = vcombine.high %v908_v37, %v920_v38  ;;  %v7257_v47 = vcombine.low %v907_v35, %v919_v36  ;;  %v7259_v48 = vcombine.low %v908_v37, %v920_v38  ;;  %v322_v35 = vld [vmem:[%s7792_s15 + $0x138] sm:$0xff] }
  0x67   : > { %5092 = vmatpush1.bf16.msra.mxu0 %v7065_v43  ;;  %5174 = vmatpush1.bf16.msra.mxu1 %v7067_v44  ;;  %v931_v43 = vld [vmem:[%s7792_s15 + $0x1440] sm:$0xff] }
  0x68   : > { %5093 = vmatprep.subr.bf16.mxu0 %v7090_v45  ;;  %5175 = vmatprep.subr.bf16.mxu1 %v7092_v49  ;;  %v943_v44 = vld [vmem:[%s7792_s15 + $0x14a0] sm:$0xff]  ;;  %v932_v45 = vld [vmem:[%s7792_s15 + $0x1448] sm:$0xff] }
  0x69   : > { %v7282_v49 = vcombine.high %v931_v43, %v943_v44  ;;  %v7284_v50 = vcombine.high %v932_v45, %v944_v46  ;;  %v7281_v55 = vcombine.low %v931_v43, %v943_v44  ;;  %v7283_v56 = vcombine.low %v932_v45, %v944_v46  ;;  %v346_v43 = vld [vmem:[%s7792_s15 + $0x1f8] sm:$0xff] }
  0x6b   : > { %5094 = vmatpush1.bf16.msra.mxu0 %v7089_v51  ;;  %5176 = vmatpush1.bf16.msra.mxu1 %v7091_v52  ;;  %v955_v51 = vld [vmem:[%s7792_s15 + $0x1500] sm:$0xff] }
  0x6c   : > { %5095 = vmatprep.subr.bf16.mxu0 %v7114_v53  ;;  %5177 = vmatprep.subr.bf16.mxu1 %v7116_v57  ;;  %v967_v52 = vld [vmem:[%s7792_s15 + $0x1560] sm:$0xff]  ;;  %v956_v53 = vld [vmem:[%s7792_s15 + $0x1508] sm:$0xff] }
  0x6d   : > { %v7306_v57 = vcombine.high %v955_v51, %v967_v52  ;;  %v7308_v58 = vcombine.high %v956_v53, %v968_v54  ;;  %v7305_v63 = vcombine.low %v955_v51, %v967_v52  ;;  %v7307_v0 = vcombine.low %v956_v53, %v968_v54  ;;  %v370_v51 = vld [vmem:[%s7792_s15 + $0x2b8] sm:$0xff] }
  0x6f   : > { %5096 = vmatpush1.bf16.msra.mxu0 %v7113_v59  ;;  %5178 = vmatpush1.bf16.msra.mxu1 %v7115_v60  ;;  %v979_v59 = vld [vmem:[%s7792_s15 + $0x15c0] sm:$0xff] }
  0x70   : > { %5097 = vmatprep.subr.bf16.mxu0 %v7138_v61  ;;  %5179 = vmatprep.subr.bf16.mxu1 %v7140_v1  ;;  %v991_v60 = vld [vmem:[%s7792_s15 + $0x1620] sm:$0xff]  ;;  %v980_v61 = vld [vmem:[%s7792_s15 + $0x15c8] sm:$0xff] }
  0x71   : > { %v7330_v1 = vcombine.high %v979_v59, %v991_v60  ;;  %v7332_v3 = vcombine.high %v980_v61, %v992_v62  ;;  %v7329_v8 = vcombine.low %v979_v59, %v991_v60  ;;  %v7331_v9 = vcombine.low %v980_v61, %v992_v62  ;;  %v394_v59 = vld [vmem:[%s7792_s15 + $0x378] sm:$0xff] }
  0x73   : > { %5098 = vmatpush1.bf16.msra.mxu0 %v7137_v4  ;;  %5180 = vmatpush1.bf16.msra.mxu1 %v7139_v5  ;;  %v1003_v4 = vld [vmem:[%s7792_s15 + $0x1680] sm:$0xff] }
  0x74   : > { %5099 = vmatprep.subr.bf16.mxu0 %v7162_v6  ;;  %5181 = vmatprep.subr.bf16.mxu1 %v7164_v10  ;;  %v1015_v5 = vld [vmem:[%s7792_s15 + $0x16e0] sm:$0xff]  ;;  %v1004_v6 = vld [vmem:[%s7792_s15 + $0x1688] sm:$0xff] }
  0x75   : > { %v7354_v10 = vcombine.high %v1003_v4, %v1015_v5  ;;  %v7356_v11 = vcombine.high %v1004_v6, %v1016_v7  ;;  %v7353_v18 = vcombine.low %v1003_v4, %v1015_v5  ;;  %v7355_v19 = vcombine.low %v1004_v6, %v1016_v7  ;;  %v418_v4 = vld [vmem:[%s7792_s15 + $0x438] sm:$0xff] }
  0x77   : > { %5100 = vmatpush1.bf16.msra.mxu0 %v7161_v12  ;;  %5182 = vmatpush1.bf16.msra.mxu1 %v7163_v13  ;;  %v1027_v12 = vld [vmem:[%s7792_s15 + $0x1740] sm:$0xff] }
  0x78   : > { %5101 = vmatprep.subr.bf16.mxu0 %v7186_v14  ;;  %5183 = vmatprep.subr.bf16.mxu1 %v7188_v15  ;;  %v1039_v13 = vld [vmem:[%s7792_s15 + $0x17a0] sm:$0xff]  ;;  %v1028_v14 = vld [vmem:[%s7792_s15 + $0x1748] sm:$0xff] }
  0x79   : > { %v1040_v15 = vld [vmem:[%s7792_s15 + $0x17a8] sm:$0xff]  ;;  %v7378_v20 = vcombine.high %v1027_v12, %v1039_v13  ;;  %v7377_v26 = vcombine.low %v1027_v12, %v1039_v13  ;;  %v442_v12 = vld [vmem:[%s7792_s15 + $0x4f8] sm:$0xff] }
  0x7a   : > { %v7380_v21 = vcombine.high %v1028_v14, %v1040_v15  ;;  %v7379_v27 = vcombine.low %v1028_v14, %v1040_v15 }
  0x7b   : > { %5102 = vmatpush1.bf16.msra.mxu0 %v7185_v22  ;;  %5184 = vmatpush1.bf16.msra.mxu1 %v7187_v23  ;;  %v285_v22 = vld [vmem:[%s7792_s15 + $0x10] sm:$0xff] }
  0x7c   : > { %5103 = vmatprep.subr.bf16.mxu0 %v7210_v24  ;;  %5185 = vmatprep.subr.bf16.mxu1 %v7212_v25  ;;  %v297_v23 = vld [vmem:[%s7792_s15 + $0x70] sm:$0xff]  ;;  %v286_v24 = vld [vmem:[%s7792_s15 + $0x18] sm:$0xff] }
  0x7d   : > { %v298_v25 = vld [vmem:[%s7792_s15 + $0x78] sm:$0xff]  ;;  %v6638_v28 = vcombine.high %v285_v22, %v297_v23  ;;  %v6637_v36 = vcombine.low %v285_v22, %v297_v23 }
  0x7e   : > { %v6640_v29 = vcombine.high %v286_v24, %v298_v25  ;;  %v6639_v37 = vcombine.low %v286_v24, %v298_v25  ;;  %v466_v22 = vld [vmem:[%s7792_s15 + $0x5b8] sm:$0xff] }
  0x7f   : > { %5104 = vmatpush1.bf16.msra.mxu0 %v7209_v30  ;;  %5186 = vmatpush1.bf16.msra.mxu1 %v7211_v31  ;;  %v309_v30 = vld [vmem:[%s7792_s15 + $0xd0] sm:$0xff] }
  0x80   : > { %5105 = vmatprep.subr.bf16.mxu0 %v7234_v32  ;;  %5187 = vmatprep.subr.bf16.mxu1 %v7236_v33  ;;  %v321_v31 = vld [vmem:[%s7792_s15 + $0x130] sm:$0xff]  ;;  %v7945_v32 = vcombine.high %v7803_v17, %v7803_v17  ;;  %v310_v33 = vld [vmem:[%s7792_s15 + $0xd8] sm:$0xff] }
  0x81   : > { %v6662_v38 = vcombine.high %v309_v30, %v321_v31  ;;  %v6661_v44 = vcombine.low %v309_v30, %v321_v31  ;;  %v6663_v45 = vcombine.low %v310_v33, %v322_v35  ;;  %v490_v30 = vld [vmem:[%s7792_s15 + $0x678] sm:$0xff] }
  0x83   : > { %5106 = vmatpush1.bf16.msra.mxu0 %v7233_v39  ;;  %5188 = vmatpush1.bf16.msra.mxu1 %v7235_v40  ;;  %v6664_v39 = vcombine.high %v310_v33, %v322_v35  ;;  %v333_v40 = vld [vmem:[%s7792_s15 + $0x190] sm:$0xff] }
  0x84   : > { %5107 = vmatprep.subr.bf16.mxu0 %v7258_v41  ;;  %5189 = vmatprep.subr.bf16.mxu1 %v7260_v42  ;;  %v345_v41 = vld [vmem:[%s7792_s15 + $0x1f0] sm:$0xff]  ;;  %v334_v42 = vld [vmem:[%s7792_s15 + $0x198] sm:$0xff] }
  0x85   : > { %v6686_v46 = vcombine.high %v333_v40, %v345_v41  ;;  %v6685_v52 = vcombine.low %v333_v40, %v345_v41  ;;  %v6687_v53 = vcombine.low %v334_v42, %v346_v43  ;;  %v514_v40 = vld [vmem:[%s7792_s15 + $0x738] sm:$0xff] }
  0x87   : > { %5108 = vmatpush1.bf16.msra.mxu0 %v7257_v47  ;;  %5190 = vmatpush1.bf16.msra.mxu1 %v7259_v48  ;;  %v6688_v47 = vcombine.high %v334_v42, %v346_v43  ;;  %v357_v48 = vld [vmem:[%s7792_s15 + $0x250] sm:$0xff] }
  0x88   : > { %5109 = vmatprep.subr.bf16.mxu0 %v7282_v49  ;;  %5191 = vmatprep.subr.bf16.mxu1 %v7284_v50  ;;  %v369_v49 = vld [vmem:[%s7792_s15 + $0x2b0] sm:$0xff]  ;;  %v358_v50 = vld [vmem:[%s7792_s15 + $0x258] sm:$0xff] }
  0x89   : > { %v6710_v54 = vcombine.high %v357_v48, %v369_v49  ;;  %v6709_v60 = vcombine.low %v357_v48, %v369_v49  ;;  %v6711_v61 = vcombine.low %v358_v50, %v370_v51  ;;  %v538_v48 = vld [vmem:[%s7792_s15 + $0x7f8] sm:$0xff] }
  0x8b   : > { %5110 = vmatpush1.bf16.msra.mxu0 %v7281_v55  ;;  %5192 = vmatpush1.bf16.msra.mxu1 %v7283_v56  ;;  %v6712_v55 = vcombine.high %v358_v50, %v370_v51  ;;  %v381_v56 = vld [vmem:[%s7792_s15 + $0x310] sm:$0xff] }
  0x8c   : > { %5111 = vmatprep.subr.bf16.mxu0 %v7306_v57  ;;  %5193 = vmatprep.subr.bf16.mxu1 %v7308_v58  ;;  %v393_v57 = vld [vmem:[%s7792_s15 + $0x370] sm:$0xff]  ;;  %v382_v58 = vld [vmem:[%s7792_s15 + $0x318] sm:$0xff] }
  0x8d   : > { %v6734_v62 = vcombine.high %v381_v56, %v393_v57  ;;  %v6733_v5 = vcombine.low %v381_v56, %v393_v57  ;;  %v6735_v6 = vcombine.low %v382_v58, %v394_v59  ;;  %v562_v56 = vld [vmem:[%s7792_s15 + $0x8b8] sm:$0xff] }
  0x8f   : > { %5112 = vmatpush1.bf16.msra.mxu0 %v7305_v63  ;;  %5194 = vmatpush1.bf16.msra.mxu1 %v7307_v0  ;;  %v6736_v63 = vcombine.high %v382_v58, %v394_v59  ;;  %v405_v0 = vld [vmem:[%s7792_s15 + $0x3d0] sm:$0xff] }
  0x90   : > { %5113 = vmatprep.subr.bf16.mxu0 %v7330_v1  ;;  %5195 = vmatprep.subr.bf16.mxu1 %v7332_v3  ;;  %v417_v1 = vld [vmem:[%s7792_s15 + $0x430] sm:$0xff]  ;;  %v406_v3 = vld [vmem:[%s7792_s15 + $0x3d8] sm:$0xff] }
  0x91   : > { %v6758_v7 = vcombine.high %v405_v0, %v417_v1  ;;  %v6757_v13 = vcombine.low %v405_v0, %v417_v1  ;;  %v6759_v14 = vcombine.low %v406_v3, %v418_v4  ;;  %v586_v0 = vld [vmem:[%s7792_s15 + $0x978] sm:$0xff] }
  0x93   : > { %5114 = vmatpush1.bf16.msra.mxu0 %v7329_v8  ;;  %5196 = vmatpush1.bf16.msra.mxu1 %v7331_v9  ;;  %v6760_v8 = vcombine.high %v406_v3, %v418_v4  ;;  %v429_v9 = vld [vmem:[%s7792_s15 + $0x490] sm:$0xff] }
  0x94   : > { %5115 = vmatprep.subr.bf16.mxu0 %v7354_v10  ;;  %5197 = vmatprep.subr.bf16.mxu1 %v7356_v11  ;;  %v441_v10 = vld [vmem:[%s7792_s15 + $0x4f0] sm:$0xff]  ;;  %v430_v11 = vld [vmem:[%s7792_s15 + $0x498] sm:$0xff] }
  0x95   : > { %v6782_v15 = vcombine.high %v429_v9, %v441_v10  ;;  %v6781_v23 = vcombine.low %v429_v9, %v441_v10  ;;  %v6783_v24 = vcombine.low %v430_v11, %v442_v12  ;;  %v610_v9 = vld [vmem:[%s7792_s15 + $0xa38] sm:$0xff] }
  0x97   : > { %5116 = vmatpush1.bf16.msra.mxu0 %v7353_v18  ;;  %5198 = vmatpush1.bf16.msra.mxu1 %v7355_v19  ;;  %v6784_v18 = vcombine.high %v430_v11, %v442_v12  ;;  %v453_v19 = vld [vmem:[%s7792_s15 + $0x550] sm:$0xff] }
  0x98   : > { %5117 = vmatprep.subr.bf16.mxu0 %v7378_v20  ;;  %5199 = vmatprep.subr.bf16.mxu1 %v7380_v21  ;;  %v465_v20 = vld [vmem:[%s7792_s15 + $0x5b0] sm:$0xff]  ;;  %v454_v21 = vld [vmem:[%s7792_s15 + $0x558] sm:$0xff] }
  0x99   : > { %v6806_v25 = vcombine.high %v453_v19, %v465_v20  ;;  %v6805_v31 = vcombine.low %v453_v19, %v465_v20  ;;  %v6807_v33 = vcombine.low %v454_v21, %v466_v22  ;;  %v634_v19 = vld [vmem:[%s7792_s15 + $0xaf8] sm:$0xff] }
  0x9b   : > { %5118 = vmatpush1.bf16.msra.mxu0 %v7377_v26  ;;  %5200 = vmatpush1.bf16.msra.mxu1 %v7379_v27  ;;  %v6808_v26 = vcombine.high %v454_v21, %v466_v22  ;;  %v477_v27 = vld [vmem:[%s7792_s15 + $0x610] sm:$0xff] }
  0x9c   : > { %5210 = vmatprep.subr.bf16.mxu0 %v6638_v28  ;;  %5292 = vmatprep.subr.bf16.mxu1 %v6640_v29  ;;  %v489_v28 = vld [vmem:[%s7792_s15 + $0x670] sm:$0xff]  ;;  %v478_v29 = vld [vmem:[%s7792_s15 + $0x618] sm:$0xff] }
  0x9d   : > { %v6830_v35 = vcombine.high %v477_v27, %v489_v28  ;;  %v6829_v41 = vcombine.low %v477_v27, %v489_v28  ;;  %v6831_v42 = vcombine.low %v478_v29, %v490_v30  ;;  %v658_v27 = vld [vmem:[%s7792_s15 + $0xbb8] sm:$0xff] }
  0x9e   : > { %5120 = vmatmul.mubr.bf16.vlgmr.msra.gmra.mrb[0].mxu0 %v7945_v32  ;;  %5202 = vmatmul.mubr.bf16.vlgmr.msra.gmra.mrb[0].mxu1 %v7945_v32 }
  0x9f   : > { %5211 = vmatpush1.bf16.msra.mxu0 %v6637_v36  ;;  %5293 = vmatpush1.bf16.msra.mxu1 %v6639_v37  ;;  %v6832_v36 = vcombine.high %v478_v29, %v490_v30  ;;  %v501_v37 = vld [vmem:[%s7792_s15 + $0x6d0] sm:$0xff] }
  0xa0   : > { %5212 = vmatprep.subr.bf16.mxu0 %v6662_v38  ;;  %5294 = vmatprep.subr.bf16.mxu1 %v6664_v39  ;;  %v513_v38 = vld [vmem:[%s7792_s15 + $0x730] sm:$0xff]  ;;  %v502_v39 = vld [vmem:[%s7792_s15 + $0x6d8] sm:$0xff] }
  0xa1   : > { %5242 = vmatprep.mubr.bf16.mxu0 %v7801_v16  ;;  %5324 = vmatprep.mubr.bf16.mxu1 %v7801_v16  ;;  %v6854_v43 = vcombine.high %v501_v37, %v513_v38  ;;  %v6853_v49 = vcombine.low %v501_v37, %v513_v38  ;;  %v6855_v50 = vcombine.low %v502_v39, %v514_v40  ;;  %v682_v37 = vld [vmem:[%s7792_s15 + $0xc78] sm:$0xff] }
  0xa3   : > { %5213 = vmatpush1.bf16.msra.mxu0 %v6661_v44  ;;  %5295 = vmatpush1.bf16.msra.mxu1 %v6663_v45  ;;  %v6856_v44 = vcombine.high %v502_v39, %v514_v40  ;;  %v525_v45 = vld [vmem:[%s7792_s15 + $0x790] sm:$0xff] }
  0xa4   : > { %5214 = vmatprep.subr.bf16.mxu0 %v6686_v46  ;;  %5296 = vmatprep.subr.bf16.mxu1 %v6688_v47  ;;  %v537_v46 = vld [vmem:[%s7792_s15 + $0x7f0] sm:$0xff]  ;;  %v526_v47 = vld [vmem:[%s7792_s15 + $0x798] sm:$0xff] }
  0xa5   : > { %v6878_v51 = vcombine.high %v525_v45, %v537_v46  ;;  %v6877_v57 = vcombine.low %v525_v45, %v537_v46  ;;  %v6879_v58 = vcombine.low %v526_v47, %v538_v48  ;;  %v706_v45 = vld [vmem:[%s7792_s15 + $0xd38] sm:$0xff] }
  0xa7   : > { %5215 = vmatpush1.bf16.msra.mxu0 %v6685_v52  ;;  %5297 = vmatpush1.bf16.msra.mxu1 %v6687_v53  ;;  %v6880_v52 = vcombine.high %v526_v47, %v538_v48  ;;  %v549_v53 = vld [vmem:[%s7792_s15 + $0x850] sm:$0xff] }
  0xa8   : > { %5216 = vmatprep.subr.bf16.mxu0 %v6710_v54  ;;  %5298 = vmatprep.subr.bf16.mxu1 %v6712_v55  ;;  %v561_v54 = vld [vmem:[%s7792_s15 + $0x8b0] sm:$0xff]  ;;  %v550_v55 = vld [vmem:[%s7792_s15 + $0x858] sm:$0xff] }
  0xa9   : > { %v6902_v59 = vcombine.high %v549_v53, %v561_v54  ;;  %v6901_v1 = vcombine.low %v549_v53, %v561_v54  ;;  %v6903_v3 = vcombine.low %v550_v55, %v562_v56  ;;  %v730_v53 = vld [vmem:[%s7792_s15 + $0xdf8] sm:$0xff] }
  0xab   : > { %5217 = vmatpush1.bf16.msra.mxu0 %v6709_v60  ;;  %5299 = vmatpush1.bf16.msra.mxu1 %v6711_v61  ;;  %v6904_v60 = vcombine.high %v550_v55, %v562_v56  ;;  %v573_v61 = vld [vmem:[%s7792_s15 + $0x910] sm:$0xff] }
  0xac   : > { %5218 = vmatprep.subr.bf16.mxu0 %v6734_v62  ;;  %5300 = vmatprep.subr.bf16.mxu1 %v6736_v63  ;;  %v585_v62 = vld [vmem:[%s7792_s15 + $0x970] sm:$0xff]  ;;  %v574_v63 = vld [vmem:[%s7792_s15 + $0x918] sm:$0xff] }
  0xad   : > { %v6926_v4 = vcombine.high %v573_v61, %v585_v62  ;;  %v6925_v10 = vcombine.low %v573_v61, %v585_v62  ;;  %v6927_v11 = vcombine.low %v574_v63, %v586_v0  ;;  %v754_v61 = vld [vmem:[%s7792_s15 + $0xeb8] sm:$0xff] }
  0xaf   : > { %5219 = vmatpush1.bf16.msra.mxu0 %v6733_v5  ;;  %5301 = vmatpush1.bf16.msra.mxu1 %v6735_v6  ;;  %v6928_v5 = vcombine.high %v574_v63, %v586_v0  ;;  %v597_v6 = vld [vmem:[%s7792_s15 + $0x9d0] sm:$0xff] }
  0xb0   : > { %5220 = vmatprep.subr.bf16.mxu0 %v6758_v7  ;;  %5302 = vmatprep.subr.bf16.mxu1 %v6760_v8  ;;  %v609_v7 = vld [vmem:[%s7792_s15 + $0xa30] sm:$0xff]  ;;  %v598_v8 = vld [vmem:[%s7792_s15 + $0x9d8] sm:$0xff] }
  0xb1   : > { %v6950_v12 = vcombine.high %v597_v6, %v609_v7  ;;  %v6949_v20 = vcombine.low %v597_v6, %v609_v7  ;;  %v6951_v21 = vcombine.low %v598_v8, %v610_v9  ;;  %v778_v6 = vld [vmem:[%s7792_s15 + $0xf78] sm:$0xff] }
  0xb3   : > { %5221 = vmatpush1.bf16.msra.mxu0 %v6757_v13  ;;  %5303 = vmatpush1.bf16.msra.mxu1 %v6759_v14  ;;  %v6952_v13 = vcombine.high %v598_v8, %v610_v9  ;;  %v621_v14 = vld [vmem:[%s7792_s15 + $0xa90] sm:$0xff] }
  0xb4   : > { %5222 = vmatprep.subr.bf16.mxu0 %v6782_v15  ;;  %5304 = vmatprep.subr.bf16.mxu1 %v6784_v18  ;;  %v633_v15 = vld [vmem:[%s7792_s15 + $0xaf0] sm:$0xff]  ;;  %v622_v18 = vld [vmem:[%s7792_s15 + $0xa98] sm:$0xff] }
  0xb5   : > { %v6974_v22 = vcombine.high %v621_v14, %v633_v15  ;;  %v6973_v28 = vcombine.low %v621_v14, %v633_v15  ;;  %v6975_v29 = vcombine.low %v622_v18, %v634_v19  ;;  %v802_v14 = vld [vmem:[%s7792_s15 + $0x1038] sm:$0xff] }
  0xb7   : > { %5223 = vmatpush1.bf16.msra.mxu0 %v6781_v23  ;;  %5305 = vmatpush1.bf16.msra.mxu1 %v6783_v24  ;;  %v6976_v23 = vcombine.high %v622_v18, %v634_v19  ;;  %v645_v24 = vld [vmem:[%s7792_s15 + $0xb50] sm:$0xff] }
  0xb8   : > { %5224 = vmatprep.subr.bf16.mxu0 %v6806_v25  ;;  %5306 = vmatprep.subr.bf16.mxu1 %v6808_v26  ;;  %v657_v25 = vld [vmem:[%s7792_s15 + $0xbb0] sm:$0xff]  ;;  %v646_v26 = vld [vmem:[%s7792_s15 + $0xb58] sm:$0xff] }
  0xb9   : > { %v6998_v30 = vcombine.high %v645_v24, %v657_v25  ;;  %v6997_v38 = vcombine.low %v645_v24, %v657_v25  ;;  %v6999_v39 = vcombine.low %v646_v26, %v658_v27  ;;  %v826_v24 = vld [vmem:[%s7792_s15 + $0x10f8] sm:$0xff] }
  0xbb   : > { %5225 = vmatpush1.bf16.msra.mxu0 %v6805_v31  ;;  %5307 = vmatpush1.bf16.msra.mxu1 %v6807_v33  ;;  %v7000_v31 = vcombine.high %v646_v26, %v658_v27  ;;  %v669_v33 = vld [vmem:[%s7792_s15 + $0xc10] sm:$0xff] }
  0xbc   : > { %5226 = vmatprep.subr.bf16.mxu0 %v6830_v35  ;;  %5308 = vmatprep.subr.bf16.mxu1 %v6832_v36  ;;  %v681_v35 = vld [vmem:[%s7792_s15 + $0xc70] sm:$0xff]  ;;  %v670_v36 = vld [vmem:[%s7792_s15 + $0xc18] sm:$0xff] }
  0xbd   : > { %v7022_v40 = vcombine.high %v669_v33, %v681_v35  ;;  %v7021_v46 = vcombine.low %v669_v33, %v681_v35  ;;  %v7023_v47 = vcombine.low %v670_v36, %v682_v37  ;;  %v850_v33 = vld [vmem:[%s7792_s15 + $0x11b8] sm:$0xff] }
  0xbf   : > { %5227 = vmatpush1.bf16.msra.mxu0 %v6829_v41  ;;  %5309 = vmatpush1.bf16.msra.mxu1 %v6831_v42  ;;  %v7024_v41 = vcombine.high %v670_v36, %v682_v37  ;;  %v693_v42 = vld [vmem:[%s7792_s15 + $0xcd0] sm:$0xff] }
  0xc0   : > { %5228 = vmatprep.subr.bf16.mxu0 %v6854_v43  ;;  %5310 = vmatprep.subr.bf16.mxu1 %v6856_v44  ;;  %v705_v43 = vld [vmem:[%s7792_s15 + $0xd30] sm:$0xff]  ;;  %v694_v44 = vld [vmem:[%s7792_s15 + $0xcd8] sm:$0xff] }
  0xc1   : > { %v7046_v48 = vcombine.high %v693_v42, %v705_v43  ;;  %v7045_v54 = vcombine.low %v693_v42, %v705_v43  ;;  %v7047_v55 = vcombine.low %v694_v44, %v706_v45  ;;  %v874_v42 = vld [vmem:[%s7792_s15 + $0x1278] sm:$0xff] }
  0xc3   : > { %5229 = vmatpush1.bf16.msra.mxu0 %v6853_v49  ;;  %5311 = vmatpush1.bf16.msra.mxu1 %v6855_v50  ;;  %v7048_v49 = vcombine.high %v694_v44, %v706_v45  ;;  %v717_v50 = vld [vmem:[%s7792_s15 + $0xd90] sm:$0xff] }
  0xc4   : > { %5230 = vmatprep.subr.bf16.mxu0 %v6878_v51  ;;  %5312 = vmatprep.subr.bf16.mxu1 %v6880_v52  ;;  %v729_v51 = vld [vmem:[%s7792_s15 + $0xdf0] sm:$0xff]  ;;  %v718_v52 = vld [vmem:[%s7792_s15 + $0xd98] sm:$0xff] }
  0xc5   : > { %v7070_v56 = vcombine.high %v717_v50, %v729_v51  ;;  %v7069_v62 = vcombine.low %v717_v50, %v729_v51  ;;  %v7071_v63 = vcombine.low %v718_v52, %v730_v53  ;;  %v898_v50 = vld [vmem:[%s7792_s15 + $0x1338] sm:$0xff] }
  0xc7   : > { %5231 = vmatpush1.bf16.msra.mxu0 %v6877_v57  ;;  %5313 = vmatpush1.bf16.msra.mxu1 %v6879_v58  ;;  %v7072_v57 = vcombine.high %v718_v52, %v730_v53  ;;  %v741_v58 = vld [vmem:[%s7792_s15 + $0xe50] sm:$0xff] }
  0xc8   : > { %5232 = vmatprep.subr.bf16.mxu0 %v6902_v59  ;;  %5314 = vmatprep.subr.bf16.mxu1 %v6904_v60  ;;  %v753_v59 = vld [vmem:[%s7792_s15 + $0xeb0] sm:$0xff]  ;;  %v742_v60 = vld [vmem:[%s7792_s15 + $0xe58] sm:$0xff] }
  0xc9   : > { %v7094_v0 = vcombine.high %v741_v58, %v753_v59  ;;  %v7093_v7 = vcombine.low %v741_v58, %v753_v59  ;;  %v7095_v8 = vcombine.low %v742_v60, %v754_v61  ;;  %v922_v58 = vld [vmem:[%s7792_s15 + $0x13f8] sm:$0xff] }
  0xcb   : > { %5233 = vmatpush1.bf16.msra.mxu0 %v6901_v1  ;;  %5315 = vmatpush1.bf16.msra.mxu1 %v6903_v3  ;;  %v7096_v1 = vcombine.high %v742_v60, %v754_v61  ;;  %v765_v3 = vld [vmem:[%s7792_s15 + $0xf10] sm:$0xff] }
  0xcc   : > { %5234 = vmatprep.subr.bf16.mxu0 %v6926_v4  ;;  %5316 = vmatprep.subr.bf16.mxu1 %v6928_v5  ;;  %v777_v4 = vld [vmem:[%s7792_s15 + $0xf70] sm:$0xff]  ;;  %v766_v5 = vld [vmem:[%s7792_s15 + $0xf18] sm:$0xff] }
  0xcd   : > { %v7118_v9 = vcombine.high %v765_v3, %v777_v4  ;;  %v7117_v15 = vcombine.low %v765_v3, %v777_v4  ;;  %v7119_v18 = vcombine.low %v766_v5, %v778_v6  ;;  %v946_v3 = vld [vmem:[%s7792_s15 + $0x14b8] sm:$0xff] }
  0xcf   : > { %5235 = vmatpush1.bf16.msra.mxu0 %v6925_v10  ;;  %5317 = vmatpush1.bf16.msra.mxu1 %v6927_v11  ;;  %v7120_v10 = vcombine.high %v766_v5, %v778_v6  ;;  %v789_v11 = vld [vmem:[%s7792_s15 + $0xfd0] sm:$0xff] }
  0xd0   : > { %5236 = vmatprep.subr.bf16.mxu0 %v6950_v12  ;;  %5318 = vmatprep.subr.bf16.mxu1 %v6952_v13  ;;  %v801_v12 = vld [vmem:[%s7792_s15 + $0x1030] sm:$0xff]  ;;  %v790_v13 = vld [vmem:[%s7792_s15 + $0xfd8] sm:$0xff] }
  0xd1   : > { %v7142_v19 = vcombine.high %v789_v11, %v801_v12  ;;  %v7141_v25 = vcombine.low %v789_v11, %v801_v12  ;;  %v7143_v26 = vcombine.low %v790_v13, %v802_v14  ;;  %v970_v11 = vld [vmem:[%s7792_s15 + $0x1578] sm:$0xff] }
  0xd3   : > { %5237 = vmatpush1.bf16.msra.mxu0 %v6949_v20  ;;  %5319 = vmatpush1.bf16.msra.mxu1 %v6951_v21  ;;  %v7144_v20 = vcombine.high %v790_v13, %v802_v14  ;;  %v813_v21 = vld [vmem:[%s7792_s15 + $0x1090] sm:$0xff] }
  0xd4   : > { %5238 = vmatprep.subr.bf16.mxu0 %v6974_v22  ;;  %5320 = vmatprep.subr.bf16.mxu1 %v6976_v23  ;;  %v825_v22 = vld [vmem:[%s7792_s15 + $0x10f0] sm:$0xff]  ;;  %v814_v23 = vld [vmem:[%s7792_s15 + $0x1098] sm:$0xff] }
  0xd5   : > { %v7166_v27 = vcombine.high %v813_v21, %v825_v22  ;;  %v7165_v35 = vcombine.low %v813_v21, %v825_v22  ;;  %v7167_v36 = vcombine.low %v814_v23, %v826_v24  ;;  %v994_v21 = vld [vmem:[%s7792_s15 + $0x1638] sm:$0xff] }
  0xd7   : > { %5239 = vmatpush1.bf16.msra.mxu0 %v6973_v28  ;;  %5321 = vmatpush1.bf16.msra.mxu1 %v6975_v29  ;;  %v7168_v28 = vcombine.high %v814_v23, %v826_v24  ;;  %v837_v29 = vld [vmem:[%s7792_s15 + $0x1150] sm:$0xff] }
  0xd8   : > { %5240 = vmatprep.subr.bf16.mxu0 %v6998_v30  ;;  %5322 = vmatprep.subr.bf16.mxu1 %v7000_v31  ;;  %v849_v30 = vld [vmem:[%s7792_s15 + $0x11b0] sm:$0xff]  ;;  %v838_v31 = vld [vmem:[%s7792_s15 + $0x1158] sm:$0xff] }
  0xd9   : > { %v7190_v37 = vcombine.high %v837_v29, %v849_v30  ;;  %v7189_v43 = vcombine.low %v837_v29, %v849_v30  ;;  %v7191_v44 = vcombine.low %v838_v31, %v850_v33  ;;  %v1018_v29 = vld [vmem:[%s7792_s15 + $0x16f8] sm:$0xff] }
  0xdb   : > { %5241 = vmatpush1.bf16.msra.mxu0 %v6997_v38  ;;  %5323 = vmatpush1.bf16.msra.mxu1 %v6999_v39  ;;  %v7192_v38 = vcombine.high %v838_v31, %v850_v33  ;;  %v861_v39 = vld [vmem:[%s7792_s15 + $0x1210] sm:$0xff] }
  0xdc   : > { %5251 = vmatprep.subr.bf16.mxu0 %v7022_v40  ;;  %5333 = vmatprep.subr.bf16.mxu1 %v7024_v41  ;;  %v873_v40 = vld [vmem:[%s7792_s15 + $0x1270] sm:$0xff]  ;;  %v862_v41 = vld [vmem:[%s7792_s15 + $0x1218] sm:$0xff] }
  0xdd   : > { %v7214_v45 = vcombine.high %v861_v39, %v873_v40  ;;  %v7213_v51 = vcombine.low %v861_v39, %v873_v40  ;;  %v7215_v52 = vcombine.low %v862_v41, %v874_v42  ;;  %v1042_v39 = vld [vmem:[%s7792_s15 + $0x17b8] sm:$0xff] }
  0xde   : > { %5243 = vmatmul.mubr.bf16.vlgmr.msra.gmra.mrb[4].mxu0 %v7803_v17  ;;  %5325 = vmatmul.mubr.bf16.vlgmr.msra.gmra.mrb[4].mxu1 %v7803_v17 }
  0xdf   : > { %5252 = vmatpush1.bf16.msra.mxu0 %v7021_v46  ;;  %5334 = vmatpush1.bf16.msra.mxu1 %v7023_v47  ;;  %v7216_v46 = vcombine.high %v862_v41, %v874_v42  ;;  %v885_v47 = vld [vmem:[%s7792_s15 + $0x12d0] sm:$0xff] }
  0xe0   : > { %5253 = vmatprep.subr.bf16.mxu0 %v7046_v48  ;;  %5335 = vmatprep.subr.bf16.mxu1 %v7048_v49  ;;  %v897_v48 = vld [vmem:[%s7792_s15 + $0x1330] sm:$0xff]  ;;  %v886_v49 = vld [vmem:[%s7792_s15 + $0x12d8] sm:$0xff] }
  0xe1   : > { %5283 = vmatprep.mubr.bf16.mxu0 %v7879_v34  ;;  %5365 = vmatprep.mubr.bf16.mxu1 %v7879_v34  ;;  %v7238_v53 = vcombine.high %v885_v47, %v897_v48  ;;  %v7237_v59 = vcombine.low %v885_v47, %v897_v48  ;;  %v7239_v60 = vcombine.low %v886_v49, %v898_v50  ;;  %v300_v47 = vld [vmem:[%s7792_s15 + $0x88] sm:$0xff] }
  0xe3   : > { %5254 = vmatpush1.bf16.msra.mxu0 %v7045_v54  ;;  %5336 = vmatpush1.bf16.msra.mxu1 %v7047_v55  ;;  %v7240_v54 = vcombine.high %v886_v49, %v898_v50  ;;  %v909_v55 = vld [vmem:[%s7792_s15 + $0x1390] sm:$0xff] }
  0xe4   : > { %5255 = vmatprep.subr.bf16.mxu0 %v7070_v56  ;;  %5337 = vmatprep.subr.bf16.mxu1 %v7072_v57  ;;  %v921_v56 = vld [vmem:[%s7792_s15 + $0x13f0] sm:$0xff]  ;;  %v910_v57 = vld [vmem:[%s7792_s15 + $0x1398] sm:$0xff] }
  0xe5   : > { %v7262_v61 = vcombine.high %v909_v55, %v921_v56  ;;  %v7261_v4 = vcombine.low %v909_v55, %v921_v56  ;;  %v7263_v5 = vcombine.low %v910_v57, %v922_v58  ;;  %v324_v55 = vld [vmem:[%s7792_s15 + $0x148] sm:$0xff] }
  0xe7   : > { %5256 = vmatpush1.bf16.msra.mxu0 %v7069_v62  ;;  %5338 = vmatpush1.bf16.msra.mxu1 %v7071_v63  ;;  %v7264_v62 = vcombine.high %v910_v57, %v922_v58  ;;  %v933_v63 = vld [vmem:[%s7792_s15 + $0x1450] sm:$0xff] }
  0xe8   : > { %5257 = vmatprep.subr.bf16.mxu0 %v7094_v0  ;;  %5339 = vmatprep.subr.bf16.mxu1 %v7096_v1  ;;  %v945_v0 = vld [vmem:[%s7792_s15 + $0x14b0] sm:$0xff]  ;;  %v934_v1 = vld [vmem:[%s7792_s15 + $0x1458] sm:$0xff] }
  0xe9   : > { %v7286_v6 = vcombine.high %v933_v63, %v945_v0  ;;  %v7285_v12 = vcombine.low %v933_v63, %v945_v0  ;;  %v7287_v13 = vcombine.low %v934_v1, %v946_v3  ;;  %v348_v63 = vld [vmem:[%s7792_s15 + $0x208] sm:$0xff] }
  0xeb   : > { %5258 = vmatpush1.bf16.msra.mxu0 %v7093_v7  ;;  %5340 = vmatpush1.bf16.msra.mxu1 %v7095_v8  ;;  %v7288_v7 = vcombine.high %v934_v1, %v946_v3  ;;  %v957_v8 = vld [vmem:[%s7792_s15 + $0x1510] sm:$0xff] }
  0xec   : > { %5259 = vmatprep.subr.bf16.mxu0 %v7118_v9  ;;  %5341 = vmatprep.subr.bf16.mxu1 %v7120_v10  ;;  %v969_v9 = vld [vmem:[%s7792_s15 + $0x1570] sm:$0xff]  ;;  %v958_v10 = vld [vmem:[%s7792_s15 + $0x1518] sm:$0xff] }
  0xed   : > { %v7310_v14 = vcombine.high %v957_v8, %v969_v9  ;;  %v7309_v22 = vcombine.low %v957_v8, %v969_v9  ;;  %v7311_v23 = vcombine.low %v958_v10, %v970_v11  ;;  %v372_v8 = vld [vmem:[%s7792_s15 + $0x2c8] sm:$0xff] }
  0xef   : > { %5260 = vmatpush1.bf16.msra.mxu0 %v7117_v15  ;;  %5342 = vmatpush1.bf16.msra.mxu1 %v7119_v18  ;;  %v7312_v15 = vcombine.high %v958_v10, %v970_v11  ;;  %v981_v18 = vld [vmem:[%s7792_s15 + $0x15d0] sm:$0xff] }
  0xf0   : > { %5261 = vmatprep.subr.bf16.mxu0 %v7142_v19  ;;  %5343 = vmatprep.subr.bf16.mxu1 %v7144_v20  ;;  %v993_v19 = vld [vmem:[%s7792_s15 + $0x1630] sm:$0xff]  ;;  %v982_v20 = vld [vmem:[%s7792_s15 + $0x15d8] sm:$0xff] }
  0xf1   : > { %v7334_v24 = vcombine.high %v981_v18, %v993_v19  ;;  %v7333_v30 = vcombine.low %v981_v18, %v993_v19  ;;  %v7335_v31 = vcombine.low %v982_v20, %v994_v21  ;;  %v396_v18 = vld [vmem:[%s7792_s15 + $0x388] sm:$0xff] }
  0xf3   : > { %5262 = vmatpush1.bf16.msra.mxu0 %v7141_v25  ;;  %5344 = vmatpush1.bf16.msra.mxu1 %v7143_v26  ;;  %v7336_v25 = vcombine.high %v982_v20, %v994_v21  ;;  %v1005_v26 = vld [vmem:[%s7792_s15 + $0x1690] sm:$0xff] }
  0xf4   : > { %5263 = vmatprep.subr.bf16.mxu0 %v7166_v27  ;;  %5345 = vmatprep.subr.bf16.mxu1 %v7168_v28  ;;  %v1017_v27 = vld [vmem:[%s7792_s15 + $0x16f0] sm:$0xff]  ;;  %v1006_v28 = vld [vmem:[%s7792_s15 + $0x1698] sm:$0xff] }
  0xf5   : > { %v7358_v33 = vcombine.high %v1005_v26, %v1017_v27  ;;  %v7357_v40 = vcombine.low %v1005_v26, %v1017_v27  ;;  %v7359_v41 = vcombine.low %v1006_v28, %v1018_v29  ;;  %v420_v26 = vld [vmem:[%s7792_s15 + $0x448] sm:$0xff] }
  0xf7   : > { %5264 = vmatpush1.bf16.msra.mxu0 %v7165_v35  ;;  %5346 = vmatpush1.bf16.msra.mxu1 %v7167_v36  ;;  %v7360_v35 = vcombine.high %v1006_v28, %v1018_v29  ;;  %v1029_v36 = vld [vmem:[%s7792_s15 + $0x1750] sm:$0xff] }
  0xf8   : > { %5265 = vmatprep.subr.bf16.mxu0 %v7190_v37  ;;  %5347 = vmatprep.subr.bf16.mxu1 %v7192_v38  ;;  %v1041_v37 = vld [vmem:[%s7792_s15 + $0x17b0] sm:$0xff]  ;;  %v1030_v38 = vld [vmem:[%s7792_s15 + $0x1758] sm:$0xff] }
  0xf9   : > { %v7382_v42 = vcombine.high %v1029_v36, %v1041_v37  ;;  %v7381_v48 = vcombine.low %v1029_v36, %v1041_v37  ;;  %v7383_v49 = vcombine.low %v1030_v38, %v1042_v39  ;;  %v444_v36 = vld [vmem:[%s7792_s15 + $0x508] sm:$0xff] }
  0xfb   : > { %5266 = vmatpush1.bf16.msra.mxu0 %v7189_v43  ;;  %5348 = vmatpush1.bf16.msra.mxu1 %v7191_v44  ;;  %v7384_v43 = vcombine.high %v1030_v38, %v1042_v39  ;;  %v287_v44 = vld [vmem:[%s7792_s15 + $0x20] sm:$0xff] }
  0xfc   : > { %5267 = vmatprep.subr.bf16.mxu0 %v7214_v45  ;;  %5349 = vmatprep.subr.bf16.mxu1 %v7216_v46  ;;  %v299_v45 = vld [vmem:[%s7792_s15 + $0x80] sm:$0xff]  ;;  %v288_v46 = vld [vmem:[%s7792_s15 + $0x28] sm:$0xff] }
  0xfd   : > { %v6642_v50 = vcombine.high %v287_v44, %v299_v45  ;;  %v6641_v56 = vcombine.low %v287_v44, %v299_v45  ;;  %v6643_v57 = vcombine.low %v288_v46, %v300_v47  ;;  %v468_v44 = vld [vmem:[%s7792_s15 + $0x5c8] sm:$0xff] }
  0xff   : > { %5268 = vmatpush1.bf16.msra.mxu0 %v7213_v51  ;;  %5350 = vmatpush1.bf16.msra.mxu1 %v7215_v52  ;;  %v6644_v51 = vcombine.high %v288_v46, %v300_v47  ;;  %v311_v52 = vld [vmem:[%s7792_s15 + $0xe0] sm:$0xff] }
 0x100   : > { %5269 = vmatprep.subr.bf16.mxu0 %v7238_v53  ;;  %5351 = vmatprep.subr.bf16.mxu1 %v7240_v54  ;;  %v323_v53 = vld [vmem:[%s7792_s15 + $0x140] sm:$0xff]  ;;  %v312_v54 = vld [vmem:[%s7792_s15 + $0xe8] sm:$0xff] }
 0x101   : > { %v6666_v58 = vcombine.high %v311_v52, %v323_v53  ;;  %v6665_v0 = vcombine.low %v311_v52, %v323_v53  ;;  %v6667_v1 = vcombine.low %v312_v54, %v324_v55  ;;  %v492_v52 = vld [vmem:[%s7792_s15 + $0x688] sm:$0xff] }
 0x103   : > { %5270 = vmatpush1.bf16.msra.mxu0 %v7237_v59  ;;  %5352 = vmatpush1.bf16.msra.mxu1 %v7239_v60  ;;  %v6668_v59 = vcombine.high %v312_v54, %v324_v55  ;;  %v335_v60 = vld [vmem:[%s7792_s15 + $0x1a0] sm:$0xff] }
 0x104   : > { %5271 = vmatprep.subr.bf16.mxu0 %v7262_v61  ;;  %5353 = vmatprep.subr.bf16.mxu1 %v7264_v62  ;;  %v347_v61 = vld [vmem:[%s7792_s15 + $0x200] sm:$0xff]  ;;  %v336_v62 = vld [vmem:[%s7792_s15 + $0x1a8] sm:$0xff] }
 0x105   : > { %v6690_v3 = vcombine.high %v335_v60, %v347_v61  ;;  %v6689_v9 = vcombine.low %v335_v60, %v347_v61  ;;  %v6691_v10 = vcombine.low %v336_v62, %v348_v63  ;;  %v516_v60 = vld [vmem:[%s7792_s15 + $0x748] sm:$0xff] }
 0x107   : > { %5272 = vmatpush1.bf16.msra.mxu0 %v7261_v4  ;;  %5354 = vmatpush1.bf16.msra.mxu1 %v7263_v5  ;;  %v6692_v4 = vcombine.high %v336_v62, %v348_v63  ;;  %v359_v5 = vld [vmem:[%s7792_s15 + $0x260] sm:$0xff] }
 0x108   : > { %5273 = vmatprep.subr.bf16.mxu0 %v7286_v6  ;;  %5355 = vmatprep.subr.bf16.mxu1 %v7288_v7  ;;  %v371_v6 = vld [vmem:[%s7792_s15 + $0x2c0] sm:$0xff]  ;;  %v360_v7 = vld [vmem:[%s7792_s15 + $0x268] sm:$0xff] }
 0x109   : > { %v6714_v11 = vcombine.high %v359_v5, %v371_v6  ;;  %v6713_v19 = vcombine.low %v359_v5, %v371_v6  ;;  %v6715_v20 = vcombine.low %v360_v7, %v372_v8  ;;  %v540_v5 = vld [vmem:[%s7792_s15 + $0x808] sm:$0xff] }
 0x10b   : > { %5274 = vmatpush1.bf16.msra.mxu0 %v7285_v12  ;;  %5356 = vmatpush1.bf16.msra.mxu1 %v7287_v13  ;;  %v6716_v12 = vcombine.high %v360_v7, %v372_v8  ;;  %v383_v13 = vld [vmem:[%s7792_s15 + $0x320] sm:$0xff] }
 0x10c   : > { %5275 = vmatprep.subr.bf16.mxu0 %v7310_v14  ;;  %5357 = vmatprep.subr.bf16.mxu1 %v7312_v15  ;;  %v395_v14 = vld [vmem:[%s7792_s15 + $0x380] sm:$0xff]  ;;  %v384_v15 = vld [vmem:[%s7792_s15 + $0x328] sm:$0xff] }
 0x10d   : > { %v6738_v21 = vcombine.high %v383_v13, %v395_v14  ;;  %v6737_v27 = vcombine.low %v383_v13, %v395_v14  ;;  %v6739_v28 = vcombine.low %v384_v15, %v396_v18  ;;  %v564_v13 = vld [vmem:[%s7792_s15 + $0x8c8] sm:$0xff] }
 0x10f   : > { %5276 = vmatpush1.bf16.msra.mxu0 %v7309_v22  ;;  %5358 = vmatpush1.bf16.msra.mxu1 %v7311_v23  ;;  %v6740_v22 = vcombine.high %v384_v15, %v396_v18  ;;  %v407_v23 = vld [vmem:[%s7792_s15 + $0x3e0] sm:$0xff] }
 0x110   : > { %5277 = vmatprep.subr.bf16.mxu0 %v7334_v24  ;;  %5359 = vmatprep.subr.bf16.mxu1 %v7336_v25  ;;  %v419_v24 = vld [vmem:[%s7792_s15 + $0x440] sm:$0xff]  ;;  %v408_v25 = vld [vmem:[%s7792_s15 + $0x3e8] sm:$0xff] }
 0x111   : > { %v6762_v29 = vcombine.high %v407_v23, %v419_v24  ;;  %v6761_v37 = vcombine.low %v407_v23, %v419_v24  ;;  %v6763_v38 = vcombine.low %v408_v25, %v420_v26  ;;  %v588_v23 = vld [vmem:[%s7792_s15 + $0x988] sm:$0xff] }
 0x113   : > { %5278 = vmatpush1.bf16.msra.mxu0 %v7333_v30  ;;  %5360 = vmatpush1.bf16.msra.mxu1 %v7335_v31  ;;  %v6764_v30 = vcombine.high %v408_v25, %v420_v26  ;;  %v431_v31 = vld [vmem:[%s7792_s15 + $0x4a0] sm:$0xff] }
 0x114   : > { %5279 = vmatprep.subr.bf16.mxu0 %v7358_v33  ;;  %5361 = vmatprep.subr.bf16.mxu1 %v7360_v35  ;;  %v443_v33 = vld [vmem:[%s7792_s15 + $0x500] sm:$0xff]  ;;  %v432_v35 = vld [vmem:[%s7792_s15 + $0x4a8] sm:$0xff] }
 0x115   : > { %v6786_v39 = vcombine.high %v431_v31, %v443_v33  ;;  %v6785_v45 = vcombine.low %v431_v31, %v443_v33  ;;  %v6787_v46 = vcombine.low %v432_v35, %v444_v36  ;;  %v612_v31 = vld [vmem:[%s7792_s15 + $0xa48] sm:$0xff] }
 0x117   : > { %5280 = vmatpush1.bf16.msra.mxu0 %v7357_v40  ;;  %5362 = vmatpush1.bf16.msra.mxu1 %v7359_v41  ;;  %v6788_v40 = vcombine.high %v432_v35, %v444_v36  ;;  %v455_v41 = vld [vmem:[%s7792_s15 + $0x560] sm:$0xff] }
 0x118   : > { %5281 = vmatprep.subr.bf16.mxu0 %v7382_v42  ;;  %5363 = vmatprep.subr.bf16.mxu1 %v7384_v43  ;;  %v467_v42 = vld [vmem:[%s7792_s15 + $0x5c0] sm:$0xff]  ;;  %v456_v43 = vld [vmem:[%s7792_s15 + $0x568] sm:$0xff] }
 0x119   : > { %v6810_v47 = vcombine.high %v455_v41, %v467_v42  ;;  %v6809_v53 = vcombine.low %v455_v41, %v467_v42  ;;  %v6811_v54 = vcombine.low %v456_v43, %v468_v44  ;;  %v636_v41 = vld [vmem:[%s7792_s15 + $0xb08] sm:$0xff] }
 0x11b   : > { %5282 = vmatpush1.bf16.msra.mxu0 %v7381_v48  ;;  %5364 = vmatpush1.bf16.msra.mxu1 %v7383_v49  ;;  %v6812_v48 = vcombine.high %v456_v43, %v468_v44  ;;  %v479_v49 = vld [vmem:[%s7792_s15 + $0x620] sm:$0xff] }
 0x11c   : > { %5374 = vmatprep.subr.bf16.mxu0 %v6642_v50  ;;  %5456 = vmatprep.subr.bf16.mxu1 %v6644_v51  ;;  %v491_v50 = vld [vmem:[%s7792_s15 + $0x680] sm:$0xff]  ;;  %v480_v51 = vld [vmem:[%s7792_s15 + $0x628] sm:$0xff] }
 0x11d   : > { %v6834_v55 = vcombine.high %v479_v49, %v491_v50  ;;  %v6833_v61 = vcombine.low %v479_v49, %v491_v50  ;;  %v6835_v62 = vcombine.low %v480_v51, %v492_v52  ;;  %v660_v49 = vld [vmem:[%s7792_s15 + $0xbc8] sm:$0xff] }
 0x11e   : > { %5284 = vmatmul.mubr.bf16.vlgmr.msra.gmra.mrb[4].mxu0 %v7945_v32  ;;  %5366 = vmatmul.mubr.bf16.vlgmr.msra.gmra.mrb[4].mxu1 %v7945_v32 }
 0x11f   : > { %5375 = vmatpush1.bf16.msra.mxu0 %v6641_v56  ;;  %5457 = vmatpush1.bf16.msra.mxu1 %v6643_v57  ;;  %v6836_v56 = vcombine.high %v480_v51, %v492_v52  ;;  %v503_v57 = vld [vmem:[%s7792_s15 + $0x6e0] sm:$0xff] }
 0x120   : > { %5376 = vmatprep.subr.bf16.mxu0 %v6666_v58  ;;  %5458 = vmatprep.subr.bf16.mxu1 %v6668_v59  ;;  %v515_v58 = vld [vmem:[%s7792_s15 + $0x740] sm:$0xff]  ;;  %v504_v59 = vld [vmem:[%s7792_s15 + $0x6e8] sm:$0xff] }
 0x121   : > { %5406 = vmatprep.mubr.bf16.mxu0 %v7801_v16  ;;  %5488 = vmatprep.mubr.bf16.mxu1 %v7801_v16  ;;  %v6858_v63 = vcombine.high %v503_v57, %v515_v58  ;;  %v6857_v6 = vcombine.low %v503_v57, %v515_v58  ;;  %v6859_v7 = vcombine.low %v504_v59, %v516_v60  ;;  %v684_v57 = vld [vmem:[%s7792_s15 + $0xc88] sm:$0xff] }
 0x123   : > { %5377 = vmatpush1.bf16.msra.mxu0 %v6665_v0  ;;  %5459 = vmatpush1.bf16.msra.mxu1 %v6667_v1  ;;  %v6860_v0 = vcombine.high %v504_v59, %v516_v60  ;;  %v527_v1 = vld [vmem:[%s7792_s15 + $0x7a0] sm:$0xff] }
 0x124   : > { %5378 = vmatprep.subr.bf16.mxu0 %v6690_v3  ;;  %5460 = vmatprep.subr.bf16.mxu1 %v6692_v4  ;;  %v539_v3 = vld [vmem:[%s7792_s15 + $0x800] sm:$0xff]  ;;  %v528_v4 = vld [vmem:[%s7792_s15 + $0x7a8] sm:$0xff] }
 0x125   : > { %v6882_v8 = vcombine.high %v527_v1, %v539_v3  ;;  %v6881_v14 = vcombine.low %v527_v1, %v539_v3  ;;  %v6883_v15 = vcombine.low %v528_v4, %v540_v5  ;;  %v708_v1 = vld [vmem:[%s7792_s15 + $0xd48] sm:$0xff] }
 0x127   : > { %5379 = vmatpush1.bf16.msra.mxu0 %v6689_v9  ;;  %5461 = vmatpush1.bf16.msra.mxu1 %v6691_v10  ;;  %v6884_v9 = vcombine.high %v528_v4, %v540_v5  ;;  %v551_v10 = vld [vmem:[%s7792_s15 + $0x860] sm:$0xff] }
 0x128   : > { %5380 = vmatprep.subr.bf16.mxu0 %v6714_v11  ;;  %5462 = vmatprep.subr.bf16.mxu1 %v6716_v12  ;;  %v563_v11 = vld [vmem:[%s7792_s15 + $0x8c0] sm:$0xff]  ;;  %v552_v12 = vld [vmem:[%s7792_s15 + $0x868] sm:$0xff] }
 0x129   : > { %v6906_v18 = vcombine.high %v551_v10, %v563_v11  ;;  %v6905_v24 = vcombine.low %v551_v10, %v563_v11  ;;  %v6907_v25 = vcombine.low %v552_v12, %v564_v13  ;;  %v732_v10 = vld [vmem:[%s7792_s15 + $0xe08] sm:$0xff] }
 0x12b   : > { %5381 = vmatpush1.bf16.msra.mxu0 %v6713_v19  ;;  %5463 = vmatpush1.bf16.msra.mxu1 %v6715_v20  ;;  %v6908_v19 = vcombine.high %v552_v12, %v564_v13  ;;  %v575_v20 = vld [vmem:[%s7792_s15 + $0x920] sm:$0xff] }
 0x12c   : > { %5382 = vmatprep.subr.bf16.mxu0 %v6738_v21  ;;  %5464 = vmatprep.subr.bf16.mxu1 %v6740_v22  ;;  %v587_v21 = vld [vmem:[%s7792_s15 + $0x980] sm:$0xff]  ;;  %v576_v22 = vld [vmem:[%s7792_s15 + $0x928] sm:$0xff] }
 0x12d   : > { %v6930_v26 = vcombine.high %v575_v20, %v587_v21  ;;  %v6929_v33 = vcombine.low %v575_v20, %v587_v21  ;;  %v6931_v35 = vcombine.low %v576_v22, %v588_v23  ;;  %v756_v20 = vld [vmem:[%s7792_s15 + $0xec8] sm:$0xff] }
 0x12f   : > { %5383 = vmatpush1.bf16.msra.mxu0 %v6737_v27  ;;  %5465 = vmatpush1.bf16.msra.mxu1 %v6739_v28  ;;  %v6932_v27 = vcombine.high %v576_v22, %v588_v23  ;;  %v599_v28 = vld [vmem:[%s7792_s15 + $0x9e0] sm:$0xff] }
 0x130   : > { %5384 = vmatprep.subr.bf16.mxu0 %v6762_v29  ;;  %5466 = vmatprep.subr.bf16.mxu1 %v6764_v30  ;;  %v611_v29 = vld [vmem:[%s7792_s15 + $0xa40] sm:$0xff]  ;;  %v600_v30 = vld [vmem:[%s7792_s15 + $0x9e8] sm:$0xff] }
 0x131   : > { %v6954_v36 = vcombine.high %v599_v28, %v611_v29  ;;  %v6953_v42 = vcombine.low %v599_v28, %v611_v29  ;;  %v6955_v43 = vcombine.low %v600_v30, %v612_v31  ;;  %v780_v28 = vld [vmem:[%s7792_s15 + $0xf88] sm:$0xff] }
 0x133   : > { %5385 = vmatpush1.bf16.msra.mxu0 %v6761_v37  ;;  %5467 = vmatpush1.bf16.msra.mxu1 %v6763_v38  ;;  %v6956_v37 = vcombine.high %v600_v30, %v612_v31  ;;  %v623_v38 = vld [vmem:[%s7792_s15 + $0xaa0] sm:$0xff] }
 0x134   : > { %5386 = vmatprep.subr.bf16.mxu0 %v6786_v39  ;;  %5468 = vmatprep.subr.bf16.mxu1 %v6788_v40  ;;  %v635_v39 = vld [vmem:[%s7792_s15 + $0xb00] sm:$0xff]  ;;  %v624_v40 = vld [vmem:[%s7792_s15 + $0xaa8] sm:$0xff] }
 0x135   : > { %v6978_v44 = vcombine.high %v623_v38, %v635_v39  ;;  %v6977_v50 = vcombine.low %v623_v38, %v635_v39  ;;  %v6979_v51 = vcombine.low %v624_v40, %v636_v41  ;;  %v792_v38 = vld [vmem:[%s7792_s15 + $0xfe8] sm:$0xff] }
 0x136   : > { %v804_v39 = vld [vmem:[%s7792_s15 + $0x1048] sm:$0xff] }
 0x137   : > { %5387 = vmatpush1.bf16.msra.mxu0 %v6785_v45  ;;  %5469 = vmatpush1.bf16.msra.mxu1 %v6787_v46  ;;  %v6980_v45 = vcombine.high %v624_v40, %v636_v41  ;;  %v647_v46 = vld [vmem:[%s7792_s15 + $0xb60] sm:$0xff] }
 0x138   : > { %5388 = vmatprep.subr.bf16.mxu0 %v6810_v47  ;;  %5470 = vmatprep.subr.bf16.mxu1 %v6812_v48  ;;  %v659_v47 = vld [vmem:[%s7792_s15 + $0xbc0] sm:$0xff]  ;;  %v648_v48 = vld [vmem:[%s7792_s15 + $0xb68] sm:$0xff] }
 0x139   : > { %v7002_v52 = vcombine.high %v647_v46, %v659_v47  ;;  %v7001_v58 = vcombine.low %v647_v46, %v659_v47  ;;  %v7003_v59 = vcombine.low %v648_v48, %v660_v49  ;;  %v8193_v41 = vld [vmem:[%s8183_s20] sm:$0xff]  ;;  %v8202_v47 = vsub.s32 3, %v7786_v2 }
 0x13b   : > { %5389 = vmatpush1.bf16.msra.mxu0 %v6809_v53  ;;  %5471 = vmatpush1.bf16.msra.mxu1 %v6811_v54  ;;  %v7004_v53 = vcombine.high %v648_v48, %v660_v49  ;;  %v671_v54 = vld [vmem:[%s7792_s15 + $0xc20] sm:$0xff]  ;;  %v7148_v49 = vcombine.high %v792_v38, %v804_v39 }
 0x13c   : > { %5390 = vmatprep.subr.bf16.mxu0 %v6834_v55  ;;  %5472 = vmatprep.subr.bf16.mxu1 %v6836_v56  ;;  %v683_v55 = vld [vmem:[%s7792_s15 + $0xc80] sm:$0xff]  ;;  %v672_v56 = vld [vmem:[%s7792_s15 + $0xc28] sm:$0xff] }
 0x13d   : > { %v7026_v60 = vcombine.high %v671_v54, %v683_v55  ;;  %v7025_v3 = vcombine.low %v671_v54, %v683_v55  ;;  %v7027_v4 = vcombine.low %v672_v56, %v684_v57  ;;  %v828_v54 = vld [vmem:[%s7792_s15 + $0x1108] sm:$0xff] }
 0x13f   : > { %5391 = vmatpush1.bf16.msra.mxu0 %v6833_v61  ;;  %5473 = vmatpush1.bf16.msra.mxu1 %v6835_v62  ;;  %v7028_v61 = vcombine.high %v672_v56, %v684_v57  ;;  %v695_v62 = vld [vmem:[%s7792_s15 + $0xce0] sm:$0xff] }
 0x140   : > { %5392 = vmatprep.subr.bf16.mxu0 %v6858_v63  ;;  %5474 = vmatprep.subr.bf16.mxu1 %v6860_v0  ;;  %v707_v63 = vld [vmem:[%s7792_s15 + $0xd40] sm:$0xff]  ;;  %v696_v0 = vld [vmem:[%s7792_s15 + $0xce8] sm:$0xff] }
 0x141   : > { %v7050_v5 = vcombine.high %v695_v62, %v707_v63  ;;  %v7049_v11 = vcombine.low %v695_v62, %v707_v63  ;;  %v7051_v12 = vcombine.low %v696_v0, %v708_v1 }
 0x143   : > { %5393 = vmatpush1.bf16.msra.mxu0 %v6857_v6  ;;  %5475 = vmatpush1.bf16.msra.mxu1 %v6859_v7  ;;  %v7052_v6 = vcombine.high %v696_v0, %v708_v1  ;;  %v719_v7 = vld [vmem:[%s7792_s15 + $0xda0] sm:$0xff] }
 0x144   : > { %5394 = vmatprep.subr.bf16.mxu0 %v6882_v8  ;;  %5476 = vmatprep.subr.bf16.mxu1 %v6884_v9  ;;  %v731_v8 = vld [vmem:[%s7792_s15 + $0xe00] sm:$0xff]  ;;  %v720_v9 = vld [vmem:[%s7792_s15 + $0xda8] sm:$0xff] }
 0x145   : > { %v7074_v13 = vcombine.high %v719_v7, %v731_v8  ;;  %v7073_v21 = vcombine.low %v719_v7, %v731_v8  ;;  %v7075_v22 = vcombine.low %v720_v9, %v732_v10  ;;  %v839_v0 = vld [vmem:[%s7792_s15 + $0x1160] sm:$0xff]  ;;  %v852_v7 = vld [vmem:[%s7792_s15 + $0x11c8] sm:$0xff] }
 0x146   : > { %v851_v1 = vld [vmem:[%s7792_s15 + $0x11c0] sm:$0xff] }
 0x147   : > { %5395 = vmatpush1.bf16.msra.mxu0 %v6881_v14  ;;  %5477 = vmatpush1.bf16.msra.mxu1 %v6883_v15  ;;  %v7076_v14 = vcombine.high %v720_v9, %v732_v10  ;;  %v743_v15 = vld [vmem:[%s7792_s15 + $0xe60] sm:$0xff] }
 0x148   : > { %5396 = vmatprep.subr.bf16.mxu0 %v6906_v18  ;;  %5478 = vmatprep.subr.bf16.mxu1 %v6908_v19  ;;  %v755_v18 = vld [vmem:[%s7792_s15 + $0xec0] sm:$0xff]  ;;  %v744_v19 = vld [vmem:[%s7792_s15 + $0xe68] sm:$0xff] }
 0x149   : > { %v7098_v23 = vcombine.high %v743_v15, %v755_v18  ;;  %v7097_v29 = vcombine.low %v743_v15, %v755_v18  ;;  %v7099_v30 = vcombine.low %v744_v19, %v756_v20 }
 0x14b   : > { %5397 = vmatpush1.bf16.msra.mxu0 %v6905_v24  ;;  %5479 = vmatpush1.bf16.msra.mxu1 %v6907_v25  ;;  %v7100_v24 = vcombine.high %v744_v19, %v756_v20  ;;  %v767_v25 = vld [vmem:[%s7792_s15 + $0xf20] sm:$0xff]  ;;  %v7194_v20 = vcombine.high %v839_v0, %v851_v1 }
 0x14c   : > { %5398 = vmatprep.subr.bf16.mxu0 %v6930_v26  ;;  %5480 = vmatprep.subr.bf16.mxu1 %v6932_v27  ;;  %v779_v26 = vld [vmem:[%s7792_s15 + $0xf80] sm:$0xff]  ;;  %v768_v27 = vld [vmem:[%s7792_s15 + $0xf28] sm:$0xff] }
 0x14d   : > { %v7122_v31 = vcombine.high %v767_v25, %v779_v26  ;;  %v7121_v40 = vcombine.low %v767_v25, %v779_v26  ;;  %v7123_v46 = vcombine.low %v768_v27, %v780_v28  ;;  %v875_v25 = vld [vmem:[%s7792_s15 + $0x1280] sm:$0xff] }
 0x14f   : > { %5399 = vmatpush1.bf16.msra.mxu0 %v6929_v33  ;;  %5481 = vmatpush1.bf16.msra.mxu1 %v6931_v35  ;;  %v7124_v33 = vcombine.high %v768_v27, %v780_v28  ;;  %v791_v35 = vld [vmem:[%s7792_s15 + $0xfe0] sm:$0xff]  ;;  %v864_v27 = vld [vmem:[%s7792_s15 + $0x1228] sm:$0xff] }
 0x150   : > { %5400 = vmatprep.subr.bf16.mxu0 %v6954_v36  ;;  %5482 = vmatprep.subr.bf16.mxu1 %v6956_v37  ;;  %v803_v36 = vld [vmem:[%s7792_s15 + $0x1040] sm:$0xff]  ;;  %v8188_v37 = vsub.s32 0, %v7786_v2  ;;  %v876_v28 = vld [vmem:[%s7792_s15 + $0x1288] sm:$0xff] }
 0x151   : > { %v7146_v48 = vcombine.high %v791_v35, %v803_v36 }
 0x153   : > { %5401 = vmatpush1.bf16.msra.mxu0 %v6953_v42  ;;  %5483 = vmatpush1.bf16.msra.mxu1 %v6955_v43  ;;  %v8196_v42 = vsub.s32 2, %v7786_v2  ;;  %v8199_v43 = vsub.s32 1, %v7786_v2 }
 0x154   : > { %5402 = vmatprep.subr.bf16.mxu0 %v6978_v44  ;;  %5484 = vmatprep.subr.bf16.mxu1 %v6980_v45  ;;  %v7694_v44 = vmov 1983009808  }
 0x155   : > { %v6057_v45 = vunpack.c.l.s4 %v7694_v44  ;;  %v1068_v55 = vrot.slane %v8193_v41, %v8196_v42  ;;  %v1064_v56 = vrot.slane %v8193_v41, %v8199_v43  ;;  %v888_v44 = vld [vmem:[%s7792_s15 + $0x12e8] sm:$0xff] }
 0x157   : > { %5403 = vmatpush1.bf16.msra.mxu0 %v6977_v50  ;;  %5485 = vmatpush1.bf16.msra.mxu1 %v6979_v51  ;;  %v815_v50 = vld [vmem:[%s7792_s15 + $0x10a0] sm:$0xff]  ;;  %v6058_v57 = vunpack.c.0.s8 %v6057_v45  ;;  %v900_v45 = vld [vmem:[%s7792_s15 + $0x1348] sm:$0xff] }
 0x158   : > { %5404 = vmatprep.subr.bf16.mxu0 %v7002_v52  ;;  %5486 = vmatprep.subr.bf16.mxu1 %v7004_v53  ;;  %v827_v51 = vld [vmem:[%s7792_s15 + $0x1100] sm:$0xff]  ;;  %v1060_v52 = vrot.slane %v8193_v41, %v8188_v37  ;;  %v816_v53 = vld [vmem:[%s7792_s15 + $0x10a8] sm:$0xff] }
 0x159   : > { %v7172_v63 = vcombine.high %v816_v53, %v828_v54  ;;  %v8222_v10 = vsub.s32 %v6058_v57, %v7786_v2  ;;  %v7171_v19 = vcombine.low %v816_v53, %v828_v54  ;;  %v912_v53 = vld [vmem:[%s7792_s15 + $0x13a8] sm:$0xff] }
 0x15a   : > { %v924_v54 = vld [vmem:[%s7792_s15 + $0x1408] sm:$0xff] }
 0x15b   : > { %5405 = vmatpush1.bf16.msra.mxu0 %v7001_v58  ;;  %5487 = vmatpush1.bf16.msra.mxu1 %v7003_v59  ;;  %v7145_v58 = vcombine.low %v791_v35, %v803_v36  ;;  %v1072_v59 = vrot.slane %v8193_v41, %v8202_v47  ;;  %v7220_v36 = vcombine.high %v864_v27, %v876_v28 }
 0x15c   : > { %5415 = vmatprep.subr.bf16.mxu0 %v7026_v60  ;;  %5497 = vmatprep.subr.bf16.mxu1 %v7028_v61  ;;  %v7147_v60 = vcombine.low %v792_v38, %v804_v39  ;;  %v7170_v61 = vcombine.high %v815_v50, %v827_v51  ;;  %v887_v38 = vld [vmem:[%s7792_s15 + $0x12e0] sm:$0xff] }
 0x15d   : > { %v899_v39 = vld [vmem:[%s7792_s15 + $0x1340] sm:$0xff] }
 0x15e   : > { %5407 = vmatmul.mubr.bf16.vlgmr.msra.gmra.mrb[8].mxu0 %v7803_v17  ;;  %5489 = vmatmul.mubr.bf16.vlgmr.msra.gmra.mrb[8].mxu1 %v7803_v17 }
 0x15f   : > { %5416 = vmatpush1.bf16.msra.mxu0 %v7025_v3  ;;  %5498 = vmatpush1.bf16.msra.mxu1 %v7027_v4 }
 0x160   : > { %5417 = vmatprep.subr.bf16.mxu0 %v7050_v5  ;;  %5499 = vmatprep.subr.bf16.mxu1 %v7052_v6  ;;  %v840_v6 = vld [vmem:[%s7792_s15 + $0x1168] sm:$0xff] }
 0x161   : > { %5447 = vmatprep.mubr.bf16.mxu0 %v7879_v34  ;;  %5529 = vmatprep.mubr.bf16.mxu1 %v7879_v34 }
 0x163   : > { %5418 = vmatpush1.bf16.msra.mxu0 %v7049_v11  ;;  %5500 = vmatpush1.bf16.msra.mxu1 %v7051_v12 }
 0x164   : > { %5419 = vmatprep.subr.bf16.mxu0 %v7074_v13  ;;  %5501 = vmatprep.subr.bf16.mxu1 %v7076_v14  ;;  %v7169_v13 = vcombine.low %v815_v50, %v827_v51  ;;  %v7244_v50 = vcombine.high %v888_v44, %v900_v45  ;;  %v911_v51 = vld [vmem:[%s7792_s15 + $0x13a0] sm:$0xff] }
 0x167   : > { %5420 = vmatpush1.bf16.msra.mxu0 %v7073_v21  ;;  %5502 = vmatpush1.bf16.msra.mxu1 %v7075_v22 }
 0x168   : > { %5421 = vmatprep.subr.bf16.mxu0 %v7098_v23  ;;  %5503 = vmatprep.subr.bf16.mxu1 %v7100_v24  ;;  %v7196_v23 = vcombine.high %v840_v6, %v852_v7  ;;  %v863_v24 = vld [vmem:[%s7792_s15 + $0x1220] sm:$0xff] }
 0x169   : > { %v7218_v35 = vcombine.high %v863_v24, %v875_v25 }
 0x16b   : > { %5422 = vmatpush1.bf16.msra.mxu0 %v7097_v29  ;;  %5504 = vmatpush1.bf16.msra.mxu1 %v7099_v30  ;;  %v7193_v30 = vcombine.low %v839_v0, %v851_v1  ;;  %v7267_v0 = vcombine.low %v912_v53, %v924_v54 }
 0x16c   : > { %5423 = vmatprep.subr.bf16.mxu0 %v7122_v31  ;;  %5505 = vmatprep.subr.bf16.mxu1 %v7124_v33  ;;  %v7195_v33 = vcombine.low %v840_v6, %v852_v7  ;;  %v960_v6 = vld [vmem:[%s7792_s15 + $0x1528] sm:$0xff] }
 0x16d   : > { %v972_v7 = vld [vmem:[%s7792_s15 + $0x1588] sm:$0xff] }
 0x16f   : > { %5424 = vmatpush1.bf16.msra.mxu0 %v7121_v40  ;;  %5506 = vmatpush1.bf16.msra.mxu1 %v7123_v46  ;;  %v7217_v46 = vcombine.low %v863_v24, %v875_v25  ;;  %v1019_v24 = vld [vmem:[%s7792_s15 + $0x1700] sm:$0xff]  ;;  %v1008_v25 = vld [vmem:[%s7792_s15 + $0x16a8] sm:$0xff] }
 0x170   : > { %5425 = vmatprep.subr.bf16.mxu0 %v7146_v48  ;;  %5507 = vmatprep.subr.bf16.mxu1 %v7148_v49  ;;  %v7219_v48 = vcombine.low %v864_v27, %v876_v28  ;;  %v7242_v49 = vcombine.high %v887_v38, %v899_v39 }
 0x171   : > { %v5121_v62 = vpop.f32.mrb[0].mxu0  ;;  %v5203_v4 = vpop.f32.mrb[0].mxu1 }
 0x172   : > { %v7482_v3 = vadd.f32 %v5121_v62, %v1060_v52  ;;  %v5123_v5 = vpop.f32.mrb[1].mxu0  ;;  %v7484_v8 = vadd.f32 %v5203_v4, %v1068_v55  ;;  %v5205_v11 = vpop.f32.mrb[1].mxu1  ;;  %v923_v52 = vld [vmem:[%s7792_s15 + $0x1400] sm:$0xff]  ;;  %v7241_v55 = vcombine.low %v887_v38, %v899_v39  ;;  %v948_v62 = vld [vmem:[%s7792_s15 + $0x14c8] sm:$0xff] }
 0x173   : > { %v7483_v9 = vadd.f32 %v5123_v5, %v1064_v56  ;;  %v5125_v12 = vpop.f32.mrb[2].mxu0  ;;  %5426 = vmatpush1.bf16.msra.mxu0 %v7145_v58  ;;  %v7485_v14 = vadd.f32 %v5205_v11, %v1072_v59  ;;  %v5207_v15 = vpop.f32.mrb[2].mxu1  ;;  %5508 = vmatpush1.bf16.msra.mxu1 %v7147_v60  ;;  %v7243_v56 = vcombine.low %v888_v44, %v900_v45  ;;  %v935_v59 = vld [vmem:[%s7792_s15 + $0x1460] sm:$0xff]  ;;  %v289_v45 = vld [vmem:[%s7792_s15 + $0x30] sm:$0xff] }
 0x174   : > { %v5126_v18 = vpop.f32.mrb[3].mxu0  ;;  %5427 = vmatprep.subr.bf16.mxu0 %v7170_v61  ;;  %v5208_v22 = vpop.f32.mrb[3].mxu1  ;;  %5509 = vmatprep.subr.bf16.mxu1 %v7172_v63  ;;  %v7266_v57 = vcombine.high %v911_v51, %v923_v52  ;;  %v7268_v58 = vcombine.high %v912_v53, %v924_v54  ;;  %v947_v60 = vld [vmem:[%s7792_s15 + $0x14c0] sm:$0xff]  ;;  %v936_v61 = vld [vmem:[%s7792_s15 + $0x1468] sm:$0xff]  ;;  %v7265_v63 = vcombine.low %v911_v51, %v923_v52  ;;  %v313_v54 = vld [vmem:[%s7792_s15 + $0xf0] sm:$0xff] }
 0x175   : > { %v6054_v21 = vcombine.low %v7482_v3, %v7483_v9  ;;  %v6055_v26 = vcombine.low %v7484_v8, %v7485_v14  ;;  %v7290_v1 = vcombine.high %v935_v59, %v947_v60  ;;  %v7292_v3 = vcombine.high %v936_v61, %v948_v62  ;;  %v959_v4 = vld [vmem:[%s7792_s15 + $0x1520] sm:$0xff]  ;;  %v984_v15 = vld [vmem:[%s7792_s15 + $0x15e8] sm:$0xff] }
 0x176   : > { %v971_v5 = vld [vmem:[%s7792_s15 + $0x1580] sm:$0xff]  ;;  %v7289_v8 = vcombine.low %v935_v59, %v947_v60  ;;  %v7291_v9 = vcombine.low %v936_v61, %v948_v62  ;;  %v7316_v12 = vcombine.high %v960_v6, %v972_v7  ;;  %v996_v18 = vld [vmem:[%s7792_s15 + $0x1648] sm:$0xff]  ;;  %v337_v62 = vld [vmem:[%s7792_s15 + $0x1b0] sm:$0xff] }
 0x177   : > { %v6062_v29 = vrot.slane %v6054_v21, %v8222_v10  ;;  %5428 = vmatpush1.bf16.msra.mxu0 %v7169_v13  ;;  %v6069_v31 = vrot.slane %v6055_v26, %v8222_v10  ;;  %5510 = vmatpush1.bf16.msra.mxu1 %v7171_v19  ;;  %v7314_v11 = vcombine.high %v959_v4, %v971_v5  ;;  %v983_v13 = vld [vmem:[%s7792_s15 + $0x15e0] sm:$0xff]  ;;  %v1020_v26 = vld [vmem:[%s7792_s15 + $0x1708] sm:$0xff] }
 0x178   : > { %5429 = vmatprep.subr.bf16.mxu0 %v7194_v20  ;;  %5511 = vmatprep.subr.bf16.mxu1 %v7196_v23  ;;  %v995_v14 = vld [vmem:[%s7792_s15 + $0x1640] sm:$0xff]  ;;  %v7313_v19 = vcombine.low %v959_v4, %v971_v5  ;;  %v7315_v20 = vcombine.low %v960_v6, %v972_v7  ;;  %v7340_v22 = vcombine.high %v984_v15, %v996_v18  ;;  %v361_v7 = vld [vmem:[%s7792_s15 + $0x270] sm:$0xff] }
 0x179   : > { %v6070_v40 = vcombine.low %v6062_v29, %v6069_v31  ;;  %v7338_v21 = vcombine.high %v983_v13, %v995_v14  ;;  %v1007_v23 = vld [vmem:[%s7792_s15 + $0x16a0] sm:$0xff]  ;;  %v7337_v27 = vcombine.low %v983_v13, %v995_v14  ;;  %v7339_v28 = vcombine.low %v984_v15, %v996_v18  ;;  %v385_v18 = vld [vmem:[%s7792_s15 + $0x330] sm:$0xff] }
 0x17a   : > { %v7362_v29 = vcombine.high %v1007_v23, %v1019_v24  ;;  %v1031_v31 = vld [vmem:[%s7792_s15 + $0x1760] sm:$0xff]  ;;  %v7361_v38 = vcombine.low %v1007_v23, %v1019_v24  ;;  %v7363_v39 = vcombine.low %v1008_v25, %v1020_v26 }
 0x17b   : > { %5430 = vmatpush1.bf16.msra.mxu0 %v7193_v30  ;;  %6162 = vst [vmem:[%s8236_s29] sm:$0xff] %v6070_v40  ;;  %5512 = vmatpush1.bf16.msra.mxu1 %v7195_v33  ;;  %v7364_v30 = vcombine.high %v1008_v25, %v1020_v26  ;;  %v1043_v33 = vld [vmem:[%s7792_s15 + $0x17c0] sm:$0xff]  ;;  %v409_v26 = vld [vmem:[%s7792_s15 + $0x3f0] sm:$0xff] }
 0x17c   : > { %5431 = vmatprep.subr.bf16.mxu0 %v7218_v35  ;;  %5513 = vmatprep.subr.bf16.mxu1 %v7220_v36  ;;  %v1032_v35 = vld [vmem:[%s7792_s15 + $0x1768] sm:$0xff]  ;;  %v7386_v40 = vcombine.high %v1031_v31, %v1043_v33 }
 0x17d   : > { %v1044_v36 = vld [vmem:[%s7792_s15 + $0x17c8] sm:$0xff] }
 0x17e   : > { %v7388_v44 = vcombine.high %v1032_v35, %v1044_v36  ;;  %v7387_v51 = vcombine.low %v1032_v35, %v1044_v36  ;;  %v433_v36 = vld [vmem:[%s7792_s15 + $0x4b0] sm:$0xff] }
 0x17f   : > { %5432 = vmatpush1.bf16.msra.mxu0 %v7217_v46  ;;  %5514 = vmatpush1.bf16.msra.mxu1 %v7219_v48  ;;  %v301_v46 = vld [vmem:[%s7792_s15 + $0x90] sm:$0xff]  ;;  %v290_v48 = vld [vmem:[%s7792_s15 + $0x38] sm:$0xff] }
 0x180   : > { %5433 = vmatprep.subr.bf16.mxu0 %v7242_v49  ;;  %5515 = vmatprep.subr.bf16.mxu1 %v7244_v50  ;;  %v302_v49 = vld [vmem:[%s7792_s15 + $0x98] sm:$0xff]  ;;  %v7385_v50 = vcombine.low %v1031_v31, %v1043_v33  ;;  %v6646_v52 = vcombine.high %v289_v45, %v301_v46 }
 0x181   : > { %v6648_v53 = vcombine.high %v290_v48, %v302_v49  ;;  %v6647_v59 = vcombine.low %v290_v48, %v302_v49  ;;  %v457_v49 = vld [vmem:[%s7792_s15 + $0x570] sm:$0xff] }
 0x183   : > { %5434 = vmatpush1.bf16.msra.mxu0 %v7241_v55  ;;  %5516 = vmatpush1.bf16.msra.mxu1 %v7243_v56  ;;  %v325_v55 = vld [vmem:[%s7792_s15 + $0x150] sm:$0xff]  ;;  %v314_v56 = vld [vmem:[%s7792_s15 + $0xf8] sm:$0xff] }
 0x184   : > { %5435 = vmatprep.subr.bf16.mxu0 %v7266_v57  ;;  %5517 = vmatprep.subr.bf16.mxu1 %v7268_v58  ;;  %v326_v57 = vld [vmem:[%s7792_s15 + $0x158] sm:$0xff]  ;;  %v6645_v58 = vcombine.low %v289_v45, %v301_v46  ;;  %v6670_v60 = vcombine.high %v313_v54, %v325_v55 }
 0x185   : > { %v6672_v61 = vcombine.high %v314_v56, %v326_v57  ;;  %v6671_v4 = vcombine.low %v314_v56, %v326_v57  ;;  %v481_v57 = vld [vmem:[%s7792_s15 + $0x630] sm:$0xff] }
 0x187   : > { %5436 = vmatpush1.bf16.msra.mxu0 %v7265_v63  ;;  %5518 = vmatpush1.bf16.msra.mxu1 %v7267_v0  ;;  %v349_v63 = vld [vmem:[%s7792_s15 + $0x210] sm:$0xff]  ;;  %v338_v0 = vld [vmem:[%s7792_s15 + $0x1b8] sm:$0xff] }
 0x188   : > { %5437 = vmatprep.subr.bf16.mxu0 %v7290_v1  ;;  %5519 = vmatprep.subr.bf16.mxu1 %v7292_v3  ;;  %v350_v1 = vld [vmem:[%s7792_s15 + $0x218] sm:$0xff]  ;;  %v6669_v3 = vcombine.low %v313_v54, %v325_v55  ;;  %v6694_v5 = vcombine.high %v337_v62, %v349_v63 }
 0x189   : > { %v6696_v6 = vcombine.high %v338_v0, %v350_v1  ;;  %v6695_v13 = vcombine.low %v338_v0, %v350_v1  ;;  %v505_v1 = vld [vmem:[%s7792_s15 + $0x6f0] sm:$0xff] }
 0x18b   : > { %5438 = vmatpush1.bf16.msra.mxu0 %v7289_v8  ;;  %5520 = vmatpush1.bf16.msra.mxu1 %v7291_v9  ;;  %v373_v8 = vld [vmem:[%s7792_s15 + $0x2d0] sm:$0xff]  ;;  %v362_v9 = vld [vmem:[%s7792_s15 + $0x278] sm:$0xff] }
 0x18c   : > { %5439 = vmatprep.subr.bf16.mxu0 %v7314_v11  ;;  %5521 = vmatprep.subr.bf16.mxu1 %v7316_v12  ;;  %v374_v11 = vld [vmem:[%s7792_s15 + $0x2d8] sm:$0xff]  ;;  %v6693_v12 = vcombine.low %v337_v62, %v349_v63  ;;  %v6718_v14 = vcombine.high %v361_v7, %v373_v8 }
 0x18d   : > { %v6720_v15 = vcombine.high %v362_v9, %v374_v11  ;;  %v6719_v23 = vcombine.low %v362_v9, %v374_v11  ;;  %v529_v11 = vld [vmem:[%s7792_s15 + $0x7b0] sm:$0xff] }
 0x18f   : > { %5440 = vmatpush1.bf16.msra.mxu0 %v7313_v19  ;;  %5522 = vmatpush1.bf16.msra.mxu1 %v7315_v20  ;;  %v397_v19 = vld [vmem:[%s7792_s15 + $0x390] sm:$0xff]  ;;  %v386_v20 = vld [vmem:[%s7792_s15 + $0x338] sm:$0xff] }
 0x190   : > { %5441 = vmatprep.subr.bf16.mxu0 %v7338_v21  ;;  %5523 = vmatprep.subr.bf16.mxu1 %v7340_v22  ;;  %v398_v21 = vld [vmem:[%s7792_s15 + $0x398] sm:$0xff]  ;;  %v6717_v22 = vcombine.low %v361_v7, %v373_v8  ;;  %v6742_v24 = vcombine.high %v385_v18, %v397_v19 }
 0x191   : > { %v6744_v25 = vcombine.high %v386_v20, %v398_v21  ;;  %v6743_v31 = vcombine.low %v386_v20, %v398_v21  ;;  %v553_v21 = vld [vmem:[%s7792_s15 + $0x870] sm:$0xff] }
 0x193   : > { %5442 = vmatpush1.bf16.msra.mxu0 %v7337_v27  ;;  %5524 = vmatpush1.bf16.msra.mxu1 %v7339_v28  ;;  %v421_v27 = vld [vmem:[%s7792_s15 + $0x450] sm:$0xff]  ;;  %v410_v28 = vld [vmem:[%s7792_s15 + $0x3f8] sm:$0xff] }
 0x194   : > { %5443 = vmatprep.subr.bf16.mxu0 %v7362_v29  ;;  %5525 = vmatprep.subr.bf16.mxu1 %v7364_v30  ;;  %v422_v29 = vld [vmem:[%s7792_s15 + $0x458] sm:$0xff]  ;;  %v6741_v30 = vcombine.low %v385_v18, %v397_v19  ;;  %v6766_v33 = vcombine.high %v409_v26, %v421_v27 }
 0x195   : > { %v6768_v35 = vcombine.high %v410_v28, %v422_v29  ;;  %v6767_v45 = vcombine.low %v410_v28, %v422_v29  ;;  %v577_v29 = vld [vmem:[%s7792_s15 + $0x930] sm:$0xff] }
 0x197   : > { %5444 = vmatpush1.bf16.msra.mxu0 %v7361_v38  ;;  %5526 = vmatpush1.bf16.msra.mxu1 %v7363_v39  ;;  %v445_v38 = vld [vmem:[%s7792_s15 + $0x510] sm:$0xff]  ;;  %v434_v39 = vld [vmem:[%s7792_s15 + $0x4b8] sm:$0xff] }
 0x198   : > { %5445 = vmatprep.subr.bf16.mxu0 %v7386_v40  ;;  %5527 = vmatprep.subr.bf16.mxu1 %v7388_v44  ;;  %v446_v40 = vld [vmem:[%s7792_s15 + $0x518] sm:$0xff]  ;;  %v6765_v44 = vcombine.low %v409_v26, %v421_v27  ;;  %v6790_v46 = vcombine.high %v433_v36, %v445_v38 }
 0x199   : > { %v6792_v48 = vcombine.high %v434_v39, %v446_v40  ;;  %v6791_v54 = vcombine.low %v434_v39, %v446_v40  ;;  %v601_v40 = vld [vmem:[%s7792_s15 + $0x9f0] sm:$0xff] }
 0x19b   : > { %5446 = vmatpush1.bf16.msra.mxu0 %v7385_v50  ;;  %5528 = vmatpush1.bf16.msra.mxu1 %v7387_v51  ;;  %v469_v50 = vld [vmem:[%s7792_s15 + $0x5d0] sm:$0xff]  ;;  %v458_v51 = vld [vmem:[%s7792_s15 + $0x578] sm:$0xff] }
 0x19c   : > { %5538 = vmatprep.subr.bf16.mxu0 %v6646_v52  ;;  %5620 = vmatprep.subr.bf16.mxu1 %v6648_v53  ;;  %v470_v52 = vld [vmem:[%s7792_s15 + $0x5d8] sm:$0xff]  ;;  %v6789_v53 = vcombine.low %v433_v36, %v445_v38  ;;  %v6814_v55 = vcombine.high %v457_v49, %v469_v50 }
 0x19d   : > { %v6816_v56 = vcombine.high %v458_v51, %v470_v52  ;;  %v6815_v62 = vcombine.low %v458_v51, %v470_v52  ;;  %v625_v52 = vld [vmem:[%s7792_s15 + $0xab0] sm:$0xff] }
 0x19e   : > { %5448 = vmatmul.mubr.bf16.vlgmr.msra.gmra.mrb[8].mxu0 %v7945_v32  ;;  %5530 = vmatmul.mubr.bf16.vlgmr.msra.gmra.mrb[8].mxu1 %v7945_v32 }
 0x19f   : > { %5539 = vmatpush1.bf16.msra.mxu0 %v6645_v58  ;;  %5621 = vmatpush1.bf16.msra.mxu1 %v6647_v59  ;;  %v493_v58 = vld [vmem:[%s7792_s15 + $0x690] sm:$0xff]  ;;  %v482_v59 = vld [vmem:[%s7792_s15 + $0x638] sm:$0xff] }
 0x1a0   : > { %5540 = vmatprep.subr.bf16.mxu0 %v6670_v60  ;;  %5622 = vmatprep.subr.bf16.mxu1 %v6672_v61  ;;  %v494_v60 = vld [vmem:[%s7792_s15 + $0x698] sm:$0xff]  ;;  %v6813_v61 = vcombine.low %v457_v49, %v469_v50  ;;  %v6838_v63 = vcombine.high %v481_v57, %v493_v58 }
 0x1a1   : > { %5570 = vmatprep.mubr.bf16.mxu0 %v7801_v16  ;;  %5652 = vmatprep.mubr.bf16.mxu1 %v7801_v16  ;;  %v6840_v0 = vcombine.high %v482_v59, %v494_v60  ;;  %v6839_v7 = vcombine.low %v482_v59, %v494_v60  ;;  %v649_v60 = vld [vmem:[%s7792_s15 + $0xb70] sm:$0xff] }
 0x1a3   : > { %5541 = vmatpush1.bf16.msra.mxu0 %v6669_v3  ;;  %5623 = vmatpush1.bf16.msra.mxu1 %v6671_v4  ;;  %v517_v3 = vld [vmem:[%s7792_s15 + $0x750] sm:$0xff]  ;;  %v506_v4 = vld [vmem:[%s7792_s15 + $0x6f8] sm:$0xff] }
 0x1a4   : > { %5542 = vmatprep.subr.bf16.mxu0 %v6694_v5  ;;  %5624 = vmatprep.subr.bf16.mxu1 %v6696_v6  ;;  %v518_v5 = vld [vmem:[%s7792_s15 + $0x758] sm:$0xff]  ;;  %v6837_v6 = vcombine.low %v481_v57, %v493_v58  ;;  %v6862_v8 = vcombine.high %v505_v1, %v517_v3 }
 0x1a5   : > { %v6864_v9 = vcombine.high %v506_v4, %v518_v5  ;;  %v6863_v18 = vcombine.low %v506_v4, %v518_v5  ;;  %v673_v5 = vld [vmem:[%s7792_s15 + $0xc30] sm:$0xff] }
 0x1a7   : > { %5543 = vmatpush1.bf16.msra.mxu0 %v6693_v12  ;;  %5625 = vmatpush1.bf16.msra.mxu1 %v6695_v13  ;;  %v541_v12 = vld [vmem:[%s7792_s15 + $0x810] sm:$0xff]  ;;  %v530_v13 = vld [vmem:[%s7792_s15 + $0x7b8] sm:$0xff] }
 0x1a8   : > { %5544 = vmatprep.subr.bf16.mxu0 %v6718_v14  ;;  %5626 = vmatprep.subr.bf16.mxu1 %v6720_v15  ;;  %v542_v14 = vld [vmem:[%s7792_s15 + $0x818] sm:$0xff]  ;;  %v6861_v15 = vcombine.low %v505_v1, %v517_v3  ;;  %v6886_v19 = vcombine.high %v529_v11, %v541_v12 }
 0x1a9   : > { %v6888_v20 = vcombine.high %v530_v13, %v542_v14  ;;  %v6887_v26 = vcombine.low %v530_v13, %v542_v14  ;;  %v697_v14 = vld [vmem:[%s7792_s15 + $0xcf0] sm:$0xff] }
 0x1ab   : > { %5545 = vmatpush1.bf16.msra.mxu0 %v6717_v22  ;;  %5627 = vmatpush1.bf16.msra.mxu1 %v6719_v23  ;;  %v565_v22 = vld [vmem:[%s7792_s15 + $0x8d0] sm:$0xff]  ;;  %v554_v23 = vld [vmem:[%s7792_s15 + $0x878] sm:$0xff] }
 0x1ac   : > { %5546 = vmatprep.subr.bf16.mxu0 %v6742_v24  ;;  %5628 = vmatprep.subr.bf16.mxu1 %v6744_v25  ;;  %v566_v24 = vld [vmem:[%s7792_s15 + $0x8d8] sm:$0xff]  ;;  %v6885_v25 = vcombine.low %v529_v11, %v541_v12  ;;  %v6910_v27 = vcombine.high %v553_v21, %v565_v22 }
 0x1ad   : > { %v6912_v28 = vcombine.high %v554_v23, %v566_v24  ;;  %v6911_v36 = vcombine.low %v554_v23, %v566_v24  ;;  %v721_v24 = vld [vmem:[%s7792_s15 + $0xdb0] sm:$0xff] }
 0x1af   : > { %5547 = vmatpush1.bf16.msra.mxu0 %v6741_v30  ;;  %5629 = vmatpush1.bf16.msra.mxu1 %v6743_v31  ;;  %v589_v30 = vld [vmem:[%s7792_s15 + $0x990] sm:$0xff]  ;;  %v578_v31 = vld [vmem:[%s7792_s15 + $0x938] sm:$0xff] }
 0x1b0   : > { %5548 = vmatprep.subr.bf16.mxu0 %v6766_v33  ;;  %5630 = vmatprep.subr.bf16.mxu1 %v6768_v35  ;;  %v590_v33 = vld [vmem:[%s7792_s15 + $0x998] sm:$0xff]  ;;  %v6909_v35 = vcombine.low %v553_v21, %v565_v22  ;;  %v6934_v38 = vcombine.high %v577_v29, %v589_v30 }
 0x1b1   : > { %v6936_v39 = vcombine.high %v578_v31, %v590_v33  ;;  %v6935_v49 = vcombine.low %v578_v31, %v590_v33  ;;  %v745_v33 = vld [vmem:[%s7792_s15 + $0xe70] sm:$0xff] }
 0x1b3   : > { %5549 = vmatpush1.bf16.msra.mxu0 %v6765_v44  ;;  %5631 = vmatpush1.bf16.msra.mxu1 %v6767_v45  ;;  %v613_v44 = vld [vmem:[%s7792_s15 + $0xa50] sm:$0xff]  ;;  %v602_v45 = vld [vmem:[%s7792_s15 + $0x9f8] sm:$0xff] }
 0x1b4   : > { %5550 = vmatprep.subr.bf16.mxu0 %v6790_v46  ;;  %5632 = vmatprep.subr.bf16.mxu1 %v6792_v48  ;;  %v614_v46 = vld [vmem:[%s7792_s15 + $0xa58] sm:$0xff]  ;;  %v6933_v48 = vcombine.low %v577_v29, %v589_v30  ;;  %v6958_v50 = vcombine.high %v601_v40, %v613_v44 }
 0x1b5   : > { %v6960_v51 = vcombine.high %v602_v45, %v614_v46  ;;  %v6959_v57 = vcombine.low %v602_v45, %v614_v46  ;;  %v769_v46 = vld [vmem:[%s7792_s15 + $0xf30] sm:$0xff] }
 0x1b7   : > { %5551 = vmatpush1.bf16.msra.mxu0 %v6789_v53  ;;  %5633 = vmatpush1.bf16.msra.mxu1 %v6791_v54  ;;  %v637_v53 = vld [vmem:[%s7792_s15 + $0xb10] sm:$0xff]  ;;  %v626_v54 = vld [vmem:[%s7792_s15 + $0xab8] sm:$0xff] }
 0x1b8   : > { %5552 = vmatprep.subr.bf16.mxu0 %v6814_v55  ;;  %5634 = vmatprep.subr.bf16.mxu1 %v6816_v56  ;;  %v638_v55 = vld [vmem:[%s7792_s15 + $0xb18] sm:$0xff]  ;;  %v6957_v56 = vcombine.low %v601_v40, %v613_v44  ;;  %v6982_v58 = vcombine.high %v625_v52, %v637_v53 }
 0x1b9   : > { %v6984_v59 = vcombine.high %v626_v54, %v638_v55  ;;  %v6983_v1 = vcombine.low %v626_v54, %v638_v55  ;;  %v793_v55 = vld [vmem:[%s7792_s15 + $0xff0] sm:$0xff] }
 0x1bb   : > { %5553 = vmatpush1.bf16.msra.mxu0 %v6813_v61  ;;  %5635 = vmatpush1.bf16.msra.mxu1 %v6815_v62  ;;  %v661_v61 = vld [vmem:[%s7792_s15 + $0xbd0] sm:$0xff]  ;;  %v650_v62 = vld [vmem:[%s7792_s15 + $0xb78] sm:$0xff] }
 0x1bc   : > { %5554 = vmatprep.subr.bf16.mxu0 %v6838_v63  ;;  %5636 = vmatprep.subr.bf16.mxu1 %v6840_v0  ;;  %v662_v63 = vld [vmem:[%s7792_s15 + $0xbd8] sm:$0xff]  ;;  %v6981_v0 = vcombine.low %v625_v52, %v637_v53  ;;  %v7006_v3 = vcombine.high %v649_v60, %v661_v61 }
 0x1bd   : > { %v7008_v4 = vcombine.high %v650_v62, %v662_v63  ;;  %v7007_v11 = vcombine.low %v650_v62, %v662_v63  ;;  %v8366_v62 = vsub.s32 5, %v7786_v2 }
 0x1bf   : > { %5555 = vmatpush1.bf16.msra.mxu0 %v6837_v6  ;;  %5637 = vmatpush1.bf16.msra.mxu1 %v6839_v7  ;;  %v685_v6 = vld [vmem:[%s7792_s15 + $0xc90] sm:$0xff]  ;;  %v674_v7 = vld [vmem:[%s7792_s15 + $0xc38] sm:$0xff] }
 0x1c0   : > { %5556 = vmatprep.subr.bf16.mxu0 %v6862_v8  ;;  %5638 = vmatprep.subr.bf16.mxu1 %v6864_v9  ;;  %v686_v8 = vld [vmem:[%s7792_s15 + $0xc98] sm:$0xff]  ;;  %v7005_v9 = vcombine.low %v649_v60, %v661_v61  ;;  %v7030_v12 = vcombine.high %v673_v5, %v685_v6  ;;  %v8363_v61 = vsub.s32 6, %v7786_v2 }
 0x1c1   : > { %v7032_v13 = vcombine.high %v674_v7, %v686_v8  ;;  %v7031_v21 = vcombine.low %v674_v7, %v686_v8  ;;  %v818_v7 = vld [vmem:[%s7792_s15 + $0x10b8] sm:$0xff] }
 0x1c2   : > { %v830_v8 = vld [vmem:[%s7792_s15 + $0x1118] sm:$0xff] }
 0x1c3   : > { %5557 = vmatpush1.bf16.msra.mxu0 %v6861_v15  ;;  %5639 = vmatpush1.bf16.msra.mxu1 %v6863_v18  ;;  %v709_v15 = vld [vmem:[%s7792_s15 + $0xd50] sm:$0xff]  ;;  %v698_v18 = vld [vmem:[%s7792_s15 + $0xcf8] sm:$0xff] }
 0x1c4   : > { %5558 = vmatprep.subr.bf16.mxu0 %v6886_v19  ;;  %5640 = vmatprep.subr.bf16.mxu1 %v6888_v20  ;;  %v710_v19 = vld [vmem:[%s7792_s15 + $0xd58] sm:$0xff]  ;;  %v7029_v20 = vcombine.low %v673_v5, %v685_v6  ;;  %v7054_v22 = vcombine.high %v697_v14, %v709_v15  ;;  %v829_v5 = vld [vmem:[%s7792_s15 + $0x1110] sm:$0xff] }
 0x1c5   : > { %v7056_v23 = vcombine.high %v698_v18, %v710_v19  ;;  %v7055_v29 = vcombine.low %v698_v18, %v710_v19  ;;  %v7176_v18 = vcombine.high %v818_v7, %v830_v8  ;;  %v841_v19 = vld [vmem:[%s7792_s15 + $0x1170] sm:$0xff] }
 0x1c7   : > { %5559 = vmatpush1.bf16.msra.mxu0 %v6885_v25  ;;  %5641 = vmatpush1.bf16.msra.mxu1 %v6887_v26  ;;  %v733_v25 = vld [vmem:[%s7792_s15 + $0xe10] sm:$0xff]  ;;  %v722_v26 = vld [vmem:[%s7792_s15 + $0xdb8] sm:$0xff] }
 0x1c8   : > { %5560 = vmatprep.subr.bf16.mxu0 %v6910_v27  ;;  %5642 = vmatprep.subr.bf16.mxu1 %v6912_v28  ;;  %v734_v27 = vld [vmem:[%s7792_s15 + $0xe18] sm:$0xff]  ;;  %v7053_v28 = vcombine.low %v697_v14, %v709_v15  ;;  %v7078_v30 = vcombine.high %v721_v24, %v733_v25 }
 0x1c9   : > { %v7080_v31 = vcombine.high %v722_v26, %v734_v27  ;;  %v7079_v40 = vcombine.low %v722_v26, %v734_v27 }
 0x1cb   : > { %5561 = vmatpush1.bf16.msra.mxu0 %v6909_v35  ;;  %5643 = vmatpush1.bf16.msra.mxu1 %v6911_v36  ;;  %v757_v35 = vld [vmem:[%s7792_s15 + $0xed0] sm:$0xff]  ;;  %v746_v36 = vld [vmem:[%s7792_s15 + $0xe78] sm:$0xff] }
 0x1cc   : > { %5562 = vmatprep.subr.bf16.mxu0 %v6934_v38  ;;  %5644 = vmatprep.subr.bf16.mxu1 %v6936_v39  ;;  %v758_v38 = vld [vmem:[%s7792_s15 + $0xed8] sm:$0xff]  ;;  %v7077_v39 = vcombine.low %v721_v24, %v733_v25  ;;  %v7102_v44 = vcombine.high %v745_v33, %v757_v35 }
 0x1cd   : > { %v7104_v45 = vcombine.high %v746_v36, %v758_v38  ;;  %v7103_v52 = vcombine.low %v746_v36, %v758_v38  ;;  %v842_v24 = vld [vmem:[%s7792_s15 + $0x1178] sm:$0xff] }
 0x1ce   : > { %v854_v25 = vld [vmem:[%s7792_s15 + $0x11d8] sm:$0xff] }
 0x1cf   : > { %5563 = vmatpush1.bf16.msra.mxu0 %v6933_v48  ;;  %5645 = vmatpush1.bf16.msra.mxu1 %v6935_v49  ;;  %v781_v48 = vld [vmem:[%s7792_s15 + $0xf90] sm:$0xff]  ;;  %v770_v49 = vld [vmem:[%s7792_s15 + $0xf38] sm:$0xff] }
 0x1d0   : > { %5564 = vmatprep.subr.bf16.mxu0 %v6958_v50  ;;  %5646 = vmatprep.subr.bf16.mxu1 %v6960_v51  ;;  %v782_v50 = vld [vmem:[%s7792_s15 + $0xf98] sm:$0xff]  ;;  %v7101_v51 = vcombine.low %v745_v33, %v757_v35  ;;  %v7126_v53 = vcombine.high %v769_v46, %v781_v48  ;;  %v7125_v60 = vcombine.low %v769_v46, %v781_v48 }
 0x1d1   : > { %v7128_v54 = vcombine.high %v770_v49, %v782_v50  ;;  %v7127_v63 = vcombine.low %v770_v49, %v782_v50  ;;  %v7175_v35 = vcombine.low %v818_v7, %v830_v8  ;;  %v866_v48 = vld [vmem:[%s7792_s15 + $0x1238] sm:$0xff]  ;;  %v925_v7 = vld [vmem:[%s7792_s15 + $0x1410] sm:$0xff] }
 0x1d2   : > { %v878_v49 = vld [vmem:[%s7792_s15 + $0x1298] sm:$0xff] }
 0x1d3   : > { %5565 = vmatpush1.bf16.msra.mxu0 %v6957_v56  ;;  %5647 = vmatpush1.bf16.msra.mxu1 %v6959_v57  ;;  %v805_v56 = vld [vmem:[%s7792_s15 + $0x1050] sm:$0xff]  ;;  %v8358_v57 = vsub.s32 4, %v7786_v2  ;;  %v914_v8 = vld [vmem:[%s7792_s15 + $0x13b8] sm:$0xff] }
 0x1d4   : > { %5566 = vmatprep.subr.bf16.mxu0 %v6982_v58  ;;  %5648 = vmatprep.subr.bf16.mxu1 %v6984_v59  ;;  %v794_v58 = vld [vmem:[%s7792_s15 + $0xff8] sm:$0xff] }
 0x1d5   : > { %v806_v59 = vld [vmem:[%s7792_s15 + $0x1058] sm:$0xff]  ;;  %v1076_v6 = vrot.slane %v8193_v41, %v8358_v57 }
 0x1d7   : > { %5567 = vmatpush1.bf16.msra.mxu0 %v6981_v0  ;;  %5649 = vmatpush1.bf16.msra.mxu1 %v6983_v1  ;;  %v8369_v0 = vsub.s32 7, %v7786_v2  ;;  %v7150_v1 = vcombine.high %v793_v55, %v805_v56  ;;  %v1080_v2 = vrot.slane %v8193_v41, %v8366_v62 }
 0x1d8   : > { %5568 = vmatprep.subr.bf16.mxu0 %v7006_v3  ;;  %5650 = vmatprep.subr.bf16.mxu1 %v7008_v4  ;;  %v7152_v3 = vcombine.high %v794_v58, %v806_v59  ;;  %v817_v4 = vld [vmem:[%s7792_s15 + $0x10b0] sm:$0xff] }
 0x1d9   : > { %v7174_v14 = vcombine.high %v817_v4, %v829_v5 }
 0x1db   : > { %5569 = vmatpush1.bf16.msra.mxu0 %v7005_v9  ;;  %5651 = vmatpush1.bf16.msra.mxu1 %v7007_v11  ;;  %v1084_v9 = vrot.slane %v8193_v41, %v8363_v61  ;;  %v7149_v11 = vcombine.low %v793_v55, %v805_v56  ;;  %v7224_v55 = vcombine.high %v866_v48, %v878_v49  ;;  %v889_v56 = vld [vmem:[%s7792_s15 + $0x12f0] sm:$0xff] }
 0x1dc   : > { %5579 = vmatprep.subr.bf16.mxu0 %v7030_v12  ;;  %5661 = vmatprep.subr.bf16.mxu1 %v7032_v13  ;;  %v1088_v12 = vrot.slane %v8193_v41, %v8369_v0  ;;  %v7151_v13 = vcombine.low %v794_v58, %v806_v59  ;;  %v7173_v41 = vcombine.low %v817_v4, %v829_v5  ;;  %v901_v58 = vld [vmem:[%s7792_s15 + $0x1350] sm:$0xff] }
 0x1dd   : > { %v7246_v4 = vcombine.high %v889_v56, %v901_v58 }
 0x1de   : > { %5571 = vmatmul.mubr.bf16.vlgmr.msra.gmra.mrb[12].mxu0 %v7803_v17  ;;  %5653 = vmatmul.mubr.bf16.vlgmr.msra.gmra.mrb[12].mxu1 %v7803_v17 }
 0x1df   : > { %5580 = vmatpush1.bf16.msra.mxu0 %v7029_v20  ;;  %5662 = vmatpush1.bf16.msra.mxu1 %v7031_v21  ;;  %v853_v20 = vld [vmem:[%s7792_s15 + $0x11d0] sm:$0xff] }
 0x1e0   : > { %5581 = vmatprep.subr.bf16.mxu0 %v7054_v22  ;;  %5663 = vmatprep.subr.bf16.mxu1 %v7056_v23  ;;  %v7198_v36 = vcombine.high %v841_v19, %v853_v20 }
 0x1e1   : > { %5611 = vmatprep.mubr.bf16.mxu0 %v7879_v34  ;;  %5693 = vmatprep.mubr.bf16.mxu1 %v7879_v34 }
 0x1e3   : > { %5582 = vmatpush1.bf16.msra.mxu0 %v7053_v28  ;;  %5664 = vmatpush1.bf16.msra.mxu1 %v7055_v29 }
 0x1e4   : > { %5583 = vmatprep.subr.bf16.mxu0 %v7078_v30  ;;  %5665 = vmatprep.subr.bf16.mxu1 %v7080_v31 }
 0x1e7   : > { %5584 = vmatpush1.bf16.msra.mxu0 %v7077_v39  ;;  %5666 = vmatpush1.bf16.msra.mxu1 %v7079_v40  ;;  %v7200_v40 = vcombine.high %v842_v24, %v854_v25 }
 0x1e8   : > { %5585 = vmatprep.subr.bf16.mxu0 %v7102_v44  ;;  %5667 = vmatprep.subr.bf16.mxu1 %v7104_v45  ;;  %v865_v44 = vld [vmem:[%s7792_s15 + $0x1230] sm:$0xff] }
 0x1e9   : > { %v877_v45 = vld [vmem:[%s7792_s15 + $0x1290] sm:$0xff] }
 0x1eb   : > { %5586 = vmatpush1.bf16.msra.mxu0 %v7101_v51  ;;  %5668 = vmatpush1.bf16.msra.mxu1 %v7103_v52  ;;  %v7197_v51 = vcombine.low %v841_v19, %v853_v20  ;;  %v950_v19 = vld [vmem:[%s7792_s15 + $0x14d8] sm:$0xff] }
 0x1ec   : > { %5587 = vmatprep.subr.bf16.mxu0 %v7126_v53  ;;  %5669 = vmatprep.subr.bf16.mxu1 %v7128_v54  ;;  %v7199_v53 = vcombine.low %v842_v24, %v854_v25  ;;  %v7222_v54 = vcombine.high %v865_v44, %v877_v45  ;;  %v961_v24 = vld [vmem:[%s7792_s15 + $0x1530] sm:$0xff] }
 0x1ed   : > { %v973_v25 = vld [vmem:[%s7792_s15 + $0x1590] sm:$0xff] }
 0x1ef   : > { %5588 = vmatpush1.bf16.msra.mxu0 %v7125_v60  ;;  %5670 = vmatpush1.bf16.msra.mxu1 %v7127_v63  ;;  %v890_v60 = vld [vmem:[%s7792_s15 + $0x12f8] sm:$0xff] }
 0x1f0   : > { %5589 = vmatprep.subr.bf16.mxu0 %v7150_v1  ;;  %5671 = vmatprep.subr.bf16.mxu1 %v7152_v3  ;;  %v902_v63 = vld [vmem:[%s7792_s15 + $0x1358] sm:$0xff]  ;;  %v7221_v1 = vcombine.low %v865_v44, %v877_v45  ;;  %v7223_v3 = vcombine.low %v866_v48, %v878_v49  ;;  %v1009_v45 = vld [vmem:[%s7792_s15 + $0x16b0] sm:$0xff] }
 0x1f1   : > { %v5285_v15 = vpop.f32.mrb[4].mxu0  ;;  %v5367_v22 = vpop.f32.mrb[4].mxu1  ;;  %v7248_v5 = vcombine.high %v890_v60, %v902_v63  ;;  %v1010_v48 = vld [vmem:[%s7792_s15 + $0x16b8] sm:$0xff] }
 0x1f2   : > { %v7486_v21 = vadd.f32 %v5285_v15, %v1076_v6  ;;  %v5287_v23 = vpop.f32.mrb[5].mxu0  ;;  %v7488_v26 = vadd.f32 %v5367_v22, %v1084_v9  ;;  %v5369_v28 = vpop.f32.mrb[5].mxu1  ;;  %v913_v6 = vld [vmem:[%s7792_s15 + $0x13b0] sm:$0xff]  ;;  %v926_v9 = vld [vmem:[%s7792_s15 + $0x1418] sm:$0xff] }
 0x1f3   : > { %v7487_v27 = vadd.f32 %v5287_v23, %v1080_v2  ;;  %v5289_v29 = vpop.f32.mrb[6].mxu0  ;;  %5590 = vmatpush1.bf16.msra.mxu0 %v7149_v11  ;;  %v7489_v30 = vadd.f32 %v5369_v28, %v1088_v12  ;;  %v5371_v31 = vpop.f32.mrb[6].mxu1  ;;  %5672 = vmatpush1.bf16.msra.mxu1 %v7151_v13  ;;  %v7245_v2 = vcombine.low %v889_v56, %v901_v58  ;;  %v949_v15 = vld [vmem:[%s7792_s15 + $0x14d0] sm:$0xff]  ;;  %v1022_v49 = vld [vmem:[%s7792_s15 + $0x1718] sm:$0xff] }
 0x1f4   : > { %v5290_v33 = vpop.f32.mrb[7].mxu0  ;;  %5591 = vmatprep.subr.bf16.mxu0 %v7174_v14  ;;  %v5372_v39 = vpop.f32.mrb[7].mxu1  ;;  %5673 = vmatprep.subr.bf16.mxu1 %v7176_v18  ;;  %v7247_v11 = vcombine.low %v890_v60, %v902_v63  ;;  %v7270_v12 = vcombine.high %v913_v6, %v925_v7  ;;  %v7272_v13 = vcombine.high %v914_v8, %v926_v9  ;;  %v937_v14 = vld [vmem:[%s7792_s15 + $0x1470] sm:$0xff]  ;;  %v938_v18 = vld [vmem:[%s7792_s15 + $0x1478] sm:$0xff] }
 0x1f5   : > { %v6071_v38 = vcombine.low %v7486_v21, %v7487_v27  ;;  %v6072_v46 = vcombine.low %v7488_v26, %v7489_v30  ;;  %v7269_v20 = vcombine.low %v913_v6, %v925_v7  ;;  %v7271_v21 = vcombine.low %v914_v8, %v926_v9  ;;  %v962_v26 = vld [vmem:[%s7792_s15 + $0x1538] sm:$0xff]  ;;  %v985_v31 = vld [vmem:[%s7792_s15 + $0x15f0] sm:$0xff]  ;;  %v304_v6 = vld [vmem:[%s7792_s15 + $0xa8] sm:$0xff] }
 0x1f6   : > { %v7294_v22 = vcombine.high %v937_v14, %v949_v15  ;;  %v7296_v23 = vcombine.high %v938_v18, %v950_v19  ;;  %v974_v27 = vld [vmem:[%s7792_s15 + $0x1598] sm:$0xff]  ;;  %v7293_v28 = vcombine.low %v937_v14, %v949_v15  ;;  %v7295_v29 = vcombine.low %v938_v18, %v950_v19  ;;  %v997_v33 = vld [vmem:[%s7792_s15 + $0x1650] sm:$0xff]  ;;  %v328_v14 = vld [vmem:[%s7792_s15 + $0x168] sm:$0xff] }
 0x1f7   : > { %v6079_v50 = vrot.slane %v6071_v38, %v8222_v10  ;;  %5592 = vmatpush1.bf16.msra.mxu0 %v7173_v41  ;;  %v6086_v52 = vrot.slane %v6072_v46, %v8222_v10  ;;  %5674 = vmatpush1.bf16.msra.mxu1 %v7175_v35  ;;  %v7318_v41 = vcombine.high %v961_v24, %v973_v25  ;;  %v986_v35 = vld [vmem:[%s7792_s15 + $0x15f8] sm:$0xff]  ;;  %v1021_v46 = vld [vmem:[%s7792_s15 + $0x1710] sm:$0xff] }
 0x1f8   : > { %5593 = vmatprep.subr.bf16.mxu0 %v7198_v36  ;;  %5675 = vmatprep.subr.bf16.mxu1 %v7200_v40  ;;  %v7320_v30 = vcombine.high %v962_v26, %v974_v27  ;;  %v998_v36 = vld [vmem:[%s7792_s15 + $0x1658] sm:$0xff]  ;;  %v7317_v38 = vcombine.low %v961_v24, %v973_v25  ;;  %v7319_v39 = vcombine.low %v962_v26, %v974_v27  ;;  %v352_v24 = vld [vmem:[%s7792_s15 + $0x228] sm:$0xff] }
 0x1f9   : > { %v6087_v59 = vcombine.low %v6079_v50, %v6086_v52  ;;  %v7342_v40 = vcombine.high %v985_v31, %v997_v33  ;;  %v7344_v44 = vcombine.high %v986_v35, %v998_v36  ;;  %v7341_v50 = vcombine.low %v985_v31, %v997_v33  ;;  %v1034_v56 = vld [vmem:[%s7792_s15 + $0x1778] sm:$0xff]  ;;  %v376_v31 = vld [vmem:[%s7792_s15 + $0x2e8] sm:$0xff] }
 0x1fa   : > { %v7366_v52 = vcombine.high %v1009_v45, %v1021_v46  ;;  %v1046_v58 = vld [vmem:[%s7792_s15 + $0x17d8] sm:$0xff]  ;;  %v7367_v60 = vcombine.low %v1010_v48, %v1022_v49 }
 0x1fb   : > { %5594 = vmatpush1.bf16.msra.mxu0 %v7197_v51  ;;  %6163 = vst [vmem:[%s8236_s29 + $0x8] sm:$0xff] %v6087_v59  ;;  %5676 = vmatpush1.bf16.msra.mxu1 %v7199_v53  ;;  %v7343_v51 = vcombine.low %v986_v35, %v998_v36  ;;  %v7368_v53 = vcombine.high %v1010_v48, %v1022_v49 }
 0x1fc   : > { %5595 = vmatprep.subr.bf16.mxu0 %v7222_v54  ;;  %5677 = vmatprep.subr.bf16.mxu1 %v7224_v55  ;;  %v1033_v54 = vld [vmem:[%s7792_s15 + $0x1770] sm:$0xff]  ;;  %v7365_v59 = vcombine.low %v1009_v45, %v1021_v46  ;;  %v7391_v8 = vcombine.low %v1034_v56, %v1046_v58  ;;  %v400_v45 = vld [vmem:[%s7792_s15 + $0x3a8] sm:$0xff] }
 0x1fd   : > { %v1045_v55 = vld [vmem:[%s7792_s15 + $0x17d0] sm:$0xff] }
 0x1fe   : > { %v7390_v63 = vcombine.high %v1033_v54, %v1045_v55  ;;  %v7389_v7 = vcombine.low %v1033_v54, %v1045_v55  ;;  %v424_v54 = vld [vmem:[%s7792_s15 + $0x468] sm:$0xff] }
 0x1ff   : > { %5596 = vmatpush1.bf16.msra.mxu0 %v7221_v1  ;;  %5678 = vmatpush1.bf16.msra.mxu1 %v7223_v3  ;;  %v7392_v1 = vcombine.high %v1034_v56, %v1046_v58  ;;  %v291_v3 = vld [vmem:[%s7792_s15 + $0x40] sm:$0xff] }
 0x200   : > { %5597 = vmatprep.subr.bf16.mxu0 %v7246_v4  ;;  %5679 = vmatprep.subr.bf16.mxu1 %v7248_v5  ;;  %v303_v4 = vld [vmem:[%s7792_s15 + $0xa0] sm:$0xff]  ;;  %v292_v5 = vld [vmem:[%s7792_s15 + $0x48] sm:$0xff] }
 0x201   : > { %v6650_v9 = vcombine.high %v291_v3, %v303_v4  ;;  %v6649_v15 = vcombine.low %v291_v3, %v303_v4  ;;  %v6651_v18 = vcombine.low %v292_v5, %v304_v6  ;;  %v448_v3 = vld [vmem:[%s7792_s15 + $0x528] sm:$0xff] }
 0x203   : > { %5598 = vmatpush1.bf16.msra.mxu0 %v7245_v2  ;;  %5680 = vmatpush1.bf16.msra.mxu1 %v7247_v11  ;;  %v6652_v2 = vcombine.high %v292_v5, %v304_v6  ;;  %v315_v11 = vld [vmem:[%s7792_s15 + $0x100] sm:$0xff] }
 0x204   : > { %5599 = vmatprep.subr.bf16.mxu0 %v7270_v12  ;;  %5681 = vmatprep.subr.bf16.mxu1 %v7272_v13  ;;  %v327_v12 = vld [vmem:[%s7792_s15 + $0x160] sm:$0xff]  ;;  %v316_v13 = vld [vmem:[%s7792_s15 + $0x108] sm:$0xff] }
 0x205   : > { %v6674_v19 = vcombine.high %v315_v11, %v327_v12  ;;  %v6673_v25 = vcombine.low %v315_v11, %v327_v12  ;;  %v6675_v26 = vcombine.low %v316_v13, %v328_v14  ;;  %v472_v11 = vld [vmem:[%s7792_s15 + $0x5e8] sm:$0xff] }
 0x207   : > { %5600 = vmatpush1.bf16.msra.mxu0 %v7269_v20  ;;  %5682 = vmatpush1.bf16.msra.mxu1 %v7271_v21  ;;  %v6676_v20 = vcombine.high %v316_v13, %v328_v14  ;;  %v339_v21 = vld [vmem:[%s7792_s15 + $0x1c0] sm:$0xff] }
 0x208   : > { %5601 = vmatprep.subr.bf16.mxu0 %v7294_v22  ;;  %5683 = vmatprep.subr.bf16.mxu1 %v7296_v23  ;;  %v351_v22 = vld [vmem:[%s7792_s15 + $0x220] sm:$0xff]  ;;  %v340_v23 = vld [vmem:[%s7792_s15 + $0x1c8] sm:$0xff] }
 0x209   : > { %v6698_v27 = vcombine.high %v339_v21, %v351_v22  ;;  %v6697_v33 = vcombine.low %v339_v21, %v351_v22  ;;  %v6699_v35 = vcombine.low %v340_v23, %v352_v24  ;;  %v496_v21 = vld [vmem:[%s7792_s15 + $0x6a8] sm:$0xff] }
 0x20b   : > { %5602 = vmatpush1.bf16.msra.mxu0 %v7293_v28  ;;  %5684 = vmatpush1.bf16.msra.mxu1 %v7295_v29  ;;  %v6700_v28 = vcombine.high %v340_v23, %v352_v24  ;;  %v363_v29 = vld [vmem:[%s7792_s15 + $0x280] sm:$0xff] }
 0x20c   : > { %5603 = vmatprep.subr.bf16.mxu0 %v7318_v41  ;;  %5685 = vmatprep.subr.bf16.mxu1 %v7320_v30  ;;  %v375_v41 = vld [vmem:[%s7792_s15 + $0x2e0] sm:$0xff]  ;;  %v364_v30 = vld [vmem:[%s7792_s15 + $0x288] sm:$0xff] }
 0x20d   : > { %v6722_v36 = vcombine.high %v363_v29, %v375_v41  ;;  %v6721_v46 = vcombine.low %v363_v29, %v375_v41  ;;  %v6723_v48 = vcombine.low %v364_v30, %v376_v31  ;;  %v520_v29 = vld [vmem:[%s7792_s15 + $0x768] sm:$0xff] }
 0x20f   : > { %5604 = vmatpush1.bf16.msra.mxu0 %v7317_v38  ;;  %5686 = vmatpush1.bf16.msra.mxu1 %v7319_v39  ;;  %v6724_v38 = vcombine.high %v364_v30, %v376_v31  ;;  %v387_v39 = vld [vmem:[%s7792_s15 + $0x340] sm:$0xff] }
 0x210   : > { %5605 = vmatprep.subr.bf16.mxu0 %v7342_v40  ;;  %5687 = vmatprep.subr.bf16.mxu1 %v7344_v44  ;;  %v399_v40 = vld [vmem:[%s7792_s15 + $0x3a0] sm:$0xff]  ;;  %v388_v44 = vld [vmem:[%s7792_s15 + $0x348] sm:$0xff] }
 0x211   : > { %v6746_v49 = vcombine.high %v387_v39, %v399_v40  ;;  %v6745_v55 = vcombine.low %v387_v39, %v399_v40  ;;  %v6747_v56 = vcombine.low %v388_v44, %v400_v45  ;;  %v544_v39 = vld [vmem:[%s7792_s15 + $0x828] sm:$0xff] }
 0x213   : > { %5606 = vmatpush1.bf16.msra.mxu0 %v7341_v50  ;;  %5688 = vmatpush1.bf16.msra.mxu1 %v7343_v51  ;;  %v6748_v50 = vcombine.high %v388_v44, %v400_v45  ;;  %v411_v51 = vld [vmem:[%s7792_s15 + $0x400] sm:$0xff] }
 0x214   : > { %5607 = vmatprep.subr.bf16.mxu0 %v7366_v52  ;;  %5689 = vmatprep.subr.bf16.mxu1 %v7368_v53  ;;  %v423_v52 = vld [vmem:[%s7792_s15 + $0x460] sm:$0xff]  ;;  %v412_v53 = vld [vmem:[%s7792_s15 + $0x408] sm:$0xff] }
 0x215   : > { %v6770_v58 = vcombine.high %v411_v51, %v423_v52  ;;  %v6769_v4 = vcombine.low %v411_v51, %v423_v52  ;;  %v6771_v5 = vcombine.low %v412_v53, %v424_v54  ;;  %v568_v51 = vld [vmem:[%s7792_s15 + $0x8e8] sm:$0xff] }
 0x217   : > { %5608 = vmatpush1.bf16.msra.mxu0 %v7365_v59  ;;  %5690 = vmatpush1.bf16.msra.mxu1 %v7367_v60  ;;  %v6772_v59 = vcombine.high %v412_v53, %v424_v54  ;;  %v435_v60 = vld [vmem:[%s7792_s15 + $0x4c0] sm:$0xff] }
 0x218   : > { %5609 = vmatprep.subr.bf16.mxu0 %v7390_v63  ;;  %5691 = vmatprep.subr.bf16.mxu1 %v7392_v1  ;;  %v447_v63 = vld [vmem:[%s7792_s15 + $0x520] sm:$0xff]  ;;  %v436_v1 = vld [vmem:[%s7792_s15 + $0x4c8] sm:$0xff] }
 0x219   : > { %v6794_v6 = vcombine.high %v435_v60, %v447_v63  ;;  %v6793_v12 = vcombine.low %v435_v60, %v447_v63  ;;  %v6795_v13 = vcombine.low %v436_v1, %v448_v3  ;;  %v592_v60 = vld [vmem:[%s7792_s15 + $0x9a8] sm:$0xff] }
 0x21b   : > { %5610 = vmatpush1.bf16.msra.mxu0 %v7389_v7  ;;  %5692 = vmatpush1.bf16.msra.mxu1 %v7391_v8  ;;  %v6796_v7 = vcombine.high %v436_v1, %v448_v3  ;;  %v459_v8 = vld [vmem:[%s7792_s15 + $0x580] sm:$0xff] }
 0x21c   : > { %5702 = vmatprep.subr.bf16.mxu0 %v6650_v9  ;;  %5784 = vmatprep.subr.bf16.mxu1 %v6652_v2  ;;  %v471_v9 = vld [vmem:[%s7792_s15 + $0x5e0] sm:$0xff]  ;;  %v460_v2 = vld [vmem:[%s7792_s15 + $0x588] sm:$0xff] }
 0x21d   : > { %v6818_v14 = vcombine.high %v459_v8, %v471_v9  ;;  %v6817_v22 = vcombine.low %v459_v8, %v471_v9  ;;  %v6819_v23 = vcombine.low %v460_v2, %v472_v11  ;;  %v616_v8 = vld [vmem:[%s7792_s15 + $0xa68] sm:$0xff] }
 0x21e   : > { %5612 = vmatmul.mubr.bf16.vlgmr.msra.gmra.mrb[12].mxu0 %v7945_v32  ;;  %5694 = vmatmul.mubr.bf16.vlgmr.msra.gmra.mrb[12].mxu1 %v7945_v32 }
 0x21f   : > { %5703 = vmatpush1.bf16.msra.mxu0 %v6649_v15  ;;  %5785 = vmatpush1.bf16.msra.mxu1 %v6651_v18  ;;  %v6820_v15 = vcombine.high %v460_v2, %v472_v11  ;;  %v483_v18 = vld [vmem:[%s7792_s15 + $0x640] sm:$0xff] }
 0x220   : > { %5704 = vmatprep.subr.bf16.mxu0 %v6674_v19  ;;  %5786 = vmatprep.subr.bf16.mxu1 %v6676_v20  ;;  %v495_v19 = vld [vmem:[%s7792_s15 + $0x6a0] sm:$0xff]  ;;  %v484_v20 = vld [vmem:[%s7792_s15 + $0x648] sm:$0xff] }
 0x221   : > { %5734 = vmatprep.mubr.bf16.mxu0 %v7801_v16  ;;  %5816 = vmatprep.mubr.bf16.mxu1 %v7801_v16  ;;  %v6842_v24 = vcombine.high %v483_v18, %v495_v19  ;;  %v6841_v41 = vcombine.low %v483_v18, %v495_v19  ;;  %v6843_v30 = vcombine.low %v484_v20, %v496_v21  ;;  %v640_v18 = vld [vmem:[%s7792_s15 + $0xb28] sm:$0xff] }
 0x223   : > { %5705 = vmatpush1.bf16.msra.mxu0 %v6673_v25  ;;  %5787 = vmatpush1.bf16.msra.mxu1 %v6675_v26  ;;  %v6844_v25 = vcombine.high %v484_v20, %v496_v21  ;;  %v507_v26 = vld [vmem:[%s7792_s15 + $0x700] sm:$0xff] }
 0x224   : > { %5706 = vmatprep.subr.bf16.mxu0 %v6698_v27  ;;  %5788 = vmatprep.subr.bf16.mxu1 %v6700_v28  ;;  %v519_v27 = vld [vmem:[%s7792_s15 + $0x760] sm:$0xff]  ;;  %v508_v28 = vld [vmem:[%s7792_s15 + $0x708] sm:$0xff] }
 0x225   : > { %v6866_v31 = vcombine.high %v507_v26, %v519_v27  ;;  %v6865_v40 = vcombine.low %v507_v26, %v519_v27  ;;  %v6867_v44 = vcombine.low %v508_v28, %v520_v29  ;;  %v664_v26 = vld [vmem:[%s7792_s15 + $0xbe8] sm:$0xff] }
 0x227   : > { %5707 = vmatpush1.bf16.msra.mxu0 %v6697_v33  ;;  %5789 = vmatpush1.bf16.msra.mxu1 %v6699_v35  ;;  %v6868_v33 = vcombine.high %v508_v28, %v520_v29  ;;  %v531_v35 = vld [vmem:[%s7792_s15 + $0x7c0] sm:$0xff] }
 0x228   : > { %5708 = vmatprep.subr.bf16.mxu0 %v6722_v36  ;;  %5790 = vmatprep.subr.bf16.mxu1 %v6724_v38  ;;  %v543_v36 = vld [vmem:[%s7792_s15 + $0x820] sm:$0xff]  ;;  %v532_v38 = vld [vmem:[%s7792_s15 + $0x7c8] sm:$0xff] }
 0x229   : > { %v6890_v45 = vcombine.high %v531_v35, %v543_v36  ;;  %v6889_v52 = vcombine.low %v531_v35, %v543_v36  ;;  %v6891_v53 = vcombine.low %v532_v38, %v544_v39  ;;  %v688_v35 = vld [vmem:[%s7792_s15 + $0xca8] sm:$0xff] }
 0x22b   : > { %5709 = vmatpush1.bf16.msra.mxu0 %v6721_v46  ;;  %5791 = vmatpush1.bf16.msra.mxu1 %v6723_v48  ;;  %v6892_v46 = vcombine.high %v532_v38, %v544_v39  ;;  %v555_v48 = vld [vmem:[%s7792_s15 + $0x880] sm:$0xff] }
 0x22c   : > { %5710 = vmatprep.subr.bf16.mxu0 %v6746_v49  ;;  %5792 = vmatprep.subr.bf16.mxu1 %v6748_v50  ;;  %v567_v49 = vld [vmem:[%s7792_s15 + $0x8e0] sm:$0xff]  ;;  %v556_v50 = vld [vmem:[%s7792_s15 + $0x888] sm:$0xff] }
 0x22d   : > { %v6914_v54 = vcombine.high %v555_v48, %v567_v49  ;;  %v6913_v63 = vcombine.low %v555_v48, %v567_v49  ;;  %v6915_v1 = vcombine.low %v556_v50, %v568_v51  ;;  %v712_v48 = vld [vmem:[%s7792_s15 + $0xd68] sm:$0xff] }
 0x22f   : > { %5711 = vmatpush1.bf16.msra.mxu0 %v6745_v55  ;;  %5793 = vmatpush1.bf16.msra.mxu1 %v6747_v56  ;;  %v6916_v55 = vcombine.high %v556_v50, %v568_v51  ;;  %v579_v56 = vld [vmem:[%s7792_s15 + $0x940] sm:$0xff] }
 0x230   : > { %5712 = vmatprep.subr.bf16.mxu0 %v6770_v58  ;;  %5794 = vmatprep.subr.bf16.mxu1 %v6772_v59  ;;  %v591_v58 = vld [vmem:[%s7792_s15 + $0x9a0] sm:$0xff]  ;;  %v580_v59 = vld [vmem:[%s7792_s15 + $0x948] sm:$0xff] }
 0x231   : > { %v6938_v3 = vcombine.high %v579_v56, %v591_v58  ;;  %v6937_v9 = vcombine.low %v579_v56, %v591_v58  ;;  %v6939_v2 = vcombine.low %v580_v59, %v592_v60  ;;  %v736_v56 = vld [vmem:[%s7792_s15 + $0xe28] sm:$0xff] }
 0x233   : > { %5713 = vmatpush1.bf16.msra.mxu0 %v6769_v4  ;;  %5795 = vmatpush1.bf16.msra.mxu1 %v6771_v5  ;;  %v6940_v4 = vcombine.high %v580_v59, %v592_v60  ;;  %v603_v5 = vld [vmem:[%s7792_s15 + $0xa00] sm:$0xff] }
 0x234   : > { %5714 = vmatprep.subr.bf16.mxu0 %v6794_v6  ;;  %5796 = vmatprep.subr.bf16.mxu1 %v6796_v7  ;;  %v615_v6 = vld [vmem:[%s7792_s15 + $0xa60] sm:$0xff]  ;;  %v604_v7 = vld [vmem:[%s7792_s15 + $0xa08] sm:$0xff] }
 0x235   : > { %v6962_v11 = vcombine.high %v603_v5, %v615_v6  ;;  %v6961_v19 = vcombine.low %v603_v5, %v615_v6  ;;  %v6963_v20 = vcombine.low %v604_v7, %v616_v8  ;;  %v760_v5 = vld [vmem:[%s7792_s15 + $0xee8] sm:$0xff] }
 0x237   : > { %5715 = vmatpush1.bf16.msra.mxu0 %v6793_v12  ;;  %5797 = vmatpush1.bf16.msra.mxu1 %v6795_v13  ;;  %v6964_v12 = vcombine.high %v604_v7, %v616_v8  ;;  %v627_v13 = vld [vmem:[%s7792_s15 + $0xac0] sm:$0xff] }
 0x238   : > { %5716 = vmatprep.subr.bf16.mxu0 %v6818_v14  ;;  %5798 = vmatprep.subr.bf16.mxu1 %v6820_v15  ;;  %v639_v14 = vld [vmem:[%s7792_s15 + $0xb20] sm:$0xff]  ;;  %v628_v15 = vld [vmem:[%s7792_s15 + $0xac8] sm:$0xff] }
 0x239   : > { %v6986_v21 = vcombine.high %v627_v13, %v639_v14  ;;  %v6985_v27 = vcombine.low %v627_v13, %v639_v14  ;;  %v6987_v28 = vcombine.low %v628_v15, %v640_v18  ;;  %v784_v13 = vld [vmem:[%s7792_s15 + $0xfa8] sm:$0xff] }
 0x23b   : > { %5717 = vmatpush1.bf16.msra.mxu0 %v6817_v22  ;;  %5799 = vmatpush1.bf16.msra.mxu1 %v6819_v23  ;;  %v6988_v22 = vcombine.high %v628_v15, %v640_v18  ;;  %v651_v23 = vld [vmem:[%s7792_s15 + $0xb80] sm:$0xff] }
 0x23c   : > { %5718 = vmatprep.subr.bf16.mxu0 %v6842_v24  ;;  %5800 = vmatprep.subr.bf16.mxu1 %v6844_v25  ;;  %v663_v24 = vld [vmem:[%s7792_s15 + $0xbe0] sm:$0xff]  ;;  %v652_v25 = vld [vmem:[%s7792_s15 + $0xb88] sm:$0xff] }
 0x23d   : > { %v7010_v29 = vcombine.high %v651_v23, %v663_v24  ;;  %v7009_v36 = vcombine.low %v651_v23, %v663_v24  ;;  %v7011_v38 = vcombine.low %v652_v25, %v664_v26  ;;  %v808_v23 = vld [vmem:[%s7792_s15 + $0x1068] sm:$0xff] }
 0x23f   : > { %5719 = vmatpush1.bf16.msra.mxu0 %v6841_v41  ;;  %5801 = vmatpush1.bf16.msra.mxu1 %v6843_v30  ;;  %v7012_v41 = vcombine.high %v652_v25, %v664_v26  ;;  %v675_v30 = vld [vmem:[%s7792_s15 + $0xc40] sm:$0xff]  ;;  %v8519_v25 = vld [vmem:[%s8183_s20 + $0x8] sm:$0xff] }
 0x240   : > { %5720 = vmatprep.subr.bf16.mxu0 %v6866_v31  ;;  %5802 = vmatprep.subr.bf16.mxu1 %v6868_v33  ;;  %v687_v31 = vld [vmem:[%s7792_s15 + $0xca0] sm:$0xff]  ;;  %v676_v33 = vld [vmem:[%s7792_s15 + $0xc48] sm:$0xff] }
 0x241   : > { %v7034_v39 = vcombine.high %v675_v30, %v687_v31  ;;  %v7033_v49 = vcombine.low %v675_v30, %v687_v31  ;;  %v7035_v50 = vcombine.low %v676_v33, %v688_v35  ;;  %v1092_v30 = vrot.slane %v8519_v25, %v8188_v37  ;;  %v820_v31 = vld [vmem:[%s7792_s15 + $0x10c8] sm:$0xff] }
 0x243   : > { %5721 = vmatpush1.bf16.msra.mxu0 %v6865_v40  ;;  %5803 = vmatpush1.bf16.msra.mxu1 %v6867_v44  ;;  %v7036_v40 = vcombine.high %v676_v33, %v688_v35  ;;  %v699_v44 = vld [vmem:[%s7792_s15 + $0xd00] sm:$0xff]  ;;  %v832_v33 = vld [vmem:[%s7792_s15 + $0x1128] sm:$0xff]  ;;  %v1100_v35 = vrot.slane %v8519_v25, %v8196_v42 }
 0x244   : > { %5722 = vmatprep.subr.bf16.mxu0 %v6890_v45  ;;  %5804 = vmatprep.subr.bf16.mxu1 %v6892_v46  ;;  %v711_v45 = vld [vmem:[%s7792_s15 + $0xd60] sm:$0xff]  ;;  %v700_v46 = vld [vmem:[%s7792_s15 + $0xd08] sm:$0xff] }
 0x245   : > { %v7058_v51 = vcombine.high %v699_v44, %v711_v45  ;;  %v7057_v58 = vcombine.low %v699_v44, %v711_v45  ;;  %v7059_v59 = vcombine.low %v700_v46, %v712_v48 }
 0x247   : > { %5723 = vmatpush1.bf16.msra.mxu0 %v6889_v52  ;;  %5805 = vmatpush1.bf16.msra.mxu1 %v6891_v53  ;;  %v7060_v52 = vcombine.high %v700_v46, %v712_v48  ;;  %v723_v53 = vld [vmem:[%s7792_s15 + $0xdc0] sm:$0xff]  ;;  %v7180_v46 = vcombine.high %v820_v31, %v832_v33 }
 0x248   : > { %5724 = vmatprep.subr.bf16.mxu0 %v6914_v54  ;;  %5806 = vmatprep.subr.bf16.mxu1 %v6916_v55  ;;  %v735_v54 = vld [vmem:[%s7792_s15 + $0xe20] sm:$0xff]  ;;  %v724_v55 = vld [vmem:[%s7792_s15 + $0xdc8] sm:$0xff] }
 0x249   : > { %v7082_v60 = vcombine.high %v723_v53, %v735_v54  ;;  %v7081_v6 = vcombine.low %v723_v53, %v735_v54  ;;  %v7083_v7 = vcombine.low %v724_v55, %v736_v56  ;;  %v843_v48 = vld [vmem:[%s7792_s15 + $0x1180] sm:$0xff]  ;;  %v844_v53 = vld [vmem:[%s7792_s15 + $0x1188] sm:$0xff] }
 0x24a   : > { %v856_v54 = vld [vmem:[%s7792_s15 + $0x11e8] sm:$0xff] }
 0x24b   : > { %5725 = vmatpush1.bf16.msra.mxu0 %v6913_v63  ;;  %5807 = vmatpush1.bf16.msra.mxu1 %v6915_v1  ;;  %v7084_v63 = vcombine.high %v724_v55, %v736_v56  ;;  %v747_v1 = vld [vmem:[%s7792_s15 + $0xe80] sm:$0xff] }
 0x24c   : > { %5726 = vmatprep.subr.bf16.mxu0 %v6938_v3  ;;  %5808 = vmatprep.subr.bf16.mxu1 %v6940_v4  ;;  %v759_v3 = vld [vmem:[%s7792_s15 + $0xee0] sm:$0xff]  ;;  %v748_v4 = vld [vmem:[%s7792_s15 + $0xe88] sm:$0xff] }
 0x24d   : > { %v7106_v8 = vcombine.high %v747_v1, %v759_v3  ;;  %v7105_v14 = vcombine.low %v747_v1, %v759_v3  ;;  %v7107_v15 = vcombine.low %v748_v4, %v760_v5 }
 0x24f   : > { %5727 = vmatpush1.bf16.msra.mxu0 %v6937_v9  ;;  %5809 = vmatpush1.bf16.msra.mxu1 %v6939_v2  ;;  %v7108_v9 = vcombine.high %v748_v4, %v760_v5  ;;  %v771_v2 = vld [vmem:[%s7792_s15 + $0xf40] sm:$0xff]  ;;  %v7179_v4 = vcombine.low %v820_v31, %v832_v33 }
 0x250   : > { %5728 = vmatprep.subr.bf16.mxu0 %v6962_v11  ;;  %5810 = vmatprep.subr.bf16.mxu1 %v6964_v12  ;;  %v783_v11 = vld [vmem:[%s7792_s15 + $0xfa0] sm:$0xff]  ;;  %v772_v12 = vld [vmem:[%s7792_s15 + $0xf48] sm:$0xff] }
 0x251   : > { %v7130_v18 = vcombine.high %v771_v2, %v783_v11  ;;  %v7129_v24 = vcombine.low %v771_v2, %v783_v11  ;;  %v7131_v26 = vcombine.low %v772_v12, %v784_v13  ;;  %v879_v2 = vld [vmem:[%s7792_s15 + $0x12a0] sm:$0xff] }
 0x252   : > { %v915_v31 = vld [vmem:[%s7792_s15 + $0x13c0] sm:$0xff] }
 0x253   : > { %5729 = vmatpush1.bf16.msra.mxu0 %v6961_v19  ;;  %5811 = vmatpush1.bf16.msra.mxu1 %v6963_v20  ;;  %v7132_v19 = vcombine.high %v772_v12, %v784_v13  ;;  %v795_v20 = vld [vmem:[%s7792_s15 + $0x1000] sm:$0xff]  ;;  %v868_v12 = vld [vmem:[%s7792_s15 + $0x1248] sm:$0xff] }
 0x254   : > { %5730 = vmatprep.subr.bf16.mxu0 %v6986_v21  ;;  %5812 = vmatprep.subr.bf16.mxu1 %v6988_v22  ;;  %v807_v21 = vld [vmem:[%s7792_s15 + $0x1060] sm:$0xff]  ;;  %v796_v22 = vld [vmem:[%s7792_s15 + $0x1008] sm:$0xff] }
 0x255   : > { %v880_v13 = vld [vmem:[%s7792_s15 + $0x12a8] sm:$0xff]  ;;  %v927_v33 = vld [vmem:[%s7792_s15 + $0x1420] sm:$0xff] }
 0x257   : > { %5731 = vmatpush1.bf16.msra.mxu0 %v6985_v27  ;;  %5813 = vmatpush1.bf16.msra.mxu1 %v6987_v28  ;;  %v7154_v27 = vcombine.high %v795_v20, %v807_v21  ;;  %v7156_v28 = vcombine.high %v796_v22, %v808_v23 }
 0x258   : > { %5732 = vmatprep.subr.bf16.mxu0 %v7010_v29  ;;  %5814 = vmatprep.subr.bf16.mxu1 %v7012_v41  ;;  %v819_v29 = vld [vmem:[%s7792_s15 + $0x10c0] sm:$0xff] }
 0x259   : > { %v831_v41 = vld [vmem:[%s7792_s15 + $0x1120] sm:$0xff] }
 0x25a   : > { %v7178_v44 = vcombine.high %v819_v29, %v831_v41 }
 0x25b   : > { %5733 = vmatpush1.bf16.msra.mxu0 %v7009_v36  ;;  %5815 = vmatpush1.bf16.msra.mxu1 %v7011_v38  ;;  %v1096_v36 = vrot.slane %v8519_v25, %v8199_v43  ;;  %v7153_v38 = vcombine.low %v795_v20, %v807_v21  ;;  %v7228_v21 = vcombine.high %v868_v12, %v880_v13 }
 0x25c   : > { %5743 = vmatprep.subr.bf16.mxu0 %v7034_v39  ;;  %5825 = vmatprep.subr.bf16.mxu1 %v7036_v40  ;;  %v1104_v39 = vrot.slane %v8519_v25, %v8202_v47  ;;  %v7155_v40 = vcombine.low %v796_v22, %v808_v23  ;;  %v891_v22 = vld [vmem:[%s7792_s15 + $0x1300] sm:$0xff] }
 0x25d   : > { %v903_v23 = vld [vmem:[%s7792_s15 + $0x1360] sm:$0xff] }
 0x25e   : > { %5735 = vmatmul.mubr.bf16.vlgmr.msra.gmra.mrb[16].mxu0 %v7803_v17  ;;  %5817 = vmatmul.mubr.bf16.vlgmr.msra.gmra.mrb[16].mxu1 %v7803_v17 }
 0x25f   : > { %5744 = vmatpush1.bf16.msra.mxu0 %v7033_v49  ;;  %5826 = vmatpush1.bf16.msra.mxu1 %v7035_v50  ;;  %v855_v49 = vld [vmem:[%s7792_s15 + $0x11e0] sm:$0xff] }
 0x260   : > { %5745 = vmatprep.subr.bf16.mxu0 %v7058_v51  ;;  %5827 = vmatprep.subr.bf16.mxu1 %v7060_v52  ;;  %v7202_v5 = vcombine.high %v843_v48, %v855_v49 }
 0x261   : > { %5775 = vmatprep.mubr.bf16.mxu0 %v7879_v34  ;;  %5857 = vmatprep.mubr.bf16.mxu1 %v7879_v34 }
 0x263   : > { %5746 = vmatpush1.bf16.msra.mxu0 %v7057_v58  ;;  %5828 = vmatpush1.bf16.msra.mxu1 %v7059_v59 }
 0x264   : > { %5747 = vmatprep.subr.bf16.mxu0 %v7082_v60  ;;  %5829 = vmatprep.subr.bf16.mxu1 %v7084_v63  ;;  %v7177_v60 = vcombine.low %v819_v29, %v831_v41  ;;  %v7227_v29 = vcombine.low %v868_v12, %v880_v13  ;;  %v7250_v41 = vcombine.high %v891_v22, %v903_v23  ;;  %v1023_v12 = vld [vmem:[%s7792_s15 + $0x1720] sm:$0xff]  ;;  %v1012_v13 = vld [vmem:[%s7792_s15 + $0x16c8] sm:$0xff] }
 0x267   : > { %5748 = vmatpush1.bf16.msra.mxu0 %v7081_v6  ;;  %5830 = vmatpush1.bf16.msra.mxu1 %v7083_v7 }
 0x268   : > { %5749 = vmatprep.subr.bf16.mxu0 %v7106_v8  ;;  %5831 = vmatprep.subr.bf16.mxu1 %v7108_v9  ;;  %v7204_v8 = vcombine.high %v844_v53, %v856_v54  ;;  %v867_v9 = vld [vmem:[%s7792_s15 + $0x1240] sm:$0xff] }
 0x269   : > { %v7226_v20 = vcombine.high %v867_v9, %v879_v2 }
 0x26b   : > { %5750 = vmatpush1.bf16.msra.mxu0 %v7105_v14  ;;  %5832 = vmatpush1.bf16.msra.mxu1 %v7107_v15  ;;  %v7201_v15 = vcombine.low %v843_v48, %v855_v49  ;;  %v940_v48 = vld [vmem:[%s7792_s15 + $0x1488] sm:$0xff] }
 0x26c   : > { %5751 = vmatprep.subr.bf16.mxu0 %v7130_v18  ;;  %5833 = vmatprep.subr.bf16.mxu1 %v7132_v19  ;;  %v7203_v19 = vcombine.low %v844_v53, %v856_v54  ;;  %v952_v49 = vld [vmem:[%s7792_s15 + $0x14e8] sm:$0xff]  ;;  %v963_v54 = vld [vmem:[%s7792_s15 + $0x1540] sm:$0xff] }
 0x26d   : > { %v7300_v53 = vcombine.high %v940_v48, %v952_v49 }
 0x26f   : > { %5752 = vmatpush1.bf16.msra.mxu0 %v7129_v24  ;;  %5834 = vmatpush1.bf16.msra.mxu1 %v7131_v26  ;;  %v892_v26 = vld [vmem:[%s7792_s15 + $0x1308] sm:$0xff] }
 0x270   : > { %5753 = vmatprep.subr.bf16.mxu0 %v7154_v27  ;;  %5835 = vmatprep.subr.bf16.mxu1 %v7156_v28  ;;  %v904_v27 = vld [vmem:[%s7792_s15 + $0x1368] sm:$0xff]  ;;  %v7225_v28 = vcombine.low %v867_v9, %v879_v2 }
 0x271   : > { %v5449_v45 = vpop.f32.mrb[8].mxu0  ;;  %v5531_v51 = vpop.f32.mrb[8].mxu1 }
 0x272   : > { %v7490_v50 = vadd.f32 %v5449_v45, %v1092_v30  ;;  %v5451_v52 = vpop.f32.mrb[9].mxu0  ;;  %v7492_v55 = vadd.f32 %v5531_v51, %v1100_v35  ;;  %v5533_v58 = vpop.f32.mrb[9].mxu1  ;;  %v7252_v30 = vcombine.high %v892_v26, %v904_v27  ;;  %v916_v35 = vld [vmem:[%s7792_s15 + $0x13c8] sm:$0xff]  ;;  %v939_v45 = vld [vmem:[%s7792_s15 + $0x1480] sm:$0xff] }
 0x273   : > { %v7491_v56 = vadd.f32 %v5451_v52, %v1096_v36  ;;  %v5453_v59 = vpop.f32.mrb[10].mxu0  ;;  %5754 = vmatpush1.bf16.msra.mxu0 %v7153_v38  ;;  %v7493_v63 = vadd.f32 %v5533_v58, %v1104_v39  ;;  %v5535_v1 = vpop.f32.mrb[10].mxu1  ;;  %5836 = vmatpush1.bf16.msra.mxu1 %v7155_v40  ;;  %v928_v36 = vld [vmem:[%s7792_s15 + $0x1428] sm:$0xff]  ;;  %v7249_v38 = vcombine.low %v891_v22, %v903_v23  ;;  %v1047_v22 = vld [vmem:[%s7792_s15 + $0x17e0] sm:$0xff] }
 0x274   : > { %v5454_v3 = vpop.f32.mrb[11].mxu0  ;;  %5755 = vmatprep.subr.bf16.mxu0 %v7178_v44  ;;  %v5536_v7 = vpop.f32.mrb[11].mxu1  ;;  %5837 = vmatprep.subr.bf16.mxu1 %v7180_v46  ;;  %v7251_v39 = vcombine.low %v892_v26, %v904_v27  ;;  %v7274_v40 = vcombine.high %v915_v31, %v927_v33  ;;  %v7276_v44 = vcombine.high %v916_v35, %v928_v36  ;;  %v951_v46 = vld [vmem:[%s7792_s15 + $0x14e0] sm:$0xff]  ;;  %v976_v58 = vld [vmem:[%s7792_s15 + $0x15a8] sm:$0xff] }
 0x275   : > { %v6088_v6 = vcombine.low %v7490_v50, %v7491_v56  ;;  %v6089_v11 = vcombine.low %v7492_v55, %v7493_v63  ;;  %v7273_v50 = vcombine.low %v915_v31, %v927_v33  ;;  %v7275_v51 = vcombine.low %v916_v35, %v928_v36  ;;  %v975_v55 = vld [vmem:[%s7792_s15 + $0x15a0] sm:$0xff]  ;;  %v964_v56 = vld [vmem:[%s7792_s15 + $0x1548] sm:$0xff]  ;;  %v294_v31 = vld [vmem:[%s7792_s15 + $0x58] sm:$0xff] }
 0x276   : > { %v7298_v52 = vcombine.high %v939_v45, %v951_v46  ;;  %v7297_v59 = vcombine.low %v939_v45, %v951_v46  ;;  %v7322_v63 = vcombine.high %v963_v54, %v975_v55  ;;  %v7324_v1 = vcombine.high %v964_v56, %v976_v58  ;;  %v987_v3 = vld [vmem:[%s7792_s15 + $0x1600] sm:$0xff]  ;;  %v1036_v23 = vld [vmem:[%s7792_s15 + $0x1788] sm:$0xff]  ;;  %v306_v33 = vld [vmem:[%s7792_s15 + $0xb8] sm:$0xff] }
 0x277   : > { %v6096_v14 = vrot.slane %v6088_v6, %v8222_v10  ;;  %5756 = vmatpush1.bf16.msra.mxu0 %v7177_v60  ;;  %v6103_v18 = vrot.slane %v6089_v11, %v8222_v10  ;;  %5838 = vmatpush1.bf16.msra.mxu1 %v7179_v4  ;;  %v7299_v60 = vcombine.low %v940_v48, %v952_v49  ;;  %v999_v4 = vld [vmem:[%s7792_s15 + $0x1660] sm:$0xff]  ;;  %v1000_v6 = vld [vmem:[%s7792_s15 + $0x1668] sm:$0xff]  ;;  %v318_v45 = vld [vmem:[%s7792_s15 + $0x118] sm:$0xff] }
 0x278   : > { %5757 = vmatprep.subr.bf16.mxu0 %v7202_v5  ;;  %5839 = vmatprep.subr.bf16.mxu1 %v7204_v8  ;;  %v988_v5 = vld [vmem:[%s7792_s15 + $0x1608] sm:$0xff]  ;;  %v7321_v7 = vcombine.low %v963_v54, %v975_v55  ;;  %v7323_v8 = vcombine.low %v964_v56, %v976_v58  ;;  %v7346_v9 = vcombine.high %v987_v3, %v999_v4  ;;  %v1011_v11 = vld [vmem:[%s7792_s15 + $0x16c0] sm:$0xff]  ;;  %v330_v46 = vld [vmem:[%s7792_s15 + $0x178] sm:$0xff] }
 0x279   : > { %v6104_v24 = vcombine.low %v6096_v14, %v6103_v18  ;;  %v7348_v2 = vcombine.high %v988_v5, %v1000_v6  ;;  %v1024_v14 = vld [vmem:[%s7792_s15 + $0x1728] sm:$0xff]  ;;  %v7347_v18 = vcombine.low %v988_v5, %v1000_v6  ;;  %v7369_v26 = vcombine.low %v1011_v11, %v1023_v12  ;;  %v342_v54 = vld [vmem:[%s7792_s15 + $0x1d8] sm:$0xff] }
 0x27a   : > { %v7371_v27 = vcombine.low %v1012_v13, %v1024_v14  ;;  %v6655_v49 = vcombine.low %v294_v31, %v306_v33  ;;  %v354_v55 = vld [vmem:[%s7792_s15 + $0x238] sm:$0xff]  ;;  %v6679_v58 = vcombine.low %v318_v45, %v330_v46 }
 0x27b   : > { %5758 = vmatpush1.bf16.msra.mxu0 %v7201_v15  ;;  %6164 = vst [vmem:[%s8236_s29 + $0x10] sm:$0xff] %v6104_v24  ;;  %5840 = vmatpush1.bf16.msra.mxu1 %v7203_v19  ;;  %v7345_v15 = vcombine.low %v987_v3, %v999_v4  ;;  %v7370_v19 = vcombine.high %v1011_v11, %v1023_v12  ;;  %v1048_v24 = vld [vmem:[%s7792_s15 + $0x17e8] sm:$0xff]  ;;  %v366_v3 = vld [vmem:[%s7792_s15 + $0x298] sm:$0xff] }
 0x27c   : > { %5759 = vmatprep.subr.bf16.mxu0 %v7226_v20  ;;  %5841 = vmatprep.subr.bf16.mxu1 %v7228_v21  ;;  %v7372_v20 = vcombine.high %v1012_v13, %v1024_v14  ;;  %v1035_v21 = vld [vmem:[%s7792_s15 + $0x1780] sm:$0xff]  ;;  %v7395_v36 = vcombine.low %v1036_v23, %v1048_v24  ;;  %v378_v4 = vld [vmem:[%s7792_s15 + $0x2f8] sm:$0xff]  ;;  %v6703_v6 = vcombine.low %v342_v54, %v354_v55 }
 0x27d   : > { %v7393_v35 = vcombine.low %v1035_v21, %v1047_v22  ;;  %v390_v11 = vld [vmem:[%s7792_s15 + $0x358] sm:$0xff]  ;;  %v6727_v14 = vcombine.low %v366_v3, %v378_v4 }
 0x27e   : > { %v402_v12 = vld [vmem:[%s7792_s15 + $0x3b8] sm:$0xff] }
 0x27f   : > { %5760 = vmatpush1.bf16.msra.mxu0 %v7225_v28  ;;  %5842 = vmatpush1.bf16.msra.mxu1 %v7227_v29  ;;  %v7394_v28 = vcombine.high %v1035_v21, %v1047_v22  ;;  %v7396_v29 = vcombine.high %v1036_v23, %v1048_v24  ;;  %v414_v21 = vld [vmem:[%s7792_s15 + $0x418] sm:$0xff]  ;;  %v6751_v24 = vcombine.low %v390_v11, %v402_v12 }
 0x280   : > { %5761 = vmatprep.subr.bf16.mxu0 %v7250_v41  ;;  %5843 = vmatprep.subr.bf16.mxu1 %v7252_v30  ;;  %v293_v41 = vld [vmem:[%s7792_s15 + $0x50] sm:$0xff]  ;;  %v426_v22 = vld [vmem:[%s7792_s15 + $0x478] sm:$0xff] }
 0x281   : > { %v305_v30 = vld [vmem:[%s7792_s15 + $0xb0] sm:$0xff] }
 0x282   : > { %v6653_v48 = vcombine.low %v293_v41, %v305_v30 }
 0x283   : > { %5762 = vmatpush1.bf16.msra.mxu0 %v7249_v38  ;;  %5844 = vmatpush1.bf16.msra.mxu1 %v7251_v39  ;;  %v6654_v38 = vcombine.high %v293_v41, %v305_v30  ;;  %v6656_v39 = vcombine.high %v294_v31, %v306_v33  ;;  %v438_v41 = vld [vmem:[%s7792_s15 + $0x4d8] sm:$0xff]  ;;  %v6775_v33 = vcombine.low %v414_v21, %v426_v22 }
 0x284   : > { %5763 = vmatprep.subr.bf16.mxu0 %v7274_v40  ;;  %5845 = vmatprep.subr.bf16.mxu1 %v7276_v44  ;;  %v317_v40 = vld [vmem:[%s7792_s15 + $0x110] sm:$0xff]  ;;  %v450_v30 = vld [vmem:[%s7792_s15 + $0x538] sm:$0xff] }
 0x285   : > { %v329_v44 = vld [vmem:[%s7792_s15 + $0x170] sm:$0xff] }
 0x286   : > { %v6677_v56 = vcombine.low %v317_v40, %v329_v44 }
 0x287   : > { %5764 = vmatpush1.bf16.msra.mxu0 %v7273_v50  ;;  %5846 = vmatpush1.bf16.msra.mxu1 %v7275_v51  ;;  %v6678_v50 = vcombine.high %v317_v40, %v329_v44  ;;  %v6680_v51 = vcombine.high %v318_v45, %v330_v46  ;;  %v462_v40 = vld [vmem:[%s7792_s15 + $0x598] sm:$0xff]  ;;  %v6799_v46 = vcombine.low %v438_v41, %v450_v30 }
 0x288   : > { %5765 = vmatprep.subr.bf16.mxu0 %v7298_v52  ;;  %5847 = vmatprep.subr.bf16.mxu1 %v7300_v53  ;;  %v341_v52 = vld [vmem:[%s7792_s15 + $0x1d0] sm:$0xff]  ;;  %v474_v44 = vld [vmem:[%s7792_s15 + $0x5f8] sm:$0xff] }
 0x289   : > { %v353_v53 = vld [vmem:[%s7792_s15 + $0x230] sm:$0xff] }
 0x28a   : > { %v6701_v5 = vcombine.low %v341_v52, %v353_v53 }
 0x28b   : > { %5766 = vmatpush1.bf16.msra.mxu0 %v7297_v59  ;;  %5848 = vmatpush1.bf16.msra.mxu1 %v7299_v60  ;;  %v6702_v59 = vcombine.high %v341_v52, %v353_v53  ;;  %v6704_v60 = vcombine.high %v342_v54, %v354_v55  ;;  %v486_v52 = vld [vmem:[%s7792_s15 + $0x658] sm:$0xff]  ;;  %v6823_v55 = vcombine.low %v462_v40, %v474_v44 }
 0x28c   : > { %5767 = vmatprep.subr.bf16.mxu0 %v7322_v63  ;;  %5849 = vmatprep.subr.bf16.mxu1 %v7324_v1  ;;  %v365_v63 = vld [vmem:[%s7792_s15 + $0x290] sm:$0xff]  ;;  %v498_v53 = vld [vmem:[%s7792_s15 + $0x6b8] sm:$0xff] }
 0x28d   : > { %v377_v1 = vld [vmem:[%s7792_s15 + $0x2f0] sm:$0xff] }
 0x28e   : > { %v6725_v13 = vcombine.low %v365_v63, %v377_v1 }
 0x28f   : > { %5768 = vmatpush1.bf16.msra.mxu0 %v7321_v7  ;;  %5850 = vmatpush1.bf16.msra.mxu1 %v7323_v8  ;;  %v6726_v7 = vcombine.high %v365_v63, %v377_v1  ;;  %v6728_v8 = vcombine.high %v366_v3, %v378_v4  ;;  %v510_v63 = vld [vmem:[%s7792_s15 + $0x718] sm:$0xff]  ;;  %v6847_v4 = vcombine.low %v486_v52, %v498_v53 }
 0x290   : > { %5769 = vmatprep.subr.bf16.mxu0 %v7346_v9  ;;  %5851 = vmatprep.subr.bf16.mxu1 %v7348_v2  ;;  %v389_v9 = vld [vmem:[%s7792_s15 + $0x350] sm:$0xff]  ;;  %v522_v1 = vld [vmem:[%s7792_s15 + $0x778] sm:$0xff] }
 0x291   : > { %v401_v2 = vld [vmem:[%s7792_s15 + $0x3b0] sm:$0xff] }
 0x292   : > { %v6749_v23 = vcombine.low %v389_v9, %v401_v2 }
 0x293   : > { %5770 = vmatpush1.bf16.msra.mxu0 %v7345_v15  ;;  %5852 = vmatpush1.bf16.msra.mxu1 %v7347_v18  ;;  %v6750_v15 = vcombine.high %v389_v9, %v401_v2  ;;  %v6752_v18 = vcombine.high %v390_v11, %v402_v12  ;;  %v534_v9 = vld [vmem:[%s7792_s15 + $0x7d8] sm:$0xff]  ;;  %v6871_v12 = vcombine.low %v510_v63, %v522_v1 }
 0x294   : > { %5771 = vmatprep.subr.bf16.mxu0 %v7370_v19  ;;  %5853 = vmatprep.subr.bf16.mxu1 %v7372_v20  ;;  %v413_v19 = vld [vmem:[%s7792_s15 + $0x410] sm:$0xff]  ;;  %v546_v2 = vld [vmem:[%s7792_s15 + $0x838] sm:$0xff] }
 0x295   : > { %v425_v20 = vld [vmem:[%s7792_s15 + $0x470] sm:$0xff] }
 0x296   : > { %v6773_v31 = vcombine.low %v413_v19, %v425_v20 }
 0x297   : > { %5772 = vmatpush1.bf16.msra.mxu0 %v7369_v26  ;;  %5854 = vmatpush1.bf16.msra.mxu1 %v7371_v27  ;;  %v6774_v26 = vcombine.high %v413_v19, %v425_v20  ;;  %v6776_v27 = vcombine.high %v414_v21, %v426_v22  ;;  %v558_v19 = vld [vmem:[%s7792_s15 + $0x898] sm:$0xff]  ;;  %v6895_v22 = vcombine.low %v534_v9, %v546_v2 }
 0x298   : > { %5773 = vmatprep.subr.bf16.mxu0 %v7394_v28  ;;  %5855 = vmatprep.subr.bf16.mxu1 %v7396_v29  ;;  %v437_v28 = vld [vmem:[%s7792_s15 + $0x4d0] sm:$0xff]  ;;  %v570_v20 = vld [vmem:[%s7792_s15 + $0x8f8] sm:$0xff] }
 0x299   : > { %v449_v29 = vld [vmem:[%s7792_s15 + $0x530] sm:$0xff] }
 0x29a   : > { %v6797_v45 = vcombine.low %v437_v28, %v449_v29 }
 0x29b   : > { %5774 = vmatpush1.bf16.msra.mxu0 %v7393_v35  ;;  %5856 = vmatpush1.bf16.msra.mxu1 %v7395_v36  ;;  %v6798_v35 = vcombine.high %v437_v28, %v449_v29  ;;  %v6800_v36 = vcombine.high %v438_v41, %v450_v30  ;;  %v582_v28 = vld [vmem:[%s7792_s15 + $0x958] sm:$0xff]  ;;  %v6919_v30 = vcombine.low %v558_v19, %v570_v20 }
 0x29c   : > { %5866 = vmatprep.subr.bf16.mxu0 %v6654_v38  ;;  %5948 = vmatprep.subr.bf16.mxu1 %v6656_v39  ;;  %v461_v38 = vld [vmem:[%s7792_s15 + $0x590] sm:$0xff]  ;;  %v594_v29 = vld [vmem:[%s7792_s15 + $0x9b8] sm:$0xff] }
 0x29d   : > { %v473_v39 = vld [vmem:[%s7792_s15 + $0x5f0] sm:$0xff] }
 0x29e   : > { %5776 = vmatmul.mubr.bf16.vlgmr.msra.gmra.mrb[16].mxu0 %v7945_v32  ;;  %5858 = vmatmul.mubr.bf16.vlgmr.msra.gmra.mrb[16].mxu1 %v7945_v32  ;;  %v6821_v54 = vcombine.low %v461_v38, %v473_v39 }
 0x29f   : > { %5867 = vmatpush1.bf16.msra.mxu0 %v6653_v48  ;;  %5949 = vmatpush1.bf16.msra.mxu1 %v6655_v49  ;;  %v6822_v48 = vcombine.high %v461_v38, %v473_v39  ;;  %v6824_v49 = vcombine.high %v462_v40, %v474_v44  ;;  %v606_v38 = vld [vmem:[%s7792_s15 + $0xa18] sm:$0xff]  ;;  %v6943_v44 = vcombine.low %v582_v28, %v594_v29 }
 0x2a0   : > { %5868 = vmatprep.subr.bf16.mxu0 %v6678_v50  ;;  %5950 = vmatprep.subr.bf16.mxu1 %v6680_v51  ;;  %v485_v50 = vld [vmem:[%s7792_s15 + $0x650] sm:$0xff]  ;;  %v618_v39 = vld [vmem:[%s7792_s15 + $0xa78] sm:$0xff] }
 0x2a1   : > { %5898 = vmatprep.mubr.bf16.mxu0 %v7801_v16  ;;  %5980 = vmatprep.mubr.bf16.mxu1 %v7801_v16  ;;  %v497_v51 = vld [vmem:[%s7792_s15 + $0x6b0] sm:$0xff] }
 0x2a2   : > { %v6845_v3 = vcombine.low %v485_v50, %v497_v51 }
 0x2a3   : > { %5869 = vmatpush1.bf16.msra.mxu0 %v6677_v56  ;;  %5951 = vmatpush1.bf16.msra.mxu1 %v6679_v58  ;;  %v6846_v56 = vcombine.high %v485_v50, %v497_v51  ;;  %v6848_v58 = vcombine.high %v486_v52, %v498_v53  ;;  %v630_v50 = vld [vmem:[%s7792_s15 + $0xad8] sm:$0xff]  ;;  %v6967_v53 = vcombine.low %v606_v38, %v618_v39 }
 0x2a4   : > { %5870 = vmatprep.subr.bf16.mxu0 %v6702_v59  ;;  %5952 = vmatprep.subr.bf16.mxu1 %v6704_v60  ;;  %v509_v59 = vld [vmem:[%s7792_s15 + $0x710] sm:$0xff]  ;;  %v642_v51 = vld [vmem:[%s7792_s15 + $0xb38] sm:$0xff] }
 0x2a5   : > { %v521_v60 = vld [vmem:[%s7792_s15 + $0x770] sm:$0xff] }
 0x2a6   : > { %v6869_v11 = vcombine.low %v509_v59, %v521_v60 }
 0x2a7   : > { %5871 = vmatpush1.bf16.msra.mxu0 %v6701_v5  ;;  %5953 = vmatpush1.bf16.msra.mxu1 %v6703_v6  ;;  %v6870_v5 = vcombine.high %v509_v59, %v521_v60  ;;  %v6872_v6 = vcombine.high %v510_v63, %v522_v1  ;;  %v654_v59 = vld [vmem:[%s7792_s15 + $0xb98] sm:$0xff]  ;;  %v6991_v1 = vcombine.low %v630_v50, %v642_v51 }
 0x2a8   : > { %5872 = vmatprep.subr.bf16.mxu0 %v6726_v7  ;;  %5954 = vmatprep.subr.bf16.mxu1 %v6728_v8  ;;  %v533_v7 = vld [vmem:[%s7792_s15 + $0x7d0] sm:$0xff]  ;;  %v666_v60 = vld [vmem:[%s7792_s15 + $0xbf8] sm:$0xff] }
 0x2a9   : > { %v545_v8 = vld [vmem:[%s7792_s15 + $0x830] sm:$0xff] }
 0x2aa   : > { %v6893_v21 = vcombine.low %v533_v7, %v545_v8 }
 0x2ab   : > { %5873 = vmatpush1.bf16.msra.mxu0 %v6725_v13  ;;  %5955 = vmatpush1.bf16.msra.mxu1 %v6727_v14  ;;  %v6894_v13 = vcombine.high %v533_v7, %v545_v8  ;;  %v6896_v14 = vcombine.high %v534_v9, %v546_v2  ;;  %v678_v7 = vld [vmem:[%s7792_s15 + $0xc58] sm:$0xff]  ;;  %v7015_v2 = vcombine.low %v654_v59, %v666_v60 }
 0x2ac   : > { %5874 = vmatprep.subr.bf16.mxu0 %v6750_v15  ;;  %5956 = vmatprep.subr.bf16.mxu1 %v6752_v18  ;;  %v557_v15 = vld [vmem:[%s7792_s15 + $0x890] sm:$0xff]  ;;  %v690_v8 = vld [vmem:[%s7792_s15 + $0xcb8] sm:$0xff] }
 0x2ad   : > { %v569_v18 = vld [vmem:[%s7792_s15 + $0x8f0] sm:$0xff] }
 0x2ae   : > { %v6917_v41 = vcombine.low %v557_v15, %v569_v18 }
 0x2af   : > { %5875 = vmatpush1.bf16.msra.mxu0 %v6749_v23  ;;  %5957 = vmatpush1.bf16.msra.mxu1 %v6751_v24  ;;  %v6918_v23 = vcombine.high %v557_v15, %v569_v18  ;;  %v6920_v24 = vcombine.high %v558_v19, %v570_v20  ;;  %v702_v15 = vld [vmem:[%s7792_s15 + $0xd18] sm:$0xff]  ;;  %v7039_v20 = vcombine.low %v678_v7, %v690_v8 }
 0x2b0   : > { %5876 = vmatprep.subr.bf16.mxu0 %v6774_v26  ;;  %5958 = vmatprep.subr.bf16.mxu1 %v6776_v27  ;;  %v581_v26 = vld [vmem:[%s7792_s15 + $0x950] sm:$0xff]  ;;  %v714_v18 = vld [vmem:[%s7792_s15 + $0xd78] sm:$0xff] }
 0x2b1   : > { %v593_v27 = vld [vmem:[%s7792_s15 + $0x9b0] sm:$0xff] }
 0x2b2   : > { %v6941_v40 = vcombine.low %v581_v26, %v593_v27 }
 0x2b3   : > { %5877 = vmatpush1.bf16.msra.mxu0 %v6773_v31  ;;  %5959 = vmatpush1.bf16.msra.mxu1 %v6775_v33  ;;  %v6942_v31 = vcombine.high %v581_v26, %v593_v27  ;;  %v6944_v33 = vcombine.high %v582_v28, %v594_v29  ;;  %v726_v26 = vld [vmem:[%s7792_s15 + $0xdd8] sm:$0xff]  ;;  %v7063_v29 = vcombine.low %v702_v15, %v714_v18 }
 0x2b4   : > { %5878 = vmatprep.subr.bf16.mxu0 %v6798_v35  ;;  %5960 = vmatprep.subr.bf16.mxu1 %v6800_v36  ;;  %v605_v35 = vld [vmem:[%s7792_s15 + $0xa10] sm:$0xff]  ;;  %v738_v27 = vld [vmem:[%s7792_s15 + $0xe38] sm:$0xff] }
 0x2b5   : > { %v617_v36 = vld [vmem:[%s7792_s15 + $0xa70] sm:$0xff] }
 0x2b6   : > { %v6965_v52 = vcombine.low %v605_v35, %v617_v36 }
 0x2b7   : > { %5879 = vmatpush1.bf16.msra.mxu0 %v6797_v45  ;;  %5961 = vmatpush1.bf16.msra.mxu1 %v6799_v46  ;;  %v6966_v45 = vcombine.high %v605_v35, %v617_v36  ;;  %v6968_v46 = vcombine.high %v606_v38, %v618_v39  ;;  %v750_v35 = vld [vmem:[%s7792_s15 + $0xe98] sm:$0xff]  ;;  %v7087_v39 = vcombine.low %v726_v26, %v738_v27 }
 0x2b8   : > { %5880 = vmatprep.subr.bf16.mxu0 %v6822_v48  ;;  %5962 = vmatprep.subr.bf16.mxu1 %v6824_v49  ;;  %v629_v48 = vld [vmem:[%s7792_s15 + $0xad0] sm:$0xff]  ;;  %v762_v36 = vld [vmem:[%s7792_s15 + $0xef8] sm:$0xff] }
 0x2b9   : > { %v641_v49 = vld [vmem:[%s7792_s15 + $0xb30] sm:$0xff] }
 0x2ba   : > { %v6989_v63 = vcombine.low %v629_v48, %v641_v49 }
 0x2bb   : > { %5881 = vmatpush1.bf16.msra.mxu0 %v6821_v54  ;;  %5963 = vmatpush1.bf16.msra.mxu1 %v6823_v55  ;;  %v6990_v54 = vcombine.high %v629_v48, %v641_v49  ;;  %v6992_v55 = vcombine.high %v630_v50, %v642_v51  ;;  %v774_v48 = vld [vmem:[%s7792_s15 + $0xf58] sm:$0xff]  ;;  %v7111_v51 = vcombine.low %v750_v35, %v762_v36 }
 0x2bc   : > { %5882 = vmatprep.subr.bf16.mxu0 %v6846_v56  ;;  %5964 = vmatprep.subr.bf16.mxu1 %v6848_v58  ;;  %v653_v56 = vld [vmem:[%s7792_s15 + $0xb90] sm:$0xff]  ;;  %v786_v49 = vld [vmem:[%s7792_s15 + $0xfb8] sm:$0xff] }
 0x2bd   : > { %v665_v58 = vld [vmem:[%s7792_s15 + $0xbf0] sm:$0xff] }
 0x2be   : > { %v7013_v9 = vcombine.low %v653_v56, %v665_v58 }
 0x2bf   : > { %5883 = vmatpush1.bf16.msra.mxu0 %v6845_v3  ;;  %5965 = vmatpush1.bf16.msra.mxu1 %v6847_v4  ;;  %v7014_v3 = vcombine.high %v653_v56, %v665_v58  ;;  %v7016_v4 = vcombine.high %v654_v59, %v666_v60  ;;  %v798_v56 = vld [vmem:[%s7792_s15 + $0x1018] sm:$0xff]  ;;  %v7135_v60 = vcombine.low %v774_v48, %v786_v49 }
 0x2c0   : > { %5884 = vmatprep.subr.bf16.mxu0 %v6870_v5  ;;  %5966 = vmatprep.subr.bf16.mxu1 %v6872_v6  ;;  %v677_v5 = vld [vmem:[%s7792_s15 + $0xc50] sm:$0xff]  ;;  %v810_v58 = vld [vmem:[%s7792_s15 + $0x1078] sm:$0xff] }
 0x2c1   : > { %v689_v6 = vld [vmem:[%s7792_s15 + $0xcb0] sm:$0xff] }
 0x2c2   : > { %v7037_v19 = vcombine.low %v677_v5, %v689_v6 }
 0x2c3   : > { %5885 = vmatpush1.bf16.msra.mxu0 %v6869_v11  ;;  %5967 = vmatpush1.bf16.msra.mxu1 %v6871_v12  ;;  %v7038_v11 = vcombine.high %v677_v5, %v689_v6  ;;  %v7040_v12 = vcombine.high %v678_v7, %v690_v8  ;;  %v1108_v5 = vrot.slane %v8519_v25, %v8358_v57  ;;  %v822_v6 = vld [vmem:[%s7792_s15 + $0x10d8] sm:$0xff] }
 0x2c4   : > { %5886 = vmatprep.subr.bf16.mxu0 %v6894_v13  ;;  %5968 = vmatprep.subr.bf16.mxu1 %v6896_v14  ;;  %v701_v13 = vld [vmem:[%s7792_s15 + $0xd10] sm:$0xff]  ;;  %v834_v7 = vld [vmem:[%s7792_s15 + $0x1138] sm:$0xff]  ;;  %v1116_v8 = vrot.slane %v8519_v25, %v8363_v61 }
 0x2c5   : > { %v713_v14 = vld [vmem:[%s7792_s15 + $0xd70] sm:$0xff] }
 0x2c6   : > { %v7061_v28 = vcombine.low %v701_v13, %v713_v14 }
 0x2c7   : > { %5887 = vmatpush1.bf16.msra.mxu0 %v6893_v21  ;;  %5969 = vmatpush1.bf16.msra.mxu1 %v6895_v22  ;;  %v7062_v21 = vcombine.high %v701_v13, %v713_v14  ;;  %v7064_v22 = vcombine.high %v702_v15, %v714_v18  ;;  %v7184_v15 = vcombine.high %v822_v6, %v834_v7  ;;  %v845_v18 = vld [vmem:[%s7792_s15 + $0x1190] sm:$0xff] }
 0x2c8   : > { %5888 = vmatprep.subr.bf16.mxu0 %v6918_v23  ;;  %5970 = vmatprep.subr.bf16.mxu1 %v6920_v24  ;;  %v725_v23 = vld [vmem:[%s7792_s15 + $0xdd0] sm:$0xff] }
 0x2c9   : > { %v737_v24 = vld [vmem:[%s7792_s15 + $0xe30] sm:$0xff] }
 0x2ca   : > { %v7085_v38 = vcombine.low %v725_v23, %v737_v24 }
 0x2cb   : > { %5889 = vmatpush1.bf16.msra.mxu0 %v6917_v41  ;;  %5971 = vmatpush1.bf16.msra.mxu1 %v6919_v30  ;;  %v7086_v41 = vcombine.high %v725_v23, %v737_v24  ;;  %v7088_v30 = vcombine.high %v726_v26, %v738_v27  ;;  %v846_v23 = vld [vmem:[%s7792_s15 + $0x1198] sm:$0xff] }
 0x2cc   : > { %5890 = vmatprep.subr.bf16.mxu0 %v6942_v31  ;;  %5972 = vmatprep.subr.bf16.mxu1 %v6944_v33  ;;  %v749_v31 = vld [vmem:[%s7792_s15 + $0xe90] sm:$0xff]  ;;  %v858_v24 = vld [vmem:[%s7792_s15 + $0x11f8] sm:$0xff] }
 0x2cd   : > { %v761_v33 = vld [vmem:[%s7792_s15 + $0xef0] sm:$0xff] }
 0x2ce   : > { %v7109_v50 = vcombine.low %v749_v31, %v761_v33 }
 0x2cf   : > { %5891 = vmatpush1.bf16.msra.mxu0 %v6941_v40  ;;  %5973 = vmatpush1.bf16.msra.mxu1 %v6943_v44  ;;  %v7110_v40 = vcombine.high %v749_v31, %v761_v33  ;;  %v7112_v44 = vcombine.high %v750_v35, %v762_v36  ;;  %v7183_v33 = vcombine.low %v822_v6, %v834_v7  ;;  %v929_v6 = vld [vmem:[%s7792_s15 + $0x1430] sm:$0xff]  ;;  %v918_v7 = vld [vmem:[%s7792_s15 + $0x13d8] sm:$0xff] }
 0x2d0   : > { %5892 = vmatprep.subr.bf16.mxu0 %v6966_v45  ;;  %5974 = vmatprep.subr.bf16.mxu1 %v6968_v46  ;;  %v773_v45 = vld [vmem:[%s7792_s15 + $0xf50] sm:$0xff] }
 0x2d1   : > { %v785_v46 = vld [vmem:[%s7792_s15 + $0xfb0] sm:$0xff] }
 0x2d2   : > { %v7133_v59 = vcombine.low %v773_v45, %v785_v46 }
 0x2d3   : > { %5893 = vmatpush1.bf16.msra.mxu0 %v6965_v52  ;;  %5975 = vmatpush1.bf16.msra.mxu1 %v6967_v53  ;;  %v7134_v52 = vcombine.high %v773_v45, %v785_v46  ;;  %v7136_v53 = vcombine.high %v774_v48, %v786_v49  ;;  %v870_v46 = vld [vmem:[%s7792_s15 + $0x1258] sm:$0xff] }
 0x2d4   : > { %5894 = vmatprep.subr.bf16.mxu0 %v6990_v54  ;;  %5976 = vmatprep.subr.bf16.mxu1 %v6992_v55  ;;  %v797_v54 = vld [vmem:[%s7792_s15 + $0x1010] sm:$0xff]  ;;  %v882_v48 = vld [vmem:[%s7792_s15 + $0x12b8] sm:$0xff] }
 0x2d5   : > { %v809_v55 = vld [vmem:[%s7792_s15 + $0x1070] sm:$0xff] }
 0x2d7   : > { %5895 = vmatpush1.bf16.msra.mxu0 %v6989_v63  ;;  %5977 = vmatpush1.bf16.msra.mxu1 %v6991_v1  ;;  %v7158_v63 = vcombine.high %v797_v54, %v809_v55  ;;  %v7160_v1 = vcombine.high %v798_v56, %v810_v58 }
 0x2d8   : > { %5896 = vmatprep.subr.bf16.mxu0 %v7014_v3  ;;  %5978 = vmatprep.subr.bf16.mxu1 %v7016_v4  ;;  %v821_v3 = vld [vmem:[%s7792_s15 + $0x10d0] sm:$0xff] }
 0x2d9   : > { %v833_v4 = vld [vmem:[%s7792_s15 + $0x1130] sm:$0xff] }
 0x2da   : > { %v7182_v13 = vcombine.high %v821_v3, %v833_v4 }
 0x2db   : > { %5897 = vmatpush1.bf16.msra.mxu0 %v7013_v9  ;;  %5979 = vmatpush1.bf16.msra.mxu1 %v7015_v2  ;;  %v1112_v9 = vrot.slane %v8519_v25, %v8366_v62  ;;  %v7157_v2 = vcombine.low %v797_v54, %v809_v55  ;;  %v7232_v54 = vcombine.high %v870_v46, %v882_v48  ;;  %v893_v55 = vld [vmem:[%s7792_s15 + $0x1310] sm:$0xff] }
 0x2dc   : > { %5907 = vmatprep.subr.bf16.mxu0 %v7038_v11  ;;  %5989 = vmatprep.subr.bf16.mxu1 %v7040_v12  ;;  %v1120_v11 = vrot.slane %v8519_v25, %v8369_v0  ;;  %v7159_v12 = vcombine.low %v798_v56, %v810_v58  ;;  %v7181_v25 = vcombine.low %v821_v3, %v833_v4  ;;  %v905_v56 = vld [vmem:[%s7792_s15 + $0x1370] sm:$0xff] }
 0x2dd   : > { %v7254_v3 = vcombine.high %v893_v55, %v905_v56 }
 0x2de   : > { %5899 = vmatmul.mubr.bf16.vlgmr.msra.gmra.mrb[20].mxu0 %v7803_v17  ;;  %5981 = vmatmul.mubr.bf16.vlgmr.msra.gmra.mrb[20].mxu1 %v7803_v17 }
 0x2df   : > { %5908 = vmatpush1.bf16.msra.mxu0 %v7037_v19  ;;  %5990 = vmatpush1.bf16.msra.mxu1 %v7039_v20  ;;  %v857_v19 = vld [vmem:[%s7792_s15 + $0x11f0] sm:$0xff] }
 0x2e0   : > { %5909 = vmatprep.subr.bf16.mxu0 %v7062_v21  ;;  %5991 = vmatprep.subr.bf16.mxu1 %v7064_v22  ;;  %v7206_v35 = vcombine.high %v845_v18, %v857_v19 }
 0x2e1   : > { %5939 = vmatprep.mubr.bf16.mxu0 %v7879_v34  ;;  %6021 = vmatprep.mubr.bf16.mxu1 %v7879_v34 }
 0x2e3   : > { %5910 = vmatpush1.bf16.msra.mxu0 %v7061_v28  ;;  %5992 = vmatpush1.bf16.msra.mxu1 %v7063_v29 }
 0x2e4   : > { %5911 = vmatprep.subr.bf16.mxu0 %v7086_v41  ;;  %5993 = vmatprep.subr.bf16.mxu1 %v7088_v30 }
 0x2e7   : > { %5912 = vmatpush1.bf16.msra.mxu0 %v7085_v38  ;;  %5994 = vmatpush1.bf16.msra.mxu1 %v7087_v39  ;;  %v7208_v39 = vcombine.high %v846_v23, %v858_v24 }
 0x2e8   : > { %5913 = vmatprep.subr.bf16.mxu0 %v7110_v40  ;;  %5995 = vmatprep.subr.bf16.mxu1 %v7112_v44  ;;  %v869_v40 = vld [vmem:[%s7792_s15 + $0x1250] sm:$0xff] }
 0x2e9   : > { %v881_v44 = vld [vmem:[%s7792_s15 + $0x12b0] sm:$0xff] }
 0x2eb   : > { %5914 = vmatpush1.bf16.msra.mxu0 %v7109_v50  ;;  %5996 = vmatpush1.bf16.msra.mxu1 %v7111_v51  ;;  %v7205_v50 = vcombine.low %v845_v18, %v857_v19  ;;  %v954_v18 = vld [vmem:[%s7792_s15 + $0x14f8] sm:$0xff] }
 0x2ec   : > { %5915 = vmatprep.subr.bf16.mxu0 %v7134_v52  ;;  %5997 = vmatprep.subr.bf16.mxu1 %v7136_v53  ;;  %v7207_v52 = vcombine.low %v846_v23, %v858_v24  ;;  %v7230_v53 = vcombine.high %v869_v40, %v881_v44  ;;  %v965_v23 = vld [vmem:[%s7792_s15 + $0x1550] sm:$0xff] }
 0x2ed   : > { %v977_v24 = vld [vmem:[%s7792_s15 + $0x15b0] sm:$0xff] }
 0x2ef   : > { %5916 = vmatpush1.bf16.msra.mxu0 %v7133_v59  ;;  %5998 = vmatpush1.bf16.msra.mxu1 %v7135_v60  ;;  %v894_v59 = vld [vmem:[%s7792_s15 + $0x1318] sm:$0xff] }
 0x2f0   : > { %5917 = vmatprep.subr.bf16.mxu0 %v7158_v63  ;;  %5999 = vmatprep.subr.bf16.mxu1 %v7160_v1  ;;  %v906_v60 = vld [vmem:[%s7792_s15 + $0x1378] sm:$0xff]  ;;  %v7229_v63 = vcombine.low %v869_v40, %v881_v44  ;;  %v7231_v1 = vcombine.low %v870_v46, %v882_v48  ;;  %v1013_v44 = vld [vmem:[%s7792_s15 + $0x16d0] sm:$0xff] }
 0x2f1   : > { %v5613_v14 = vpop.f32.mrb[12].mxu0  ;;  %v5695_v21 = vpop.f32.mrb[12].mxu1  ;;  %v7256_v4 = vcombine.high %v894_v59, %v906_v60  ;;  %v1014_v46 = vld [vmem:[%s7792_s15 + $0x16d8] sm:$0xff] }
 0x2f2   : > { %v7494_v20 = vadd.f32 %v5613_v14, %v1108_v5  ;;  %v5615_v22 = vpop.f32.mrb[13].mxu0  ;;  %v7496_v26 = vadd.f32 %v5695_v21, %v1116_v8  ;;  %v5697_v28 = vpop.f32.mrb[13].mxu1  ;;  %v917_v5 = vld [vmem:[%s7792_s15 + $0x13d0] sm:$0xff]  ;;  %v930_v8 = vld [vmem:[%s7792_s15 + $0x1438] sm:$0xff] }
 0x2f3   : > { %v7495_v27 = vadd.f32 %v5615_v22, %v1112_v9  ;;  %v5617_v29 = vpop.f32.mrb[14].mxu0  ;;  %5918 = vmatpush1.bf16.msra.mxu0 %v7157_v2  ;;  %v7497_v41 = vadd.f32 %v5697_v28, %v1120_v11  ;;  %v5699_v30 = vpop.f32.mrb[14].mxu1  ;;  %6000 = vmatpush1.bf16.msra.mxu1 %v7159_v12  ;;  %v7253_v9 = vcombine.low %v893_v55, %v905_v56  ;;  %v953_v14 = vld [vmem:[%s7792_s15 + $0x14f0] sm:$0xff]  ;;  %v1026_v48 = vld [vmem:[%s7792_s15 + $0x1738] sm:$0xff] }
 0x2f4   : > { %v5618_v31 = vpop.f32.mrb[15].mxu0  ;;  %5919 = vmatprep.subr.bf16.mxu0 %v7182_v13  ;;  %v5700_v38 = vpop.f32.mrb[15].mxu1  ;;  %6001 = vmatprep.subr.bf16.mxu1 %v7184_v15  ;;  %v7255_v2 = vcombine.low %v894_v59, %v906_v60  ;;  %v7278_v11 = vcombine.high %v917_v5, %v929_v6  ;;  %v7280_v12 = vcombine.high %v918_v7, %v930_v8  ;;  %v941_v13 = vld [vmem:[%s7792_s15 + $0x1490] sm:$0xff]  ;;  %v942_v15 = vld [vmem:[%s7792_s15 + $0x1498] sm:$0xff] }
 0x2f5   : > { %v6105_v36 = vcombine.low %v7494_v20, %v7495_v27  ;;  %v6106_v45 = vcombine.low %v7496_v26, %v7497_v41  ;;  %v7277_v19 = vcombine.low %v917_v5, %v929_v6  ;;  %v7279_v20 = vcombine.low %v918_v7, %v930_v8  ;;  %v966_v26 = vld [vmem:[%s7792_s15 + $0x1558] sm:$0xff]  ;;  %v989_v30 = vld [vmem:[%s7792_s15 + $0x1610] sm:$0xff]  ;;  %v7598_v5 = vld [vmem:[%s8895_s3 + $0xc0] sm:$0xff]  }
 0x2f6   : > { %v7302_v21 = vcombine.high %v941_v13, %v953_v14  ;;  %v7304_v22 = vcombine.high %v942_v15, %v954_v18  ;;  %v978_v27 = vld [vmem:[%s7792_s15 + $0x15b8] sm:$0xff]  ;;  %v7301_v28 = vcombine.low %v941_v13, %v953_v14  ;;  %v7303_v29 = vcombine.low %v942_v15, %v954_v18  ;;  %v1001_v31 = vld [vmem:[%s7792_s15 + $0x1670] sm:$0xff]  ;;  %v7599_v6 = vld [vmem:[%s8895_s3] sm:$0xff]  }
 0x2f7   : > { %v6113_v49 = vrot.slane %v6105_v36, %v8222_v10  ;;  %5920 = vmatpush1.bf16.msra.mxu0 %v7181_v25  ;;  %v6120_v51 = vrot.slane %v6106_v45, %v8222_v10  ;;  %6002 = vmatpush1.bf16.msra.mxu1 %v7183_v33  ;;  %v7326_v25 = vcombine.high %v965_v23, %v977_v24  ;;  %v990_v33 = vld [vmem:[%s7792_s15 + $0x1618] sm:$0xff]  ;;  %v1025_v45 = vld [vmem:[%s7792_s15 + $0x1730] sm:$0xff]  ;;  %v7600_v7 = vld [vmem:[%s8895_s3 + $0x80] sm:$0xff]  }
 0x2f8   : > { %5921 = vmatprep.subr.bf16.mxu0 %v7206_v35  ;;  %6003 = vmatprep.subr.bf16.mxu1 %v7208_v39  ;;  %v7328_v41 = vcombine.high %v966_v26, %v978_v27  ;;  %v1002_v35 = vld [vmem:[%s7792_s15 + $0x1678] sm:$0xff]  ;;  %v7325_v36 = vcombine.low %v965_v23, %v977_v24  ;;  %v7327_v38 = vcombine.low %v966_v26, %v978_v27  ;;  %v7601_v8 = vld [vmem:[%s8895_s3 + $0x48] sm:$0xff]   ;;  %v7606_v13 = vld [vmem:[%s8895_s3 + $0xd0] sm:$0xff]  }
 0x2f9   : > { %v6121_v58 = vcombine.low %v6113_v49, %v6120_v51  ;;  %v7350_v39 = vcombine.high %v989_v30, %v1001_v31  ;;  %v7352_v40 = vcombine.high %v990_v33, %v1002_v35  ;;  %v7349_v49 = vcombine.low %v989_v30, %v1001_v31  ;;  %v1038_v55 = vld [vmem:[%s7792_s15 + $0x1798] sm:$0xff]  ;;  %v7607_v14 = vld [vmem:[%s8895_s3 + $0x10] sm:$0xff]   ;;  %v7616_v23 = vld [vmem:[%s8895_s3 + $0xa0] sm:$0xff]  }
 0x2fa   : > { %v7374_v51 = vcombine.high %v1013_v44, %v1025_v45  ;;  %v1050_v56 = vld [vmem:[%s7792_s15 + $0x17f8] sm:$0xff]  ;;  %v7375_v59 = vcombine.low %v1014_v46, %v1026_v48  ;;  %v7608_v15 = vld [vmem:[%s8895_s3 + $0x90] sm:$0xff]   ;;  %v7617_v24 = vld [vmem:[%s8895_s3 + $0x68] sm:$0xff]  }
 0x2fb   : > { %5922 = vmatpush1.bf16.msra.mxu0 %v7205_v50  ;;  %6165 = vst [vmem:[%s8236_s29 + $0x18] sm:$0xff] %v6121_v58  ;;  %6004 = vmatpush1.bf16.msra.mxu1 %v7207_v52  ;;  %v7351_v50 = vcombine.low %v990_v33, %v1002_v35  ;;  %v7376_v52 = vcombine.high %v1014_v46, %v1026_v48  ;;  %v7609_v18 = vld [vmem:[%s8895_s3 + $0x58] sm:$0xff]   ;;  %v7618_v26 = vld [vmem:[%s8895_s3 + $0xe8] sm:$0xff]   ;;  %v7624_v30 = vld [vmem:[%s8895_s3 + $0xb0] sm:$0xff]  }
 0x2fc   : > { %5923 = vmatprep.subr.bf16.mxu0 %v7230_v53  ;;  %6005 = vmatprep.subr.bf16.mxu1 %v7232_v54  ;;  %v1037_v53 = vld [vmem:[%s7792_s15 + $0x1790] sm:$0xff]  ;;  %v7373_v58 = vcombine.low %v1013_v44, %v1025_v45  ;;  %v7619_v27 = vld [vmem:[%s8895_s3 + $0x28] sm:$0xff]   ;;  %v7625_v31 = vld [vmem:[%s8895_s3 + $0x78] sm:$0xff]  }
 0x2fd   : > { %v1049_v54 = vld [vmem:[%s7792_s15 + $0x17f0] sm:$0xff]  ;;  %v7626_v33 = vld [vmem:[%s8895_s3 + $0xf8] sm:$0xff]   ;;  %s7635_s15 = scalar_lea.vmem %s7634_s14, 1536 }
 0x2fe   : > { %v7398_v60 = vcombine.high %v1037_v53, %v1049_v54  ;;  %v7627_v35 = vld [vmem:[%s8895_s3 + $0x38] sm:$0xff]  }
 0x2ff   : > { %5924 = vmatpush1.bf16.msra.mxu0 %v7229_v63  ;;  %6006 = vmatpush1.bf16.msra.mxu1 %v7231_v1  ;;  %v7400_v63 = vcombine.high %v1038_v55, %v1050_v56  ;;  %v7397_v1 = vcombine.low %v1037_v53, %v1049_v54 }
 0x300   : > { %5925 = vmatprep.subr.bf16.mxu0 %v7254_v3  ;;  %6007 = vmatprep.subr.bf16.mxu1 %v7256_v4  ;;  %v7399_v3 = vcombine.low %v1038_v55, %v1050_v56  ;;  %v7597_v4 = vld [vmem:[%s8895_s3 + $0x40] sm:$0xff]  }
 0x303   : > { %5926 = vmatpush1.bf16.msra.mxu0 %v7253_v9  ;;  %6008 = vmatpush1.bf16.msra.mxu1 %v7255_v2  ;;  %v7602_v9 = vld [vmem:[%s8895_s3 + $0xc8] sm:$0xff]  }
 0x304   : > { %5927 = vmatprep.subr.bf16.mxu0 %v7278_v11  ;;  %6009 = vmatprep.subr.bf16.mxu1 %v7280_v12  ;;  %v7603_v2 = vld [vmem:[%s8895_s3 + $0x8] sm:$0xff]   ;;  %v7605_v12 = vld [vmem:[%s8895_s3 + $0x50] sm:$0xff]  }
 0x305   : > { %v7604_v11 = vld [vmem:[%s8895_s3 + $0x88] sm:$0xff]  }
 0x307   : > { %5928 = vmatpush1.bf16.msra.mxu0 %v7277_v19  ;;  %6010 = vmatpush1.bf16.msra.mxu1 %v7279_v20  ;;  %v7612_v19 = vld [vmem:[%s8895_s3 + $0x98] sm:$0xff]   ;;  %v7613_v20 = vld [vmem:[%s8895_s3 + $0x60] sm:$0xff]  }
 0x308   : > { %5929 = vmatprep.subr.bf16.mxu0 %v7302_v21  ;;  %6011 = vmatprep.subr.bf16.mxu1 %v7304_v22  ;;  %v7614_v21 = vld [vmem:[%s8895_s3 + $0xe0] sm:$0xff]  }
 0x309   : > { %v7615_v22 = vld [vmem:[%s8895_s3 + $0x20] sm:$0xff]  }
 0x30b   : > { %5930 = vmatpush1.bf16.msra.mxu0 %v7301_v28  ;;  %6012 = vmatpush1.bf16.msra.mxu1 %v7303_v29  ;;  %v7620_v28 = vld [vmem:[%s8895_s3 + $0xa8] sm:$0xff]   ;;  %v7621_v29 = vld [vmem:[%s8895_s3 + $0x70] sm:$0xff]  }
 0x30c   : > { %5931 = vmatprep.subr.bf16.mxu0 %v7326_v25  ;;  %6013 = vmatprep.subr.bf16.mxu1 %v7328_v41  ;;  %v7622_v25 = vld [vmem:[%s8895_s3 + $0xf0] sm:$0xff]  }
 0x30d   : > { %v7623_v41 = vld [vmem:[%s8895_s3 + $0x30] sm:$0xff]  }
 0x30f   : > { %5932 = vmatpush1.bf16.msra.mxu0 %v7325_v36  ;;  %6014 = vmatpush1.bf16.msra.mxu1 %v7327_v38  ;;  %v7628_v36 = vld [vmem:[%s8895_s3 + $0xb8] sm:$0xff]   ;;  %v1053_v38 = vld [vmem:[%s8183_s20 + $0x10] sm:$0xff]  ;;  %s7437_s20 = smul.u32 768, %s7752_s25  ;;  %s7629_s25 = scalar_lea.vmem %s8842_s19, 768 }
 0x310   : > { %5933 = vmatprep.subr.bf16.mxu0 %v7350_v39  ;;  %6015 = vmatprep.subr.bf16.mxu1 %v7352_v40  ;;  %v1124_v39 = vrot.slane %v1053_v38, %v8188_v37  ;;  %v1132_v40 = vrot.slane %v1053_v38, %v8196_v42  ;;  %v1128_v44 = vrot.slane %v1053_v38, %v8199_v43  ;;  %p7630_p12 = scmp.ne.s32.totalorder %s8842_s19, %s7629_s25  ;;  %p7637_p2 = scmp.lt.s32.totalorder %s7635_s15, %s7629_s25 }
 0x311   : > { %v1136_v45 = vrot.slane %v1053_v38, %v8202_v47  ;;  %s8840_s10 = scalar_lea.hbm %s8898_s6, %s7437_s20 }
 0x312   : > { %p7631_p13 = pnand %p7630_p12, %p7769_p5  ;;  %p7638_p3 = por %p7637_p2, %p7636_p1 }
 0x313   : > { %5934 = vmatpush1.bf16.msra.mxu0 %v7349_v49  ;;  %6016 = vmatpush1.bf16.msra.mxu1 %v7351_v50 }
 0x314   : > { %5935 = vmatprep.subr.bf16.mxu0 %v7374_v51  ;;  %6017 = vmatprep.subr.bf16.mxu1 %v7376_v52  ;;  %p7632_p0 = pneg %p7631_p13 }
 0x316   : > { %p7639_p4 = pnand %p7638_p3, %p7632_p0 }
 0x317   : > { %5936 = vmatpush1.bf16.msra.mxu0 %v7373_v58  ;;  %6018 = vmatpush1.bf16.msra.mxu1 %v7375_v59  ;;  %v1140_v59 = vrot.slane %v1053_v38, %v8358_v57 }
 0x318   : > { %5937 = vmatprep.subr.bf16.mxu0 %v7398_v60  ;;  %6019 = vmatprep.subr.bf16.mxu1 %v7400_v63  ;;  %v1148_v60 = vrot.slane %v1053_v38, %v8363_v61  ;;  %v1144_v63 = vrot.slane %v1053_v38, %v8366_v62 }
 0x31b   : > { %5938 = vmatpush1.bf16.msra.mxu0 %v7397_v1  ;;  %6020 = vmatpush1.bf16.msra.mxu1 %v7399_v3  ;;  %v1152_v1 = vrot.slane %v1053_v38, %v8369_v0 }
 0x31c   : > { %7438 = vmatprep.subr.bf16.mxu0 %v7597_v4  ;;  %7460 = vmatprep.subr.bf16.mxu1 %v7598_v5 }
 0x31e   : > { %5940 = vmatmul.mubr.bf16.vlgmr.msra.gmra.mrb[20].mxu0 %v7945_v32  ;;  %6022 = vmatmul.mubr.bf16.vlgmr.msra.gmra.mrb[20].mxu1 %v7945_v32 }
 0x31f   : > { %7439 = vmatpush3.bf16.msra.mxu0 %v7599_v6  ;;  %7461 = vmatpush3.bf16.msra.mxu1 %v7600_v7 }
 0x320   : > { %7440 = vmatprep.subr.bf16.mxu0 %v7601_v8  ;;  %7462 = vmatprep.subr.bf16.mxu1 %v7602_v9 }
 0x321   : > { %6463 = vmatprep.mubr.bf16.mxu0 %v7801_v16  ;;  %6503 = vmatprep.mubr.bf16.mxu1 %v7879_v34  ;;  %v7610_v16 = vld [vmem:[%s8895_s3 + $0xd8] sm:$0xff]  }
 0x322   : > { %v7611_v34 = vld [vmem:[%s8895_s3 + $0x18] sm:$0xff]  }
 0x323   : > { %7441 = vmatpush3.bf16.msra.mxu0 %v7603_v2  ;;  %7463 = vmatpush3.bf16.msra.mxu1 %v7604_v11 }
 0x324   : > { %7442 = vmatprep.subr.bf16.mxu0 %v7605_v12  ;;  %7464 = vmatprep.subr.bf16.mxu1 %v7606_v13 }
 0x327   : > { %7443 = vmatpush3.bf16.msra.mxu0 %v7607_v14  ;;  %7465 = vmatpush3.bf16.msra.mxu1 %v7608_v15 }
 0x328   : > { %7444 = vmatprep.subr.bf16.mxu0 %v7609_v18  ;;  %7466 = vmatprep.subr.bf16.mxu1 %v7610_v16 }
 0x32b   : > { %7445 = vmatpush3.bf16.msra.mxu0 %v7611_v34  ;;  %7467 = vmatpush3.bf16.msra.mxu1 %v7612_v19 }
 0x32c   : > { %7446 = vmatprep.subr.bf16.mxu0 %v7613_v20  ;;  %7468 = vmatprep.subr.bf16.mxu1 %v7614_v21 }
 0x32f   : > { %7447 = vmatpush3.bf16.msra.mxu0 %v7615_v22  ;;  %7469 = vmatpush3.bf16.msra.mxu1 %v7616_v23 }
 0x330   : > { %7448 = vmatprep.subr.bf16.mxu0 %v7617_v24  ;;  %7470 = vmatprep.subr.bf16.mxu1 %v7618_v26 }
 0x333   : > { %7449 = vmatpush3.bf16.msra.mxu0 %v7619_v27  ;;  %7471 = vmatpush3.bf16.msra.mxu1 %v7620_v28 }
 0x334   : > { %7450 = vmatprep.subr.bf16.mxu0 %v7621_v29  ;;  %7472 = vmatprep.subr.bf16.mxu1 %v7622_v25 }
 0x337   : > { %7451 = vmatpush3.bf16.msra.mxu0 %v7623_v41  ;;  %7473 = vmatpush3.bf16.msra.mxu1 %v7624_v30 }
 0x338   : > { %7452 = vmatprep.subr.bf16.mxu0 %v7625_v31  ;;  %7474 = vmatprep.subr.bf16.mxu1 %v7626_v33 }
 0x33b   : > { %7453 = vmatpush3.bf16.msra.mxu0 %v7627_v35  ;;  %7475 = vmatpush3.bf16.msra.mxu1 %v7628_v36 }
 0x33e   : > { %6464 = vmatmul.mubr.bf16.vlgmr.msra.gmra.mrb[24].mxu0 %v7803_v17  ;;  %6504 = vmatmul.mubr.bf16.vlgmr.msra.gmra.mrb[24].mxu1 %v7945_v32 }
 0x371   : > { %v5777_v46 = vpop.f32.mrb[16].mxu0  ;;  %v5859_v49 = vpop.f32.mrb[16].mxu1 }
 0x372   : > { %v7498_v48 = vadd.f32 %v5777_v46, %v1124_v39  ;;  %v5779_v50 = vpop.f32.mrb[17].mxu0  ;;  %v7500_v51 = vadd.f32 %v5859_v49, %v1132_v40  ;;  %v5861_v53 = vpop.f32.mrb[17].mxu1 }
 0x373   : > { %v7499_v52 = vadd.f32 %v5779_v50, %v1128_v44  ;;  %v5781_v17 = vpop.f32.mrb[18].mxu0  ;;  %v7501_v54 = vadd.f32 %v5861_v53, %v1136_v45  ;;  %v5863_v32 = vpop.f32.mrb[18].mxu1 }
 0x374   : > { %v5782_v55 = vpop.f32.mrb[19].mxu0  ;;  %v5864_v37 = vpop.f32.mrb[19].mxu1 }
 0x375   : > { %v6122_v56 = vcombine.low %v7498_v48, %v7499_v52  ;;  %v6123_v58 = vcombine.low %v7500_v51, %v7501_v54 }
 0x377   : > { %v6130_v42 = vrot.slane %v6122_v56, %v8222_v10  ;;  %v6137_v43 = vrot.slane %v6123_v58, %v8222_v10 }
 0x379   : > { %v6138_v47 = vcombine.low %v6130_v42, %v6137_v43 }
 0x37b   : > { %6166 = vst [vmem:[%s8236_s29 + $0x20] sm:$0xff] %v6138_v47 }
 0x3f1   : > { %v5941_v3 = vpop.f32.mrb[20].mxu0  ;;  %v6023_v5 = vpop.f32.mrb[20].mxu1 }
 0x3f2   : > { %v7502_v4 = vadd.f32 %v5941_v3, %v1140_v59  ;;  %v5943_v6 = vpop.f32.mrb[21].mxu0  ;;  %v7504_v7 = vadd.f32 %v6023_v5, %v1148_v60  ;;  %v6025_v9 = vpop.f32.mrb[21].mxu1 }
 0x3f3   : > { %v7503_v8 = vadd.f32 %v5943_v6, %v1144_v63  ;;  %v5945_v2 = vpop.f32.mrb[22].mxu0  ;;  %v7505_v11 = vadd.f32 %v6025_v9, %v1152_v1  ;;  %v6027_v57 = vpop.f32.mrb[22].mxu1 }
 0x3f4   : > { %v5946_v61 = vpop.f32.mrb[23].mxu0  ;;  %v6028_v62 = vpop.f32.mrb[23].mxu1 }
 0x3f5   : > { %v6139_v12 = vcombine.low %v7502_v4, %v7503_v8  ;;  %v6140_v13 = vcombine.low %v7504_v7, %v7505_v11 }
 0x3f7   : > { %v6147_v0 = vrot.slane %v6139_v12, %v8222_v10  ;;  %v6154_v14 = vrot.slane %v6140_v13, %v8222_v10 }
 0x3f9   : > { %v6155_v15 = vcombine.low %v6147_v0, %v6154_v14 }
 0x3fb   : > { %6167 = vst [vmem:[%s8236_s29 + $0x28] sm:$0xff] %v6155_v15 }
 0x3fc   : > { %7642 = shalt.err (!%p7639_p4)
}
 0x3fd   : > { %s7643_s26 = scalar_lea.hbm %s8840_s10, 768  ;;  %s7647_s17 = scalar_lea.hbm %s8898_s6, 3072 }
 0x3fe   : > { %p7644_p7 = scmp.ne.s32.totalorder %s8840_s10, %s7643_s26  ;;  %p7648_p10 = scmp.lt.u32.totalorder %s8840_s10, %s8898_s6 }
 0x3ff   : > { %p7649_p11 = scmp.lt.u32.totalorder %s7647_s17, %s7643_s26  ;;  %p7651_p13 = scmp.lt.u32.totalorder %s7643_s26, %s8840_s10 }
 0x400   : > { %p7645_p8 = pnand %p7644_p7, %p7769_p5 }
 0x401   : > { %p7650_p12 = por %p7649_p11, %p7648_p10 }
 0x402   : > { %p7646_p9 = pneg %p7645_p8 }
 0x403   : > { %p7652_p0 = por %p7651_p13, %p7650_p12 }
 0x405   : > { %p7653_p1 = pnand %p7652_p0, %p7646_p9 }
 0x407   : > { %7656 = shalt.err (!%p7653_p1)
}
 0x408   : > { %7556 = dma.vmem_to_hbm [thread:$0]  (%p7769_p5), %s8842_s19, 768, %s8840_s10, %s6517_s12   ;;  %v7401_v16 = vld [vmem:[%s8896_s4] ss:$0 sm:$0xff] }
 0x409   : > { %s6631_s25 = sshll.u32 %s7784_s11, 1 }
 0x40a   : > { %s279_s19 = scalar_lea.vmem %s8897_s5, %s6631_s25 }
 0x411   : > { %v7454_v10 = vpop.f32.mrb[24].mxu0  ;;  %v7476_v18 = vpop.f32.mrb[24].mxu1 }
 0x412   : > { %v7455_v34 = vpop.f32.mrb[25].mxu0  ;;  %v7477_v20 = vpop.f32.mrb[25].mxu1 }
 0x413   : > { %v7456_v19 = vadd.f32 %v7455_v34, %v7454_v10  ;;  %v7457_v21 = vpop.f32.mrb[26].mxu0  ;;  %v7478_v22 = vadd.f32 %v7477_v20, %v7476_v18  ;;  %v7479_v23 = vpop.f32.mrb[26].mxu1 }
 0x414   : > { %v7458_v24 = vpop.f32.mrb[27].mxu0  ;;  %v7480_v27 = vpop.f32.mrb[27].mxu1 }
 0x415   : > { %v6466_v26 = vadd.f32 %v7456_v19, %v7401_v16 }
 0x417   : > { %v6506_v28 = vadd.f32 %v7478_v22, %v6466_v26 }
 0x419   : > { %6511 = vst [vmem:[%s279_s19] sm:$0x3] %v6506_v28 }
 0x41a PF: > { %p7562_p5 = scmp.ge.s32.totalorder %s7691_s24, 2  ;;  %s6553_s10 = sand.u32 1, %s7679_s21  }
 0x41b   : > { %s6554_s11 = scalar_lea.sflag [#allocation3], %s6553_s10 }
 0x41c   : > { %p7559_p2 = pnand %p7562_p5, %p7773_p6 }
 0x41e   : > { %7674 = dma.done.wait (!%p7559_p2), %s6554_s11, 768  }
 0x41f   : > { %7676 = vsyncadd (!%p7559_p2), %s6554_s11, 4294966528  ;;  %p17_p3 = scmp.ge.s32.totalorder %s7756_s27, 6   ;;  %s8902_s21 = smov %s7683_s22 }
 0x420   : > { %s8903_s22 = smov %s7687_s23  ;;  %s8904_s23 = smov %s7767_s30 }
 0x421   : > { %s8905_s24 = smov %s7756_s27  ;;  %19 = sbr.rel (!%p17_p3) target bundleno = 3 (0x3), region = 90 }
 0x428   :  { %6559 = vsyncpa [#allocation3], 1 }
 0x429   :  { %6561 = vsyncpa [#allocation3 + $0x1], 1 }

</bundles_post_ra>
